<compile_context>
chip_gen: v7x
topology: tpu7x:2x2x1
jax: 0.10.0
libtpu: 0.0.40
codegen_flags: <defaults>
</compile_context>

<pallas_src>
import math

import jax
import jax.numpy as jnp
from jax import lax
from jax.experimental import pallas as pl
from jax.experimental.pallas import tpu as pltpu

SHARED_DEPTH = 512  # fixed by the PyTorch module (conv_shared out channels)


def _make_rpn_kernel(Wp, TILE_H, NBLK, A):
    """Build the per-batch kernel (all tiling constants are static Python ints)."""
    TM = TILE_H * Wp          # matmul M per row block
    NCLS = 2 * A

    def kernel(xf_ref, wsh_ref, bsh_ref, whead_ref, bhead_ref, out_ref):
        # ---- hoisted bias loads + broadcasts (once, reused by every block) ----
        bias_sh = jnp.broadcast_to(bsh_ref[...], (TM, SHARED_DEPTH))       # (TM, 512) f32
        bias_hd = jnp.broadcast_to(bhead_ref[...], (TM, 8 * A))            # (TM, 8A) f32

        # Static Python loop over row blocks: NBLK is small and all slab offsets are
        # compile-time constants (best lowering for the shifted slices).
        for blk in range(NBLK):
            r0 = blk * TM

            # ---- conv_shared: 3x3 conv as 9 shifted contiguous slabs (f32 acc) ----
            acc = bias_sh
            for ky in range(3):
                for kx in range(3):
                    off = r0 + ky * Wp + kx
                    slab = xf_ref[pl.ds(off, TM), :]                       # (TM, C) bf16
                    acc = acc + jnp.dot(slab, wsh_ref[3 * ky + kx],
                                        preferred_element_type=jnp.float32)
            shared = jnp.maximum(acc, 0.0).astype(jnp.bfloat16)            # bias+ReLU

            # ---- fused 1x1 heads: columns = [class | class_swapped | bbox] ----
            head = jnp.dot(shared, whead_ref[...],
                           preferred_element_type=jnp.float32) + bias_hd   # (TM, 8A) f32
            logits = head[:, 0:NCLS]
            logits_sw = head[:, NCLS:2 * NCLS]
            bbox = head[:, 2 * NCLS:]

            # ---- pairwise (bg, fg) softmax == sigmoid(logit - partner), stable ----
            z = logits - logits_sw
            ed = jnp.exp(-jnp.abs(z))
            den = 1.0 + ed
            r = pl.reciprocal(den, approx=True)
            r = r * (2.0 - den * r)                 # one Newton step -> ~f32 accuracy
            probs = jnp.where(z >= 0.0, r, 1.0 - r)

            # Single packed, full-width, offset-0-lane store per block.
            packed = jnp.concatenate([logits, probs, bbox], axis=-1)       # (TM, 8A) f32
            out_ref[pl.ds(r0, TM), :] = packed

    return kernel


def _pick_tile_h(H, Wp, cap=512):
    """Largest TILE_H dividing H with TILE_H*Wp <= cap, preferring TM % 8 == 0."""
    best_aligned, best_any = None, None
    for t in range(1, H + 1):
        if H % t == 0 and t * Wp <= cap:
            best_any = t
            if (t * Wp) % 8 == 0:
                best_aligned = t
    if best_aligned is not None:
        return best_aligned
    if best_any is not None:
        return best_any
    return 1


def rpn_forward(x_nchw, params, anchors_per_location, anchor_stride=1):
    assert anchor_stride == 1, "kernel implements the typical anchor_stride=1"
    B, C, H, W = x_nchw.shape
    A = anchors_per_location
    x = jnp.transpose(x_nchw, (0, 2, 3, 1)).astype(jnp.float32)            # NCHW -> NHWC

    # SamePad2d(kernel=3, stride=1): symmetric 1-pixel pad.
    k, s = 3, anchor_stride
    pad_h = (math.ceil(H / s) - 1) * s + k - H
    pad_w = (math.ceil(W / s) - 1) * s + k - W
    pt, pb = pad_h // 2, pad_h - pad_h // 2
    plft, prt = pad_w // 2, pad_w - pad_w // 2
    xp = jnp.pad(x, ((0, 0), (pt, pb), (plft, prt), (0, 0)))
    Hp, Wp = H + pt + pb, W + plft + prt

    # Flatten spatially; add a few extra zero rows so the last block's shifted slabs
    # stay in bounds (those rows only ever feed the discarded junk columns).
    xf = xp.reshape(B, Hp * Wp, C)
    need = Hp * Wp + 2
    NF = -(-need // 8) * 8
    xf = jnp.pad(xf, ((0, 0), (0, NF - Hp * Wp), (0, 0))).astype(jnp.bfloat16)

    # ---- wrapper-side weight packing (pure glue, plain JAX) ----
    wsh = params["w_shared"].reshape(9, C, SHARED_DEPTH).astype(jnp.bfloat16)
    bsh = params["b_shared"].astype(jnp.float32)                           # (1, 512)
    wcls = params["w_class"]                                               # (512, 2A)
    wcls_sw = wcls.reshape(SHARED_DEPTH, A, 2)[:, :, ::-1].reshape(SHARED_DEPTH, 2 * A)
    whead = jnp.concatenate([wcls, wcls_sw, params["w_bbox"]],
                            axis=1).astype(jnp.bfloat16)                   # (512, 8A)
    bcls = params["b_class"]
    bcls_sw = bcls.reshape(1, A, 2)[:, :, ::-1].reshape(1, 2 * A)
    bhead = jnp.concatenate([bcls, bcls_sw, params["b_bbox"]],
                            axis=1).astype(jnp.float32)                    # (1, 8A)

    TILE_H = _pick_tile_h(H, Wp, cap=512)
    NBLK = H // TILE_H
    M2 = H * Wp                                   # computed output rows (incl. junk cols)

    kernel = _make_rpn_kernel(Wp, TILE_H, NBLK, A)

    grid_spec = pltpu.PrefetchScalarGridSpec(
        num_scalar_prefetch=0,
        grid=(B,),
        in_specs=[
            pl.BlockSpec((None, NF, C), lambda b: (b, 0, 0)),              # flat padded image
            pl.BlockSpec((9, C, SHARED_DEPTH), lambda b: (0, 0, 0)),       # conv_shared weights
            pl.BlockSpec((1, SHARED_DEPTH), lambda b: (0, 0)),             # conv_shared bias
            pl.BlockSpec((SHARED_DEPTH, 8 * A), lambda b: (0, 0)),         # fused head weights
            pl.BlockSpec((1, 8 * A), lambda b: (0, 0)),                    # fused head bias
        ],
        out_specs=pl.BlockSpec((None, M2, 8 * A), lambda b: (b, 0, 0)),    # packed output
    )

    packed = pl.pallas_call(
        kernel,
        out_shape=jax.ShapeDtypeStruct((B, M2, 8 * A), jnp.float32),
        grid_spec=grid_spec,
        compiler_params=pltpu.CompilerParams(dimension_semantics=("parallel",)),
    )(xf, wsh, bsh, whead, bhead)

    # Strip the 2 junk columns per row, split the packed columns, then
    # PyTorch-order reshapes (pure glue).
    pk = packed.reshape(B, H, Wp, 8 * A)[:, :, :W, :]
    logits = pk[..., 0:2 * A].reshape(B, H * W * A, 2)
    probs = pk[..., 2 * A:4 * A].reshape(B, H * W * A, 2)
    bbox = pk[..., 4 * A:8 * A].reshape(B, H * W * A, 4)
    return [logits, probs, bbox]


def init_params(key, depth, anchors_per_location):
    # NOTE: weights are kept in matmul-friendly layouts (HWIO / (512, N)); mapping
    # real PyTorch OIHW Conv2d weights requires an explicit transpose by the caller.
    A = anchors_per_location
    ks = jax.random.split(key, 6)
    scale = 0.05
    return {
        "w_shared": scale * jax.random.normal(ks[0], (3, 3, depth, SHARED_DEPTH), jnp.float32),
        "b_shared": scale * jax.random.normal(ks[1], (1, SHARED_DEPTH), jnp.float32),
        "w_class": scale * jax.random.normal(ks[2], (SHARED_DEPTH, 2 * A), jnp.float32),
        "b_class": scale * jax.random.normal(ks[3], (1, 2 * A), jnp.float32),
        "w_bbox": scale * jax.random.normal(ks[4], (SHARED_DEPTH, 4 * A), jnp.float32),
        "b_bbox": scale * jax.random.normal(ks[5], (1, 4 * A), jnp.float32),
    }


def rpn_reference(x_nchw, params, anchors_per_location):
    """Plain-JAX f32 reference matching the PyTorch forward (for verification)."""
    A = anchors_per_location
    x = jnp.transpose(x_nchw, (0, 2, 3, 1)).astype(jnp.float32)
    B, H, W, _ = x.shape
    xp = jnp.pad(x, ((0, 0), (1, 1), (1, 1), (0, 0)))
    shared = lax.conv_general_dilated(
        xp, params["w_shared"], window_strides=(1, 1), padding="VALID",
        dimension_numbers=("NHWC", "HWIO", "NHWC"))
    shared = jax.nn.relu(shared + params["b_shared"].reshape(1, 1, 1, -1))
    logits = jnp.tensordot(shared, params["w_class"], axes=1) + params["b_class"].reshape(1, 1, 1, -1)
    bbox = jnp.tensordot(shared, params["w_bbox"], axes=1) + params["b_bbox"].reshape(1, 1, 1, -1)
    logits = logits.reshape(B, H * W * A, 2)
    probs = jax.nn.softmax(logits, axis=2)
    bbox = bbox.reshape(B, H * W * A, 4)
    return [logits, probs, bbox]


if __name__ == "__main__":
    import numpy as np

    B, depth, H, W = 2, 4, 16, 16          # small NCHW input, like PyTorch
    anchors_per_location, anchor_stride = 3, 1

    key = jax.random.PRNGKey(0)
    kx, kp = jax.random.split(key)
    x = jax.random.normal(kx, (B, depth, H, W), jnp.float32)
    params = init_params(kp, depth, anchors_per_location)

    outs = rpn_forward(x, params, anchors_per_location, anchor_stride)
    outs = jax.block_until_ready(outs)

    refs = rpn_reference(x, params, anchors_per_location)
    # Tolerance reflects the intentional bf16 matmul inputs (f32 accumulation).
    for got, want in zip(outs, refs):
        np.testing.assert_allclose(np.asarray(got), np.asarray(want),
                                   rtol=3e-2, atol=3e-2)

    print("KERNEL_OK")
</pallas_src>

<mosaic_0001>
module attributes {stable_mosaic.version = 11 : i64} {
  func.func @kernel(%arg0: i32, %arg1: memref<1x328x4xbf16, #tpu.memory_space<vmem>>, %arg2: memref<9x4x512xbf16, #tpu.memory_space<vmem>>, %arg3: memref<1x512xf32, #tpu.memory_space<vmem>>, %arg4: memref<512x24xbf16, #tpu.memory_space<vmem>>, %arg5: memref<1x24xf32, #tpu.memory_space<vmem>>, %arg6: memref<1x288x24xf32, #tpu.memory_space<vmem>>) attributes {dimension_semantics = [#tpu.dimension_semantics<parallel>], iteration_bounds = array<i64: 2>, scalar_prefetch = 0 : i64, scratch_operands = 0 : i64, tpu.core_type = #tpu.core_type<tc>, window_params = [{transform_indices = @transform_0, window_bounds = array<i64: 1, 328, 4>}, {pipeline_mode = #tpu.pipeline_mode<synchronous>, transform_indices = @transform_1, window_bounds = array<i64: 9, 4, 512>}, {pipeline_mode = #tpu.pipeline_mode<synchronous>, transform_indices = @transform_2, window_bounds = array<i64: 1, 512>}, {pipeline_mode = #tpu.pipeline_mode<synchronous>, transform_indices = @transform_3, window_bounds = array<i64: 512, 24>}, {pipeline_mode = #tpu.pipeline_mode<synchronous>, transform_indices = @transform_4, window_bounds = array<i64: 1, 24>}, {transform_indices = @transform_5, window_bounds = array<i64: 1, 288, 24>}]} {
    %c0 = arith.constant 0 : index
    %c0_0 = arith.constant 0 : index
    %0 = vector.load %arg3[%c0, %c0_0] : memref<1x512xf32, #tpu.memory_space<vmem>>, vector<1x512xf32>
    %1 = vector.shape_cast %0 : vector<1x512xf32> to vector<1x512xf32>
    %2 = vector.broadcast %1 : vector<1x512xf32> to vector<288x512xf32>
    %c0_1 = arith.constant 0 : index
    %c0_2 = arith.constant 0 : index
    %3 = vector.load %arg5[%c0_1, %c0_2] : memref<1x24xf32, #tpu.memory_space<vmem>>, vector<1x24xf32>
    %4 = vector.shape_cast %3 : vector<1x24xf32> to vector<1x24xf32>
    %5 = vector.broadcast %4 : vector<1x24xf32> to vector<288x24xf32>
    %c0_3 = arith.constant 0 : index
    %c0_4 = arith.constant 0 : index
    %c0_5 = arith.constant 0 : index
    %6 = vector.load %arg1[%c0_3, %c0_4, %c0_5] : memref<1x328x4xbf16, #tpu.memory_space<vmem>>, vector<1x288x4xbf16>
    %7 = vector.shape_cast %6 : vector<1x288x4xbf16> to vector<288x4xbf16>
    %c0_6 = arith.constant 0 : index
    %c0_7 = arith.constant 0 : index
    %c0_8 = arith.constant 0 : index
    %8 = vector.load %arg2[%c0_6, %c0_7, %c0_8] : memref<9x4x512xbf16, #tpu.memory_space<vmem>>, vector<1x4x512xbf16>
    %9 = vector.shape_cast %8 : vector<1x4x512xbf16> to vector<4x512xbf16>
    %cst = arith.constant dense<0.000000e+00> : vector<288x512xf32>
    %10 = tpu.matmul %7, %9, %cst {dimension_numbers = #tpu.dot_dimension_numbers<[1], [0], [0], [1], [0, 0, 1, 1], [], []>} : vector<288x4xbf16>, vector<4x512xbf16>, vector<288x512xf32> -> vector<288x512xf32>
    %11 = arith.addf %2, %10 : vector<288x512xf32>
    %c0_9 = arith.constant 0 : index
    %c1 = arith.constant 1 : index
    %c0_10 = arith.constant 0 : index
    %12 = vector.load %arg1[%c0_9, %c1, %c0_10] : memref<1x328x4xbf16, #tpu.memory_space<vmem>>, vector<1x288x4xbf16>
    %13 = vector.shape_cast %12 : vector<1x288x4xbf16> to vector<288x4xbf16>
    %c1_11 = arith.constant 1 : index
    %c0_12 = arith.constant 0 : index
    %c0_13 = arith.constant 0 : index
    %14 = vector.load %arg2[%c1_11, %c0_12, %c0_13] : memref<9x4x512xbf16, #tpu.memory_space<vmem>>, vector<1x4x512xbf16>
    %15 = vector.shape_cast %14 : vector<1x4x512xbf16> to vector<4x512xbf16>
    %cst_14 = arith.constant dense<0.000000e+00> : vector<288x512xf32>
    %16 = tpu.matmul %13, %15, %cst_14 {dimension_numbers = #tpu.dot_dimension_numbers<[1], [0], [0], [1], [0, 0, 1, 1], [], []>} : vector<288x4xbf16>, vector<4x512xbf16>, vector<288x512xf32> -> vector<288x512xf32>
    %17 = arith.addf %11, %16 : vector<288x512xf32>
    %c0_15 = arith.constant 0 : index
    %c2 = arith.constant 2 : index
    %c0_16 = arith.constant 0 : index
    %18 = vector.load %arg1[%c0_15, %c2, %c0_16] : memref<1x328x4xbf16, #tpu.memory_space<vmem>>, vector<1x288x4xbf16>
    %19 = vector.shape_cast %18 : vector<1x288x4xbf16> to vector<288x4xbf16>
    %c2_17 = arith.constant 2 : index
    %c0_18 = arith.constant 0 : index
    %c0_19 = arith.constant 0 : index
    %20 = vector.load %arg2[%c2_17, %c0_18, %c0_19] : memref<9x4x512xbf16, #tpu.memory_space<vmem>>, vector<1x4x512xbf16>
    %21 = vector.shape_cast %20 : vector<1x4x512xbf16> to vector<4x512xbf16>
    %cst_20 = arith.constant dense<0.000000e+00> : vector<288x512xf32>
    %22 = tpu.matmul %19, %21, %cst_20 {dimension_numbers = #tpu.dot_dimension_numbers<[1], [0], [0], [1], [0, 0, 1, 1], [], []>} : vector<288x4xbf16>, vector<4x512xbf16>, vector<288x512xf32> -> vector<288x512xf32>
    %23 = arith.addf %17, %22 : vector<288x512xf32>
    %c0_21 = arith.constant 0 : index
    %c18 = arith.constant 18 : index
    %c0_22 = arith.constant 0 : index
    %24 = vector.load %arg1[%c0_21, %c18, %c0_22] : memref<1x328x4xbf16, #tpu.memory_space<vmem>>, vector<1x288x4xbf16>
    %25 = vector.shape_cast %24 : vector<1x288x4xbf16> to vector<288x4xbf16>
    %c3 = arith.constant 3 : index
    %c0_23 = arith.constant 0 : index
    %c0_24 = arith.constant 0 : index
    %26 = vector.load %arg2[%c3, %c0_23, %c0_24] : memref<9x4x512xbf16, #tpu.memory_space<vmem>>, vector<1x4x512xbf16>
    %27 = vector.shape_cast %26 : vector<1x4x512xbf16> to vector<4x512xbf16>
    %cst_25 = arith.constant dense<0.000000e+00> : vector<288x512xf32>
    %28 = tpu.matmul %25, %27, %cst_25 {dimension_numbers = #tpu.dot_dimension_numbers<[1], [0], [0], [1], [0, 0, 1, 1], [], []>} : vector<288x4xbf16>, vector<4x512xbf16>, vector<288x512xf32> -> vector<288x512xf32>
    %29 = arith.addf %23, %28 : vector<288x512xf32>
    %c0_26 = arith.constant 0 : index
    %c19 = arith.constant 19 : index
    %c0_27 = arith.constant 0 : index
    %30 = vector.load %arg1[%c0_26, %c19, %c0_27] : memref<1x328x4xbf16, #tpu.memory_space<vmem>>, vector<1x288x4xbf16>
    %31 = vector.shape_cast %30 : vector<1x288x4xbf16> to vector<288x4xbf16>
    %c4 = arith.constant 4 : index
    %c0_28 = arith.constant 0 : index
    %c0_29 = arith.constant 0 : index
    %32 = vector.load %arg2[%c4, %c0_28, %c0_29] : memref<9x4x512xbf16, #tpu.memory_space<vmem>>, vector<1x4x512xbf16>
    %33 = vector.shape_cast %32 : vector<1x4x512xbf16> to vector<4x512xbf16>
    %cst_30 = arith.constant dense<0.000000e+00> : vector<288x512xf32>
    %34 = tpu.matmul %31, %33, %cst_30 {dimension_numbers = #tpu.dot_dimension_numbers<[1], [0], [0], [1], [0, 0, 1, 1], [], []>} : vector<288x4xbf16>, vector<4x512xbf16>, vector<288x512xf32> -> vector<288x512xf32>
    %35 = arith.addf %29, %34 : vector<288x512xf32>
    %c0_31 = arith.constant 0 : index
    %c20 = arith.constant 20 : index
    %c0_32 = arith.constant 0 : index
    %36 = vector.load %arg1[%c0_31, %c20, %c0_32] : memref<1x328x4xbf16, #tpu.memory_space<vmem>>, vector<1x288x4xbf16>
    %37 = vector.shape_cast %36 : vector<1x288x4xbf16> to vector<288x4xbf16>
    %c5 = arith.constant 5 : index
    %c0_33 = arith.constant 0 : index
    %c0_34 = arith.constant 0 : index
    %38 = vector.load %arg2[%c5, %c0_33, %c0_34] : memref<9x4x512xbf16, #tpu.memory_space<vmem>>, vector<1x4x512xbf16>
    %39 = vector.shape_cast %38 : vector<1x4x512xbf16> to vector<4x512xbf16>
    %cst_35 = arith.constant dense<0.000000e+00> : vector<288x512xf32>
    %40 = tpu.matmul %37, %39, %cst_35 {dimension_numbers = #tpu.dot_dimension_numbers<[1], [0], [0], [1], [0, 0, 1, 1], [], []>} : vector<288x4xbf16>, vector<4x512xbf16>, vector<288x512xf32> -> vector<288x512xf32>
    %41 = arith.addf %35, %40 : vector<288x512xf32>
    %c0_36 = arith.constant 0 : index
    %c36 = arith.constant 36 : index
    %c0_37 = arith.constant 0 : index
    %42 = vector.load %arg1[%c0_36, %c36, %c0_37] : memref<1x328x4xbf16, #tpu.memory_space<vmem>>, vector<1x288x4xbf16>
    %43 = vector.shape_cast %42 : vector<1x288x4xbf16> to vector<288x4xbf16>
    %c6 = arith.constant 6 : index
    %c0_38 = arith.constant 0 : index
    %c0_39 = arith.constant 0 : index
    %44 = vector.load %arg2[%c6, %c0_38, %c0_39] : memref<9x4x512xbf16, #tpu.memory_space<vmem>>, vector<1x4x512xbf16>
    %45 = vector.shape_cast %44 : vector<1x4x512xbf16> to vector<4x512xbf16>
    %cst_40 = arith.constant dense<0.000000e+00> : vector<288x512xf32>
    %46 = tpu.matmul %43, %45, %cst_40 {dimension_numbers = #tpu.dot_dimension_numbers<[1], [0], [0], [1], [0, 0, 1, 1], [], []>} : vector<288x4xbf16>, vector<4x512xbf16>, vector<288x512xf32> -> vector<288x512xf32>
    %47 = arith.addf %41, %46 : vector<288x512xf32>
    %c0_41 = arith.constant 0 : index
    %c37 = arith.constant 37 : index
    %c0_42 = arith.constant 0 : index
    %48 = vector.load %arg1[%c0_41, %c37, %c0_42] : memref<1x328x4xbf16, #tpu.memory_space<vmem>>, vector<1x288x4xbf16>
    %49 = vector.shape_cast %48 : vector<1x288x4xbf16> to vector<288x4xbf16>
    %c7 = arith.constant 7 : index
    %c0_43 = arith.constant 0 : index
    %c0_44 = arith.constant 0 : index
    %50 = vector.load %arg2[%c7, %c0_43, %c0_44] : memref<9x4x512xbf16, #tpu.memory_space<vmem>>, vector<1x4x512xbf16>
    %51 = vector.shape_cast %50 : vector<1x4x512xbf16> to vector<4x512xbf16>
    %cst_45 = arith.constant dense<0.000000e+00> : vector<288x512xf32>
    %52 = tpu.matmul %49, %51, %cst_45 {dimension_numbers = #tpu.dot_dimension_numbers<[1], [0], [0], [1], [0, 0, 1, 1], [], []>} : vector<288x4xbf16>, vector<4x512xbf16>, vector<288x512xf32> -> vector<288x512xf32>
    %53 = arith.addf %47, %52 : vector<288x512xf32>
    %c0_46 = arith.constant 0 : index
    %c38 = arith.constant 38 : index
    %c0_47 = arith.constant 0 : index
    %54 = vector.load %arg1[%c0_46, %c38, %c0_47] : memref<1x328x4xbf16, #tpu.memory_space<vmem>>, vector<1x288x4xbf16>
    %55 = vector.shape_cast %54 : vector<1x288x4xbf16> to vector<288x4xbf16>
    %c8 = arith.constant 8 : index
    %c0_48 = arith.constant 0 : index
    %c0_49 = arith.constant 0 : index
    %56 = vector.load %arg2[%c8, %c0_48, %c0_49] : memref<9x4x512xbf16, #tpu.memory_space<vmem>>, vector<1x4x512xbf16>
    %57 = vector.shape_cast %56 : vector<1x4x512xbf16> to vector<4x512xbf16>
    %cst_50 = arith.constant dense<0.000000e+00> : vector<288x512xf32>
    %58 = tpu.matmul %55, %57, %cst_50 {dimension_numbers = #tpu.dot_dimension_numbers<[1], [0], [0], [1], [0, 0, 1, 1], [], []>} : vector<288x4xbf16>, vector<4x512xbf16>, vector<288x512xf32> -> vector<288x512xf32>
    %59 = arith.addf %53, %58 : vector<288x512xf32>
    %cst_51 = arith.constant 0.000000e+00 : f32
    %60 = vector.broadcast %cst_51 : f32 to vector<288x512xf32>
    %61 = arith.maximumf %59, %60 : vector<288x512xf32>
    %62 = arith.truncf %61 : vector<288x512xf32> to vector<288x512xbf16>
    %c0_52 = arith.constant 0 : index
    %c0_53 = arith.constant 0 : index
    %63 = vector.load %arg4[%c0_52, %c0_53] : memref<512x24xbf16, #tpu.memory_space<vmem>>, vector<512x24xbf16>
    %cst_54 = arith.constant dense<0.000000e+00> : vector<288x24xf32>
    %64 = tpu.matmul %62, %63, %cst_54 {dimension_numbers = #tpu.dot_dimension_numbers<[1], [0], [0], [1], [0, 0, 1, 1], [], []>} : vector<288x512xbf16>, vector<512x24xbf16>, vector<288x24xf32> -> vector<288x24xf32>
    %65 = arith.addf %64, %5 : vector<288x24xf32>
    %66 = vector.extract_strided_slice %65 {offsets = [0, 0], sizes = [288, 6], strides = [1, 1]} : vector<288x24xf32> to vector<288x6xf32>
    %67 = vector.extract_strided_slice %65 {offsets = [0, 6], sizes = [288, 6], strides = [1, 1]} : vector<288x24xf32> to vector<288x6xf32>
    %68 = vector.extract_strided_slice %65 {offsets = [0, 12], sizes = [288, 12], strides = [1, 1]} : vector<288x24xf32> to vector<288x12xf32>
    %69 = arith.subf %66, %67 : vector<288x6xf32>
    %70 = math.absf %69 : vector<288x6xf32>
    %cst_55 = arith.constant 0.000000e+00 : f32
    %71 = vector.broadcast %cst_55 : f32 to vector<288x6xf32>
    %72 = arith.subf %71, %70 : vector<288x6xf32>
    %73 = math.exp %72 : vector<288x6xf32>
    %cst_56 = arith.constant 1.000000e+00 : f32
    %74 = vector.broadcast %cst_56 : f32 to vector<288x6xf32>
    %75 = arith.addf %74, %73 : vector<288x6xf32>
    %76 = tpu.reciprocal %75 {approx = true} : vector<288x6xf32> -> vector<288x6xf32>
    %77 = arith.mulf %75, %76 : vector<288x6xf32>
    %cst_57 = arith.constant 2.000000e+00 : f32
    %78 = vector.broadcast %cst_57 : f32 to vector<288x6xf32>
    %79 = arith.subf %78, %77 : vector<288x6xf32>
    %80 = arith.mulf %76, %79 : vector<288x6xf32>
    %cst_58 = arith.constant 0.000000e+00 : f32
    %81 = vector.broadcast %cst_58 : f32 to vector<288x6xf32>
    %82 = arith.cmpf oge, %69, %81 : vector<288x6xf32>
    %cst_59 = arith.constant 1.000000e+00 : f32
    %83 = vector.broadcast %cst_59 : f32 to vector<288x6xf32>
    %84 = arith.subf %83, %80 : vector<288x6xf32>
    %85 = arith.select %82, %80, %84 : vector<288x6xi1>, vector<288x6xf32>
    %86 = tpu.concatenate %66, %85, %68 in 1 : vector<288x6xf32>, vector<288x6xf32>, vector<288x12xf32> -> vector<288x24xf32>
    %c0_60 = arith.constant 0 : index
    %c0_61 = arith.constant 0 : index
    %c0_62 = arith.constant 0 : index
    %87 = vector.load %arg6[%c0_60, %c0_61, %c0_62] : memref<1x288x24xf32, #tpu.memory_space<vmem>>, vector<1x288x24xf32>
    %88 = vector.shape_cast %87 : vector<1x288x24xf32> to vector<288x24xf32>
    %89 = vector.shape_cast %86 : vector<288x24xf32> to vector<1x288x24xf32>
    tpu.vector_store %arg6[%c0_60, %c0_61, %c0_62], %89 {strides = array<i32>} : memref<1x288x24xf32, #tpu.memory_space<vmem>>, vector<1x288x24xf32>,
    return
  }
  func.func @transform_0(%arg0: i32) -> (i32, i32, i32) {
    %c0_i32 = arith.constant 0 : i32
    %c0_i32_0 = arith.constant 0 : i32
    %c0_i32_1 = arith.constant 0 : i32
    return %arg0, %c0_i32, %c0_i32_0 : i32, i32, i32
  }
  func.func @transform_1(%arg0: i32) -> (i32, i32, i32) {
    %c0_i32 = arith.constant 0 : i32
    %c0_i32_0 = arith.constant 0 : i32
    %c0_i32_1 = arith.constant 0 : i32
    %c0_i32_2 = arith.constant 0 : i32
    return %c0_i32, %c0_i32_0, %c0_i32_1 : i32, i32, i32
  }
  func.func @transform_2(%arg0: i32) -> (i32, i32) {
    %c0_i32 = arith.constant 0 : i32
    %c0_i32_0 = arith.constant 0 : i32
    %c0_i32_1 = arith.constant 0 : i32
    return %c0_i32, %c0_i32_0 : i32, i32
  }
  func.func @transform_3(%arg0: i32) -> (i32, i32) {
    %c0_i32 = arith.constant 0 : i32
    %c0_i32_0 = arith.constant 0 : i32
    %c0_i32_1 = arith.constant 0 : i32
    return %c0_i32, %c0_i32_0 : i32, i32
  }
  func.func @transform_4(%arg0: i32) -> (i32, i32) {
    %c0_i32 = arith.constant 0 : i32
    %c0_i32_0 = arith.constant 0 : i32
    %c0_i32_1 = arith.constant 0 : i32
    return %c0_i32, %c0_i32_0 : i32, i32
  }
  func.func @transform_5(%arg0: i32) -> (i32, i32, i32) {
    %c0_i32 = arith.constant 0 : i32
    %c0_i32_0 = arith.constant 0 : i32
    %c0_i32_1 = arith.constant 0 : i32
    return %arg0, %c0_i32, %c0_i32_0 : i32, i32, i32
  }
}

</mosaic_0001>

<bundles_post_ra>
// kernel: tpu_custom_call.1
= control target key start
LH: loop header
LB: loop body
LE: loop exit
PB: predicated region body
PF: predicated region fallthrough
CT: control target
= control target key end

     0   :  { %s12136_s18 = smov 0   ;;  %s15084_s0 = inlined_call_operand.vmem [shape: bf16[2,328,4], index: 0, kind: input, shape index: {}]   ;;  %s15085_s1 = inlined_call_operand.vmem [shape: bf16[9,4,512], index: 1, kind: input, shape index: {}]   ;;  %s15086_s2 = inlined_call_operand.vmem [shape: f32[1,512], index: 2, kind: input, shape index: {}]   ;;  %s15087_s3 = inlined_call_operand.vmem [shape: bf16[512,24], index: 3, kind: input, shape index: {}]   ;;  %s15088_s4 = inlined_call_operand.vmem [shape: f32[1,24], index: 4, kind: input, shape index: {}]   ;;  %s15089_s5 = inlined_call_operand.vmem [shape: f32[2,288,24], index: 5, kind: output, shape index: {}]  }
   0x1 LB: > { %s9753_s19 = sadd.s32 4294967295, %s12100_s18   ;;  %p9757_p0 = scmp.ge.s32.totalorder %s12100_s18, 1  ;;  %s12100_s18 = sphi %s12136_s18, %s15_s18  }
   0x2   : > { %p187_p1 = scmp.lt.s32.totalorder %s12100_s18, 3 }
   0x4   : > { %p188_p2 = pnand %p9757_p0, %p187_p1 }
   0x6   : > { %191 = sbr.rel (%p188_p2) target bundleno = 2172 (0x87c), region = 40 }
   0xd   : > { %v228_v0 = vlaneseq  ;;  %v12102_v1 = vmov 1983009808   ;;  %p215_p3 = scmp.lt.s32.totalorder %s9753_s19, 1  ;;  %v291_v4 = vld [vmem:[%s15085_s1] sm:$0xff]  ;;  %v12103_v5 = vmov 0   ;;  %v9817_v11 = vld [vmem:[%s15085_s1 + $0x8] sm:$0xff] }
   0xe   : > { %v385_v2 = vunpack.c.l.s4 %v12102_v1  ;;  %500 = vmatprep.mubr.bf16.mxu1 %v12103_v5  ;;  %1435 = vmatprep.mubr.bf16.mxu0 %v12103_v5  ;;  %v226_v6 = vld [vmem:[%s15086_s2] sm:$0xf]  ;;  %v383_v7 = vcombine.high %v291_v4, %v291_v4  ;;  %vm455_vm0 = vcmask 1041408   ;;  %vm400_vm1 = vcmask 31744   ;;  %s12104_s21 = smov 122   ;;  %s12105_s22 = smov 6  }
   0xf   : > { %v12144_v3 = vshrl.u32 %v228_v0, 7  ;;  %s15257_s19 = smov (!%p215_p3, %s9753_s19), 1  ;;  %vm1170_vm2 = vsmask.f32 7424  ;;  %v1320_v41 = vcombine.high %v9817_v11, %v9817_v11  ;;  %vm2105_vm3 = vcmask 1046528  }
  0x10   : > { %v386_v8 = vunpack.c.0.s8 %v385_v2  ;;  %s11719_s26 = smul.u32 164, %s15257_s19  ;;  %v12237_v2 = vld [vmem:[%s15085_s1 + $0x10] sm:$0xff]  ;;  %vm3752_vm4 = vsmask.f32 6400  ;;  %vm4709_vm5 = vcmask 1045504   ;;  %vm7313_vm7 = vcmask 1044480  }
  0x11   : > { %v238_v9 = vsub.s32 2, %v12144_v3  ;;  %v242_v10 = vsub.s32 3, %v12144_v3  ;;  %vm6356_vm6 = vsmask.f32 5376  ;;  %s11720_s23 = smul.u32 288, %s15257_s19 }
  0x12   : > { %v12162_v12 = vsub.s32 %v386_v8, %v12144_v3  ;;  %s12175_s29 = scalar_lea.vmem %s15084_s0, %s11719_s26 }
  0x13   : > { %v12165_v13 = vrot.slane %v226_v6, %v238_v9  ;;  %v12167_v14 = vrot.slane %v226_v6, %v242_v10  ;;  %v11735_v22 = vld [vmem:[%s12175_s29] sm:$0xff]   ;;  %v11737_v25 = vld [vmem:[%s12175_s29 + $0x8] sm:$0xff]   ;;  %v11739_v28 = vld [vmem:[%s12175_s29 + $0x10] sm:$0xff]   ;;  %s14851_s19 = scalar_lea.vmem %s15089_s5, %s11720_s23 }
  0x14   : > { %v390_v15 = vrot.slane %v291_v4, %v12162_v12  ;;  %v397_v16 = vrot.slane %v383_v7, %v12162_v12  ;;  %v1327_v17 = vrot.slane %v9817_v11, %v12162_v12  ;;  %v11736_v24 = vld [vmem:[%s12175_s29] sm:$0xff]   ;;  %v1179_v30 = vshll.u32 %v11737_v25, 16  ;;  %v11738_v37 = vld [vmem:[%s12175_s29 + $0x8] sm:$0xff]   ;;  %v11741_v40 = vld [vmem:[%s12175_s29 + $0x18] sm:$0xff]  }
  0x15   : > { %15108 = vst [vmem:[#allocation2_spill] sm:$0xff] %v12165_v13  ;;  %15109 = vst [vmem:[#allocation3_spill] sm:$0xff] %v12167_v14  ;;  %v1172_v26 = vshrl.u32 %v11736_v24, 16  ;;  %v1174_v27 = vshll.u32 %v11736_v24, 16  ;;  %v1183_v34 = vshrl.u32 %v11737_v25, 16  ;;  %v1187_v35 = vshll.u32 %v11739_v28, 16 }
  0x16   : > { %v398_v18 = vcombine.high %v390_v15, %v390_v15  ;;  %v457_v19 = vsel %vm455_vm0, %v390_v15, 0  ;;  %v1335_v20 = vcombine.high %v1327_v17, %v1327_v17  ;;  %v1392_v21 = vsel %vm455_vm0, %v1327_v17, 0  ;;  %v11740_v45 = vld [vmem:[%s12175_s29 + $0x10] sm:$0xff]   ;;  %v11743_v47 = vld [vmem:[%s12175_s29 + $0x20] sm:$0xff]   ;;  %v11742_v54 = vld [vmem:[%s12175_s29 + $0x18] sm:$0xff]  }
  0x17   : > { %v399_v23 = vcombine.high %v397_v16, %v397_v16  ;;  %v463_v29 = vsel %vm455_vm0, %v397_v16, 0  ;;  %v1176_v31 = vrot.slane %v1174_v27, 1  ;;  %v1181_v32 = vrot.slane %v1179_v30, 1  ;;  %v11745_v57 = vld [vmem:[%s12175_s29 + $0x28] sm:$0xff]   ;;  %v11744_v61 = vld [vmem:[%s12175_s29 + $0x20] sm:$0xff]   ;;  %v11747_v0 = vld [vmem:[%s12175_s29 + $0x30] sm:$0xff]  }
  0x18   : > { %9779 = vmatprep.subr.msk.bf16.mxu1 %vm455_vm0, %v398_v18  ;;  %9837 = vmatprep.subr.msk.bf16.mxu0 %vm455_vm0, %v1335_v20  ;;  %v1189_v39 = vrot.slane %v1187_v35, 1  ;;  %v1191_v43 = vshrl.u32 %v11739_v28, 16  ;;  %v1195_v44 = vshll.u32 %v11741_v40, 16  ;;  %v12204_v46 = vrot.slane %v1320_v41, %v12162_v12  ;;  %v11749_v7 = vld [vmem:[%s12175_s29 + $0x38] sm:$0xff]   ;;  %v12249_v9 = vld [vmem:[%s12175_s29 + $0x28] sm:$0xff]   ;;  %v11751_v10 = vld [vmem:[%s12175_s29 + $0x40] sm:$0xff]  }
  0x19   : > { %469 = vmatpush1.bf16.msra.mxu1 %v457_v19  ;;  %1404 = vmatpush1.bf16.msra.mxu0 %v1392_v21  ;;  %v1177_v33 = vor.u32 %v1176_v31, %v1172_v26  ;;  %v1185_v38 = vor.u32 %v1183_v34, %v1181_v32  ;;  %v1199_v50 = vshrl.u32 %v11741_v40, 16  ;;  %v1203_v51 = vshll.u32 %v11743_v47, 16  ;;  %v11753_v24 = vld [vmem:[%s12175_s29 + $0x48] sm:$0xff]   ;;  %v12275_v30 = vld [vmem:[%s12175_s29 + $0x38] sm:$0xff]   ;;  %v11755_v31 = vld [vmem:[%s12175_s29 + $0x50] sm:$0xff]  }
  0x1a   : > { %9798 = vmatprep.subr.msk.bf16.mxu1 %vm455_vm0, %v399_v23  ;;  %v1193_v48 = vor.u32 %v1191_v43, %v1189_v39  ;;  %v1197_v49 = vrot.slane %v1195_v44, 1  ;;  %v1336_v52 = vcombine.high %v12204_v46, %v12204_v46  ;;  %v1207_v59 = vshrl.u32 %v11743_v47, 16  ;;  %v12262_v23 = vld [vmem:[%s12175_s29 + $0x30] sm:$0xff]   ;;  %v12301_v47 = vld [vmem:[%s12175_s29 + $0x48] sm:$0xff]  }
  0x1b   : > { %v12190_v36 = vsel %vm1170_vm2, %v1177_v33, %v1181_v32  ;;  %v12199_v42 = vsel %vm1170_vm2, %v1185_v38, %v1189_v39  ;;  %v1205_v56 = vrot.slane %v1203_v51, 1  ;;  %v1211_v60 = vshll.u32 %v11745_v57, 16  ;;  %v12288_v38 = vld [vmem:[%s12175_s29 + $0x40] sm:$0xff]   ;;  %v11757_v39 = vld [vmem:[%s12175_s29 + $0x58] sm:$0xff]  }
  0x1c   : > { %9780 = vmatmul.mubr.msk.bf16.vlgmr.msra.gmra.mrb[0].mxu1 %vm400_vm1, %v11735_v22  ;;  %9838 = vmatmul.mubr.msk.bf16.vlgmr.msra.gmra.mrb[0].mxu0 %vm400_vm1, %v12190_v36  ;;  %v12214_v53 = vsel %vm1170_vm2, %v1193_v48, %v1197_v49  ;;  %v1201_v55 = vor.u32 %v1199_v50, %v1197_v49  ;;  %v1215_v1 = vshrl.u32 %v11745_v57, 16  ;;  %v1219_v6 = vshll.u32 %v11747_v0, 16  ;;  %v11759_v48 = vld [vmem:[%s12175_s29 + $0x60] sm:$0xff]  }
  0x1d   : > { %682 = vmatpush1.bf16.msra.mxu1 %v463_v29  ;;  %510 = vmatprep.mubr.bf16.mxu1 %v12103_v5  ;;  %v1209_v62 = vor.u32 %v1207_v59, %v1205_v56  ;;  %v1213_v63 = vrot.slane %v1211_v60, 1  ;;  %v2151_v8 = vrot.slane %v12237_v2, %v12162_v12  ;;  %v1227_v18 = vshll.u32 %v11749_v7, 16 }
  0x1e   : > { %1445 = vmatprep.mubr.bf16.mxu0 %v12103_v5  ;;  %9856 = vmatprep.subr.msk.bf16.mxu1 %vm455_vm0, %v1336_v52  ;;  %v12225_v58 = vsel %vm1170_vm2, %v1201_v55, %v1205_v56  ;;  %v1221_v17 = vrot.slane %v1219_v6, 1  ;;  %v1223_v19 = vshrl.u32 %v11747_v0, 16  ;;  %v1235_v22 = vshll.u32 %v11751_v10, 16  ;;  %v12314_v55 = vld [vmem:[%s12175_s29 + $0x50] sm:$0xff]   ;;  %v11761_v56 = vld [vmem:[%s12175_s29 + $0x68] sm:$0xff]  }
  0x1f   : > { %v12240_v4 = vsel %vm1170_vm2, %v1209_v62, %v1213_v63  ;;  %v2159_v11 = vcombine.high %v2151_v8, %v2151_v8  ;;  %v2216_v15 = vsel %vm455_vm0, %v2151_v8, 0  ;;  %v1217_v16 = vor.u32 %v1215_v1, %v1213_v63  ;;  %v12327_v63 = vld [vmem:[%s12175_s29 + $0x58] sm:$0xff]   ;;  %v11763_v0 = vld [vmem:[%s12175_s29 + $0x70] sm:$0xff]  }
  0x20   : > { %v1229_v21 = vrot.slane %v1227_v18, 1  ;;  %v1225_v25 = vor.u32 %v1223_v19, %v1221_v17  ;;  %v1231_v26 = vshrl.u32 %v11749_v7, 16  ;;  %v1237_v28 = vrot.slane %v1235_v22, 1  ;;  %v12353_v22 = vld [vmem:[%s12175_s29 + $0x68] sm:$0xff]  }
  0x21   : > { %9895 = vmatprep.subr.msk.bf16.mxu0 %vm455_vm0, %v2159_v11  ;;  %v12258_v20 = vsel %vm1170_vm2, %v1217_v16, %v1221_v17  ;;  %v1243_v29 = vshll.u32 %v11753_v24, 16  ;;  %v1239_v33 = vshrl.u32 %v11751_v10, 16  ;;  %v1247_v41 = vshrl.u32 %v11753_v24, 16  ;;  %v12340_v11 = vld [vmem:[%s12175_s29 + $0x60] sm:$0xff]  }
  0x22   : > { %2228 = vmatpush1.bf16.msra.mxu0 %v2216_v15  ;;  %v12271_v27 = vsel %vm1170_vm2, %v1225_v25, %v1229_v21  ;;  %v1233_v32 = vor.u32 %v1231_v26, %v1229_v21  ;;  %v1255_v50 = vshrl.u32 %v11755_v31, 16  ;;  %v1263_v59 = vshrl.u32 %v11757_v39, 16  ;;  %v11765_v15 = vld [vmem:[%s12175_s29 + $0x78] sm:$0xff]   ;;  %v11767_v24 = vld [vmem:[%s12175_s29 + $0x80] sm:$0xff]  }
  0x23   : > { %v1245_v35 = vrot.slane %v1243_v29, 1  ;;  %v1241_v40 = vor.u32 %v1239_v33, %v1237_v28  ;;  %v1275_v62 = vshll.u32 %v11761_v56, 16  ;;  %v1271_v6 = vshrl.u32 %v11759_v48, 16  ;;  %v11769_v33 = vld [vmem:[%s12175_s29 + $0x88] sm:$0xff]  }
  0x24   : > { %9781 = vmatmul.mubr.msk.bf16.gmra.mrb[4].mxu1 %vm400_vm1, %v11738_v37  ;;  %9839 = vmatmul.mubr.msk.bf16.gmra.mrb[4].mxu0 %vm400_vm1, %v12199_v42  ;;  %v12284_v34 = vsel %vm1170_vm2, %v1233_v32, %v1237_v28  ;;  %v1251_v37 = vshll.u32 %v11755_v31, 16  ;;  %v1283_v10 = vshll.u32 %v11763_v0, 16  ;;  %v1279_v17 = vshrl.u32 %v11761_v56, 16  ;;  %v12366_v32 = vld [vmem:[%s12175_s29 + $0x70] sm:$0xff]   ;;  %v12392_v56 = vld [vmem:[%s12175_s29 + $0x80] sm:$0xff]  }
  0x25   : > { %520 = vmatprep.mubr.bf16.mxu1 %v12103_v5  ;;  %1455 = vmatprep.mubr.bf16.mxu0 %v12103_v5  ;;  %v12297_v43 = vsel %vm1170_vm2, %v1241_v40, %v1245_v35  ;;  %v1249_v49 = vor.u32 %v1247_v41, %v1245_v35  ;;  %v1277_v8 = vrot.slane %v1275_v62, 1  ;;  %v1291_v21 = vshll.u32 %v11765_v15, 16 }
  0x26   : > { %v1253_v44 = vrot.slane %v1251_v37, 1  ;;  %v1285_v19 = vrot.slane %v1283_v10, 1  ;;  %v1287_v26 = vshrl.u32 %v11763_v0, 16  ;;  %v1299_v31 = vshll.u32 %v11767_v24, 16  ;;  %v12404_v0 = vld [vmem:[%s12175_s29 + $0x88] sm:$0xff]  }
  0x27   : > { %v1281_v25 = vor.u32 %v1279_v17, %v1277_v8  ;;  %v1293_v29 = vrot.slane %v1291_v21, 1  ;;  %v1295_v37 = vshrl.u32 %v11765_v15, 16  ;;  %v1307_v41 = vshll.u32 %v11769_v33, 16  ;;  %v11774_v21 = vld [vmem:[%s12175_s29 + $0x10] sm:$0xff]  }
  0x28   : > { %v12310_v51 = vsel %vm1170_vm2, %v1249_v49, %v1253_v44  ;;  %v1257_v57 = vor.u32 %v1255_v50, %v1253_v44  ;;  %v1289_v35 = vor.u32 %v1287_v26, %v1285_v19  ;;  %v1301_v40 = vrot.slane %v1299_v31, 1  ;;  %v12379_v44 = vld [vmem:[%s12175_s29 + $0x78] sm:$0xff]  }
  0x29   : > { %v12362_v28 = vsel %vm1170_vm2, %v1281_v25, %v1285_v19  ;;  %v1303_v49 = vshrl.u32 %v11767_v24, 16  ;;  %v1398_v10 = vsel %vm455_vm0, %v12204_v46, 0  ;;  %v12088_v19 = vld [vmem:[%s12175_s29] sm:$0xff]   ;;  %v2109_v24 = vrot.slane %v11774_v21, 1  ;;  %v12089_v25 = vld [vmem:[%s12175_s29 + $0x8] sm:$0xff]   ;;  %v12442_v31 = vld [vmem:[%s15085_s1 + $0x18] sm:$0xff] }
  0x2c   : > { %9782 = vmatmul.mubr.msk.bf16.gmra.mrb[8].mxu1 %vm400_vm1, %v11740_v45  ;;  %9840 = vmatmul.mubr.msk.bf16.gmra.mrb[8].mxu0 %vm400_vm1, %v12214_v53  ;;  %v1259_v45 = vshll.u32 %v11757_v39, 16  ;;  %v12375_v39 = vsel %vm1170_vm2, %v1289_v35, %v1293_v29 }
  0x2d   : > { %530 = vmatprep.mubr.bf16.mxu1 %v12103_v5  ;;  %1465 = vmatprep.mubr.bf16.mxu0 %v12103_v5 }
  0x2e   : > { %v1261_v52 = vrot.slane %v1259_v45, 1  ;;  %v11771_v45 = vld [vmem:[%s12175_s29 + $0x90] ss:$0 sps:$4 sm:$0x11]  }
  0x30   : > { %v12323_v60 = vsel %vm1170_vm2, %v1257_v57, %v1261_v52  ;;  %v1265_v1 = vor.u32 %v1263_v59, %v1261_v52  ;;  %v1309_v52 = vrot.slane %v1307_v41, 1  ;;  %v1305_v57 = vor.u32 %v1303_v49, %v1301_v40  ;;  %v12090_v41 = vld [vmem:[%s12175_s29 + $0x10] sm:$0xff]   ;;  %v11776_v49 = vld [vmem:[%s12175_s29 + $0x20] sm:$0xff]  }
  0x32   : > { %v12400_v59 = vsel %vm1170_vm2, %v1305_v57, %v1309_v52  ;;  %v12091_v57 = vld [vmem:[%s12175_s29 + $0x18] sm:$0xff]  }
  0x34   : > { %9783 = vmatmul.mubr.msk.bf16.gmra.mrb[12].mxu1 %vm400_vm1, %v11742_v54  ;;  %9841 = vmatmul.mubr.msk.bf16.gmra.mrb[12].mxu0 %vm400_vm1, %v12225_v58  ;;  %v1267_v54 = vshll.u32 %v11759_v48, 16  ;;  %v1297_v48 = vor.u32 %v1295_v37, %v1293_v29  ;;  %v11775_v29 = vld [vmem:[%s12175_s29 + $0x18] sm:$0xff]  }
  0x35   : > { %540 = vmatprep.mubr.bf16.mxu1 %v12103_v5  ;;  %1475 = vmatprep.mubr.bf16.mxu0 %v12103_v5  ;;  %v2111_v35 = vrot.slane %v11775_v29, 1 }
  0x36   : > { %v12388_v50 = vsel %vm1170_vm2, %v1297_v48, %v1301_v40 }
  0x37   : > { %v12456_v48 = vsel %vm2105_vm3, %v2109_v24, %v2111_v35 }
  0x3c   : > { %9784 = vmatmul.mubr.msk.bf16.gmra.mrb[16].mxu1 %vm400_vm1, %v11744_v61  ;;  %9842 = vmatmul.mubr.msk.bf16.gmra.mrb[16].mxu0 %vm400_vm1, %v12240_v4  ;;  %v1269_v61 = vrot.slane %v1267_v54, 1  ;;  %v1315_v54 = vshll.u32 %v11771_v45, 16  ;;  %v2144_v45 = vcombine.high %v12237_v2, %v12237_v2  ;;  %v2113_v2 = vrot.slane %v11776_v49, 1 }
  0x3d   : > { %550 = vmatprep.mubr.bf16.mxu1 %v12103_v5  ;;  %1485 = vmatprep.mubr.bf16.mxu0 %v12103_v5 }
  0x3e   : > { %v12336_v7 = vsel %vm1170_vm2, %v1265_v1, %v1269_v61  ;;  %v1273_v16 = vor.u32 %v1271_v6, %v1269_v61  ;;  %v1311_v61 = vshrl.u32 %v11769_v33, 16  ;;  %v1317_v62 = vrot.slane %v1315_v54, 1  ;;  %v11772_v1 = vld [vmem:[%s12175_s29] sm:$0xfe]   ;;  %v11773_v6 = vld [vmem:[%s12175_s29 + $0x8] sm:$0xff]  }
  0x3f   : > { %v2107_v17 = vrot.slane %v11773_v6, 1  ;;  %v2974_v33 = vrot.slane %v12442_v31, %v12162_v12  ;;  %v12092_v6 = vld [vmem:[%s12175_s29 + $0x20] sm:$0xff]  }
  0x40   : > { %v12349_v18 = vsel %vm1170_vm2, %v1273_v16, %v1277_v8  ;;  %v1313_v8 = vor.u32 %v1311_v61, %v1309_v52  ;;  %v2106_v16 = vrot.slane %v11772_v1, 1  ;;  %v12461_v52 = vrot.slane %v2144_v45, %v12162_v12 }
  0x41   : > { %v12435_v26 = vsel %vm2105_vm3, %v2107_v17, %v2109_v24  ;;  %v2982_v37 = vcombine.high %v2974_v33, %v2974_v33  ;;  %v3039_v40 = vsel %vm455_vm0, %v2974_v33, 0  ;;  %v12472_v61 = vsel %vm2105_vm3, %v2111_v35, %v2113_v2 }
  0x42   : > { %v12416_v15 = vsel %vm1170_vm2, %v1313_v8, %v1317_v62  ;;  %v12425_v46 = vsel %vm2105_vm3, %v2106_v16, %v2107_v17  ;;  %v2160_v54 = vcombine.high %v12461_v52, %v12461_v52  ;;  %v11777_v62 = vld [vmem:[%s12175_s29 + $0x28] sm:$0xff]  }
  0x43   : > { %9953 = vmatprep.subr.msk.bf16.mxu0 %vm455_vm0, %v2982_v37  ;;  %v2115_v1 = vrot.slane %v11777_v62, 1 }
  0x44   : > { %9785 = vmatmul.mubr.msk.bf16.gmra.mrb[20].mxu1 %vm400_vm1, %v12249_v9  ;;  %9843 = vmatmul.mubr.msk.bf16.gmra.mrb[20].mxu0 %vm400_vm1, %v12258_v20 }
  0x45   : > { %560 = vmatprep.mubr.bf16.mxu1 %v12103_v5  ;;  %1495 = vmatprep.mubr.bf16.mxu0 %v12103_v5  ;;  %v12482_v8 = vsel %vm2105_vm3, %v2113_v2, %v2115_v1 }
  0x4c   : > { %9786 = vmatmul.mubr.msk.bf16.gmra.mrb[24].mxu1 %vm400_vm1, %v12262_v23  ;;  %9844 = vmatmul.mubr.msk.bf16.gmra.mrb[24].mxu0 %vm400_vm1, %v12271_v27 }
  0x4d   : > { %570 = vmatprep.mubr.bf16.mxu1 %v12103_v5  ;;  %1505 = vmatprep.mubr.bf16.mxu0 %v12103_v5 }
  0x54   : > { %9787 = vmatmul.mubr.msk.bf16.gmra.mrb[28].mxu1 %vm400_vm1, %v12275_v30  ;;  %9845 = vmatmul.mubr.msk.bf16.gmra.mrb[28].mxu0 %vm400_vm1, %v12284_v34 }
  0x55   : > { %580 = vmatprep.mubr.bf16.mxu1 %v12103_v5  ;;  %1515 = vmatprep.mubr.bf16.mxu0 %v12103_v5 }
  0x5c   : > { %9788 = vmatmul.mubr.msk.bf16.gmra.mrb[32].mxu1 %vm400_vm1, %v12288_v38  ;;  %9846 = vmatmul.mubr.msk.bf16.gmra.mrb[32].mxu0 %vm400_vm1, %v12297_v43 }
  0x5d   : > { %590 = vmatprep.mubr.bf16.mxu1 %v12103_v5  ;;  %1525 = vmatprep.mubr.bf16.mxu0 %v12103_v5 }
  0x64   : > { %9789 = vmatmul.mubr.msk.bf16.gmra.mrb[36].mxu1 %vm400_vm1, %v12301_v47  ;;  %9847 = vmatmul.mubr.msk.bf16.gmra.mrb[36].mxu0 %vm400_vm1, %v12310_v51 }
  0x65   : > { %600 = vmatprep.mubr.bf16.mxu1 %v12103_v5  ;;  %1535 = vmatprep.mubr.bf16.mxu0 %v12103_v5 }
  0x6c   : > { %9790 = vmatmul.mubr.msk.bf16.gmra.mrb[40].mxu1 %vm400_vm1, %v12314_v55  ;;  %9848 = vmatmul.mubr.msk.bf16.gmra.mrb[40].mxu0 %vm400_vm1, %v12323_v60 }
  0x6d   : > { %610 = vmatprep.mubr.bf16.mxu1 %v12103_v5  ;;  %1545 = vmatprep.mubr.bf16.mxu0 %v12103_v5 }
  0x74   : > { %9791 = vmatmul.mubr.msk.bf16.gmra.mrb[44].mxu1 %vm400_vm1, %v12327_v63  ;;  %9849 = vmatmul.mubr.msk.bf16.gmra.mrb[44].mxu0 %vm400_vm1, %v12336_v7 }
  0x75   : > { %620 = vmatprep.mubr.bf16.mxu1 %v12103_v5  ;;  %1555 = vmatprep.mubr.bf16.mxu0 %v12103_v5 }
  0x7c   : > { %9792 = vmatmul.mubr.msk.bf16.gmra.mrb[48].mxu1 %vm400_vm1, %v12340_v11  ;;  %9850 = vmatmul.mubr.msk.bf16.gmra.mrb[48].mxu0 %vm400_vm1, %v12349_v18 }
  0x7d   : > { %630 = vmatprep.mubr.bf16.mxu1 %v12103_v5  ;;  %1565 = vmatprep.mubr.bf16.mxu0 %v12103_v5 }
  0x84   : > { %9793 = vmatmul.mubr.msk.bf16.gmra.mrb[52].mxu1 %vm400_vm1, %v12353_v22  ;;  %9851 = vmatmul.mubr.msk.bf16.gmra.mrb[52].mxu0 %vm400_vm1, %v12362_v28 }
  0x85   : > { %640 = vmatprep.mubr.bf16.mxu1 %v12103_v5  ;;  %1575 = vmatprep.mubr.bf16.mxu0 %v12103_v5 }
  0x8c   : > { %9794 = vmatmul.mubr.msk.bf16.gmra.mrb[56].mxu1 %vm400_vm1, %v12366_v32  ;;  %9852 = vmatmul.mubr.msk.bf16.gmra.mrb[56].mxu0 %vm400_vm1, %v12375_v39 }
  0x8d   : > { %650 = vmatprep.mubr.bf16.mxu1 %v12103_v5  ;;  %1585 = vmatprep.mubr.bf16.mxu0 %v12103_v5 }
  0x94   : > { %9795 = vmatmul.mubr.msk.bf16.gmra.mrb[60].mxu1 %vm400_vm1, %v12379_v44  ;;  %9853 = vmatmul.mubr.msk.bf16.gmra.mrb[60].mxu0 %vm400_vm1, %v12388_v50 }
  0x95   : > { %660 = vmatprep.mubr.bf16.mxu1 %v12103_v5  ;;  %1595 = vmatprep.mubr.bf16.mxu0 %v12103_v5 }
  0x9c   : > { %9796 = vmatmul.mubr.msk.bf16.gmra.mrb[64].mxu1 %vm400_vm1, %v12392_v56  ;;  %9854 = vmatmul.mubr.msk.bf16.gmra.mrb[64].mxu0 %vm400_vm1, %v12400_v59 }
  0x9d   : > { %670 = vmatprep.mubr.bf16.mxu1 %v12103_v5  ;;  %1605 = vmatprep.mubr.bf16.mxu0 %v12103_v5 }
  0xa4   : > { %9797 = vmatmul.mubr.msk.bf16.gmra.mrb[68].mxu1 %vm400_vm1, %v12404_v0  ;;  %9855 = vmatmul.mubr.msk.bf16.gmra.mrb[68].mxu0 %vm400_vm1, %v12416_v15 }
  0xa5   : > { %713 = vmatprep.mubr.bf16.mxu1 %v12103_v5  ;;  %2259 = vmatprep.mubr.bf16.mxu0 %v12103_v5 }
  0xac   : > { %9799 = vmatmul.mubr.msk.bf16.vlgmr.msra.gmra.mrb[72].mxu1 %vm400_vm1, %v12088_v19  ;;  %9896 = vmatmul.mubr.msk.bf16.vlgmr.msra.gmra.mrb[0].mxu0 %vm400_vm1, %v12425_v46  ;;  %v11779_v19 = vld [vmem:[%s12175_s29 + $0x38] sm:$0xff]  }
  0xad   : > { %1617 = vmatpush1.bf16.msra.mxu1 %v1398_v10  ;;  %723 = vmatprep.mubr.bf16.mxu1 %v12103_v5  ;;  %v11778_v10 = vld [vmem:[%s12175_s29 + $0x30] sm:$0xff]   ;;  %v2119_v21 = vrot.slane %v11779_v19, 1 }
  0xae   : > { %2269 = vmatprep.mubr.bf16.mxu0 %v12103_v5  ;;  %3051 = vmatpush1.bf16.msra.mxu0 %v3039_v40  ;;  %v2117_v16 = vrot.slane %v11778_v10, 1  ;;  %v11784_v10 = vld [vmem:[%s12175_s29 + $0x60] sm:$0xff]  }
  0xaf   : > { %9914 = vmatprep.subr.msk.bf16.mxu1 %vm455_vm0, %v2160_v54  ;;  %v11783_v54 = vld [vmem:[%s12175_s29 + $0x58] sm:$0xff]  }
  0xb0   : > { %v12492_v17 = vsel %vm2105_vm3, %v2115_v1, %v2117_v16  ;;  %v12502_v24 = vsel %vm2105_vm3, %v2117_v16, %v2119_v21  ;;  %v2127_v1 = vrot.slane %v11783_v54, 1 }
  0xb4   : > { %9800 = vmatmul.mubr.msk.bf16.gmra.mrb[76].mxu1 %vm400_vm1, %v12089_v25  ;;  %9897 = vmatmul.mubr.msk.bf16.gmra.mrb[4].mxu0 %vm400_vm1, %v12435_v26 }
  0xb5   : > { %733 = vmatprep.mubr.bf16.mxu1 %v12103_v5  ;;  %2279 = vmatprep.mubr.bf16.mxu0 %v12103_v5 }
  0xbc   : > { %9801 = vmatmul.mubr.msk.bf16.gmra.mrb[80].mxu1 %vm400_vm1, %v12090_v41  ;;  %9898 = vmatmul.mubr.msk.bf16.gmra.mrb[8].mxu0 %vm400_vm1, %v12456_v48 }
  0xbd   : > { %743 = vmatprep.mubr.bf16.mxu1 %v12103_v5  ;;  %2289 = vmatprep.mubr.bf16.mxu0 %v12103_v5 }
  0xc4   : > { %9802 = vmatmul.mubr.msk.bf16.gmra.mrb[84].mxu1 %vm400_vm1, %v12091_v57  ;;  %9899 = vmatmul.mubr.msk.bf16.gmra.mrb[12].mxu0 %vm400_vm1, %v12472_v61 }
  0xc5   : > { %753 = vmatprep.mubr.bf16.mxu1 %v12103_v5  ;;  %2299 = vmatprep.mubr.bf16.mxu0 %v12103_v5 }
  0xcc   : > { %9803 = vmatmul.mubr.msk.bf16.gmra.mrb[88].mxu1 %vm400_vm1, %v12092_v6  ;;  %9900 = vmatmul.mubr.msk.bf16.gmra.mrb[16].mxu0 %vm400_vm1, %v12482_v8 }
  0xcd   : > { %763 = vmatprep.mubr.bf16.mxu1 %v12103_v5  ;;  %2309 = vmatprep.mubr.bf16.mxu0 %v12103_v5 }
  0xd4   : > { %9804 = vmatmul.mubr.msk.bf16.gmra.mrb[92].mxu1 %vm400_vm1, %v12249_v9  ;;  %9901 = vmatmul.mubr.msk.bf16.gmra.mrb[20].mxu0 %vm400_vm1, %v12492_v17  ;;  %v11780_v9 = vld [vmem:[%s12175_s29 + $0x40] sm:$0xff]  }
  0xd5   : > { %773 = vmatprep.mubr.bf16.mxu1 %v12103_v5  ;;  %2319 = vmatprep.mubr.bf16.mxu0 %v12103_v5  ;;  %v2121_v25 = vrot.slane %v11780_v9, 1  ;;  %v2129_v9 = vrot.slane %v11784_v10, 1  ;;  %v11786_v10 = vld [vmem:[%s12175_s29 + $0x70] sm:$0xff]  }
  0xd7   : > { %v12512_v29 = vsel %vm2105_vm3, %v2119_v21, %v2121_v25 }
  0xdc   : > { %9805 = vmatmul.mubr.msk.bf16.gmra.mrb[96].mxu1 %vm400_vm1, %v12262_v23  ;;  %9902 = vmatmul.mubr.msk.bf16.gmra.mrb[24].mxu0 %vm400_vm1, %v12502_v24  ;;  %v11781_v23 = vld [vmem:[%s12175_s29 + $0x48] sm:$0xff]  }
  0xdd   : > { %783 = vmatprep.mubr.bf16.mxu1 %v12103_v5  ;;  %2329 = vmatprep.mubr.bf16.mxu0 %v12103_v5  ;;  %v2123_v33 = vrot.slane %v11781_v23, 1  ;;  %v11785_v23 = vld [vmem:[%s12175_s29 + $0x68] sm:$0xff]  }
  0xde   : > { %v2131_v54 = vrot.slane %v11785_v23, 1 }
  0xdf   : > { %v12522_v35 = vsel %vm2105_vm3, %v2121_v25, %v2123_v33  ;;  %v12576_v25 = vsel %vm2105_vm3, %v2127_v1, %v2129_v9 }
  0xe4   : > { %9806 = vmatmul.mubr.msk.bf16.gmra.mrb[100].mxu1 %vm400_vm1, %v12275_v30  ;;  %9903 = vmatmul.mubr.msk.bf16.gmra.mrb[28].mxu0 %vm400_vm1, %v12512_v29  ;;  %v11782_v30 = vld [vmem:[%s12175_s29 + $0x50] sm:$0xff]  }
  0xe5   : > { %793 = vmatprep.mubr.bf16.mxu1 %v12103_v5  ;;  %2339 = vmatprep.mubr.bf16.mxu0 %v12103_v5  ;;  %v2125_v45 = vrot.slane %v11782_v30, 1 }
  0xe7   : > { %v12540_v49 = vsel %vm2105_vm3, %v2123_v33, %v2125_v45  ;;  %v12558_v6 = vsel %vm2105_vm3, %v2125_v45, %v2127_v1  ;;  %v12594_v1 = vsel %vm2105_vm3, %v2129_v9, %v2131_v54 }
  0xec   : > { %9807 = vmatmul.mubr.msk.bf16.gmra.mrb[104].mxu1 %vm400_vm1, %v12288_v38  ;;  %9904 = vmatmul.mubr.msk.bf16.gmra.mrb[32].mxu0 %vm400_vm1, %v12522_v35 }
  0xed   : > { %803 = vmatprep.mubr.bf16.mxu1 %v12103_v5  ;;  %2349 = vmatprep.mubr.bf16.mxu0 %v12103_v5 }
  0xef   : > { %v12526_v37 = vpop.f32.mrb[0].mxu1 }
  0xf0   : > { %v12530_v40 = vpop.f32.mrb[1].mxu1 }
  0xf1   : > { %v12532_v41 = vpop.f32.mrb[2].mxu1 }
  0xf2   : > { %v12535_v38 = vpop.f32.mrb[3].mxu1 }
  0xf4   : > { %9808 = vmatmul.mubr.msk.bf16.gmra.mrb[108].mxu1 %vm400_vm1, %v12301_v47  ;;  %9905 = vmatmul.mubr.msk.bf16.gmra.mrb[36].mxu0 %vm400_vm1, %v12540_v49 }
  0xf5   : > { %813 = vmatprep.mubr.bf16.mxu1 %v12103_v5  ;;  %2359 = vmatprep.mubr.bf16.mxu0 %v12103_v5 }
  0xf7   : > { %v12544_v2 = vpop.f32.mrb[4].mxu1 }
  0xf8   : > { %v12548_v57 = vpop.f32.mrb[5].mxu1 }
  0xf9   : > { %v12550_v62 = vpop.f32.mrb[6].mxu1 }
  0xfa   : > { %v12553_v47 = vpop.f32.mrb[7].mxu1 }
  0xfc   : > { %9809 = vmatmul.mubr.msk.bf16.gmra.mrb[112].mxu1 %vm400_vm1, %v12314_v55  ;;  %9906 = vmatmul.mubr.msk.bf16.gmra.mrb[40].mxu0 %vm400_vm1, %v12558_v6 }
  0xfd   : > { %823 = vmatprep.mubr.bf16.mxu1 %v12103_v5  ;;  %2369 = vmatprep.mubr.bf16.mxu0 %v12103_v5 }
  0xff   : > { %v12562_v16 = vpop.f32.mrb[8].mxu1 }
 0x100   : > { %15110 = vst [vmem:[#allocation4_spill] sm:$0xff] %v12562_v16  ;;  %v12566_v19 = vpop.f32.mrb[9].mxu1 }
 0x101   : > { %15111 = vst [vmem:[#allocation5_spill] sm:$0xff] %v12566_v19  ;;  %v12568_v21 = vpop.f32.mrb[10].mxu1 }
 0x102   : > { %15112 = vst [vmem:[#allocation6_spill] sm:$0xff] %v12568_v21  ;;  %v12571_v55 = vpop.f32.mrb[11].mxu1 }
 0x103   : > { %15113 = vst [vmem:[#allocation7_spill] sm:$0xff] %v12571_v55 }
 0x104   : > { %9810 = vmatmul.mubr.msk.bf16.gmra.mrb[116].mxu1 %vm400_vm1, %v12327_v63  ;;  %9907 = vmatmul.mubr.msk.bf16.gmra.mrb[44].mxu0 %vm400_vm1, %v12576_v25 }
 0x105   : > { %833 = vmatprep.mubr.bf16.mxu1 %v12103_v5  ;;  %2379 = vmatprep.mubr.bf16.mxu0 %v12103_v5 }
 0x107   : > { %v12580_v33 = vpop.f32.mrb[12].mxu1 }
 0x108   : > { %15114 = vst [vmem:[#allocation8_spill] sm:$0xff] %v12580_v33  ;;  %v12584_v30 = vpop.f32.mrb[13].mxu1 }
 0x109   : > { %15115 = vst [vmem:[#allocation9_spill] sm:$0xff] %v12584_v30  ;;  %v12586_v45 = vpop.f32.mrb[14].mxu1 }
 0x10a   : > { %15116 = vst [vmem:[#allocation10_spill] sm:$0xff] %v12586_v45  ;;  %v12589_v63 = vpop.f32.mrb[15].mxu1 }
 0x10b   : > { %15117 = vst [vmem:[#allocation11_spill] sm:$0xff] %v12589_v63  ;;  %v2133_v63 = vrot.slane %v11786_v10, 1 }
 0x10c   : > { %9811 = vmatmul.mubr.msk.bf16.gmra.mrb[120].mxu1 %vm400_vm1, %v12340_v11  ;;  %9908 = vmatmul.mubr.msk.bf16.gmra.mrb[48].mxu0 %vm400_vm1, %v12594_v1 }
 0x10d   : > { %843 = vmatprep.mubr.bf16.mxu1 %v12103_v5  ;;  %2389 = vmatprep.mubr.bf16.mxu0 %v12103_v5  ;;  %v12612_v9 = vsel %vm2105_vm3, %v2131_v54, %v2133_v63 }
 0x10f   : > { %v12598_v14 = vpop.f32.mrb[16].mxu1 }
 0x110   : > { %15118 = vst [vmem:[#allocation12_spill] sm:$0xff] %v12598_v14  ;;  %v12602_v13 = vpop.f32.mrb[17].mxu1  ;;  %v11787_v14 = vld [vmem:[%s12175_s29 + $0x78] sm:$0xff]  }
 0x111   : > { %15119 = vst [vmem:[#allocation13_spill] sm:$0xff] %v12602_v13  ;;  %v12604_v23 = vpop.f32.mrb[18].mxu1 }
 0x112   : > { %15120 = vst [vmem:[#allocation14_spill] sm:$0xff] %v12604_v23  ;;  %v12607_v11 = vpop.f32.mrb[19].mxu1 }
 0x113   : > { %15121 = vst [vmem:[#allocation15_spill] sm:$0xff] %v12607_v11  ;;  %v2135_v11 = vrot.slane %v11787_v14, 1 }
 0x114   : > { %9812 = vmatmul.mubr.msk.bf16.gmra.mrb[124].mxu1 %vm400_vm1, %v12353_v22  ;;  %9909 = vmatmul.mubr.msk.bf16.gmra.mrb[52].mxu0 %vm400_vm1, %v12612_v9 }
 0x115   : > { %853 = vmatprep.mubr.bf16.mxu1 %v12103_v5  ;;  %2399 = vmatprep.mubr.bf16.mxu0 %v12103_v5  ;;  %v12630_v54 = vsel %vm2105_vm3, %v2133_v63, %v2135_v11 }
 0x117   : > { %v12616_v45 = vpop.f32.mrb[20].mxu1 }
 0x118   : > { %15122 = vst [vmem:[#allocation16_spill] sm:$0xff] %v12616_v45  ;;  %v12620_v23 = vpop.f32.mrb[21].mxu1  ;;  %v11788_v45 = vld [vmem:[%s12175_s29 + $0x80] sm:$0xff]  }
 0x119   : > { %15123 = vst [vmem:[#allocation17_spill] sm:$0xff] %v12620_v23  ;;  %v12622_v10 = vpop.f32.mrb[22].mxu1 }
 0x11a   : > { %15124 = vst [vmem:[#allocation18_spill] sm:$0xff] %v12622_v10  ;;  %v12625_v22 = vpop.f32.mrb[23].mxu1 }
 0x11b   : > { %15125 = vst [vmem:[#allocation19_spill] sm:$0xff] %v12625_v22  ;;  %v2137_v22 = vrot.slane %v11788_v45, 1 }
 0x11c   : > { %9813 = vmatmul.mubr.msk.bf16.gmra.mrb[128].mxu1 %vm400_vm1, %v12366_v32  ;;  %9910 = vmatmul.mubr.msk.bf16.gmra.mrb[56].mxu0 %vm400_vm1, %v12630_v54 }
 0x11d   : > { %863 = vmatprep.mubr.bf16.mxu1 %v12103_v5  ;;  %2409 = vmatprep.mubr.bf16.mxu0 %v12103_v5  ;;  %v12648_v63 = vsel %vm2105_vm3, %v2135_v11, %v2137_v22 }
 0x11f   : > { %v12634_v13 = vpop.f32.mrb[24].mxu1 }
 0x120   : > { %15126 = vst [vmem:[#allocation20_spill] sm:$0xff] %v12634_v13  ;;  %v12638_v10 = vpop.f32.mrb[25].mxu1  ;;  %v11789_v13 = vld [vmem:[%s12175_s29 + $0x88] sm:$0xff]  }
 0x121   : > { %15127 = vst [vmem:[#allocation21_spill] sm:$0xff] %v12638_v10  ;;  %v12640_v14 = vpop.f32.mrb[26].mxu1 }
 0x122   : > { %15128 = vst [vmem:[#allocation22_spill] sm:$0xff] %v12640_v14  ;;  %v12643_v32 = vpop.f32.mrb[27].mxu1 }
 0x123   : > { %15129 = vst [vmem:[#allocation23_spill] sm:$0xff] %v12643_v32  ;;  %v2139_v32 = vrot.slane %v11789_v13, 1 }
 0x124   : > { %9814 = vmatmul.mubr.msk.bf16.gmra.mrb[132].mxu1 %vm400_vm1, %v12379_v44  ;;  %9911 = vmatmul.mubr.msk.bf16.gmra.mrb[60].mxu0 %vm400_vm1, %v12648_v63 }
 0x125   : > { %873 = vmatprep.mubr.bf16.mxu1 %v12103_v5  ;;  %2419 = vmatprep.mubr.bf16.mxu0 %v12103_v5  ;;  %v12666_v11 = vsel %vm2105_vm3, %v2137_v22, %v2139_v32  ;;  %v11792_v22 = vld [vmem:[%s12175_s29 + $0x8] sm:$0xfe]  }
 0x127   : > { %v12652_v23 = vpop.f32.mrb[28].mxu1 }
 0x128   : > { %15130 = vst [vmem:[#allocation24_spill] sm:$0xff] %v12652_v23  ;;  %v12656_v14 = vpop.f32.mrb[29].mxu1  ;;  %v11790_v23 = vld [vmem:[%s12175_s29 + $0x90] ss:$0 sps:$4 sm:$0x11]  }
 0x129   : > { %15131 = vst [vmem:[#allocation25_spill] sm:$0xff] %v12656_v14  ;;  %v12658_v45 = vpop.f32.mrb[30].mxu1 }
 0x12a   : > { %15132 = vst [vmem:[#allocation26_spill] sm:$0xff] %v12658_v45  ;;  %v12661_v44 = vpop.f32.mrb[31].mxu1 }
 0x12b   : > { %15133 = vst [vmem:[#allocation27_spill] sm:$0xff] %v12661_v44  ;;  %v2141_v44 = vrot.slane %v11790_v23, 1 }
 0x12c   : > { %9815 = vmatmul.mubr.msk.bf16.gmra.mrb[136].mxu1 %vm400_vm1, %v12392_v56  ;;  %9912 = vmatmul.mubr.msk.bf16.gmra.mrb[64].mxu0 %vm400_vm1, %v12666_v11 }
 0x12d   : > { %883 = vmatprep.mubr.bf16.mxu1 %v12103_v5  ;;  %2429 = vmatprep.mubr.bf16.mxu0 %v12103_v5  ;;  %v12684_v56 = vsel %vm2105_vm3, %v2139_v32, %v2141_v44  ;;  %v2222_v44 = vsel %vm455_vm0, %v12461_v52, 0 }
 0x12f   : > { %v12670_v10 = vpop.f32.mrb[32].mxu1 }
 0x130   : > { %15134 = vst [vmem:[#allocation28_spill] sm:$0xff] %v12670_v10  ;;  %v12674_v45 = vpop.f32.mrb[33].mxu1  ;;  %v11793_v10 = vld [vmem:[%s12175_s29 + $0x10] sm:$0xff]  }
 0x131   : > { %15135 = vst [vmem:[#allocation29_spill] sm:$0xff] %v12674_v45  ;;  %v12676_v13 = vpop.f32.mrb[34].mxu1 }
 0x132   : > { %15136 = vst [vmem:[#allocation30_spill] sm:$0xff] %v12676_v13  ;;  %v12679_v14 = vpop.f32.mrb[35].mxu1 }
 0x133   : > { %15137 = vst [vmem:[#allocation31_spill] sm:$0xff] %v12679_v14  ;;  %v2930_v14 = vrot.slane %v11793_v10, 1 }
 0x134   : > { %9816 = vmatmul.mubr.msk.bf16.gmra.mrb[140].mxu1 %vm400_vm1, %v12404_v0  ;;  %9913 = vmatmul.mubr.msk.bf16.gmra.mrb[68].mxu0 %vm400_vm1, %v12684_v56  ;;  %v2929_v0 = vrot.slane %v11792_v22, 1 }
 0x135   : > { %1648 = vmatprep.mubr.bf16.mxu1 %v12103_v5  ;;  %3082 = vmatprep.mubr.bf16.mxu0 %v12103_v5 }
 0x137   : > { %v12689_v30 = vpop.f32.mrb[36].mxu1 }
 0x138   : > { %15138 = vst [vmem:[#allocation32_spill] sm:$0xff] %v12689_v30  ;;  %v12693_v13 = vpop.f32.mrb[37].mxu1  ;;  %v12705_v30 = vsel %vm2105_vm3, %v2929_v0, %v2930_v14 }
 0x139   : > { %15139 = vst [vmem:[#allocation33_spill] sm:$0xff] %v12693_v13  ;;  %v12695_v23 = vpop.f32.mrb[38].mxu1 }
 0x13a   : > { %15140 = vst [vmem:[#allocation34_spill] sm:$0xff] %v12695_v23  ;;  %v12698_v32 = vpop.f32.mrb[39].mxu1  ;;  %v11794_v23 = vld [vmem:[%s12175_s29 + $0x18] sm:$0xff]  }
 0x13b   : > { %15141 = vst [vmem:[#allocation35_spill] sm:$0xff] %v12698_v32  ;;  %v2932_v52 = vrot.slane %v11794_v23, 1 }
 0x13c   : > { %9857 = vmatmul.mubr.msk.bf16.vlgmr.msra.gmra.mrb[72].mxu1 %vm400_vm1, %v12190_v36  ;;  %9954 = vmatmul.mubr.msk.bf16.vlgmr.msra.gmra.mrb[0].mxu0 %vm400_vm1, %v12705_v30 }
 0x13d   : > { %2441 = vmatpush1.bf16.msra.mxu1 %v2222_v44  ;;  %1658 = vmatprep.mubr.bf16.mxu1 %v12103_v5  ;;  %v12723_v0 = vsel %vm2105_vm3, %v2930_v14, %v2932_v52  ;;  %v11795_v44 = vld [vmem:[%s12175_s29 + $0x20] sm:$0xff]  }
 0x13e   : > { %3092 = vmatprep.mubr.bf16.mxu0 %v12103_v5 }
 0x13f   : > { %v12709_v13 = vpop.f32.mrb[40].mxu1 }
 0x140   : > { %15142 = vst [vmem:[#allocation36_spill] sm:$0xff] %v12709_v13  ;;  %v12713_v10 = vpop.f32.mrb[41].mxu1 }
 0x141   : > { %15143 = vst [vmem:[#allocation37_spill] sm:$0xff] %v12713_v10  ;;  %v12715_v22 = vpop.f32.mrb[42].mxu1 }
 0x142   : > { %15144 = vst [vmem:[#allocation38_spill] sm:$0xff] %v12715_v22  ;;  %v12718_v36 = vpop.f32.mrb[43].mxu1  ;;  %v12732_v22 = vld [vmem:[%s15085_s1 + $0x20] sm:$0xff] }
 0x143   : > { %15145 = vst [vmem:[#allocation39_spill] sm:$0xff] %v12718_v36  ;;  %v2934_v36 = vrot.slane %v11795_v44, 1  ;;  %v11796_v44 = vld [vmem:[%s12175_s29 + $0x28] sm:$0xff]  }
 0x144   : > { %9858 = vmatmul.mubr.msk.bf16.gmra.mrb[76].mxu1 %vm400_vm1, %v12199_v42  ;;  %9955 = vmatmul.mubr.msk.bf16.gmra.mrb[4].mxu0 %vm400_vm1, %v12723_v0  ;;  %v3931_v42 = vrot.slane %v12732_v22, %v12162_v12 }
 0x145   : > { %1668 = vmatprep.mubr.bf16.mxu1 %v12103_v5  ;;  %3102 = vmatprep.mubr.bf16.mxu0 %v12103_v5  ;;  %v12752_v45 = vsel %vm2105_vm3, %v2932_v52, %v2934_v36  ;;  %v2936_v52 = vrot.slane %v11796_v44, 1 }
 0x146   : > { %v3939_v10 = vcombine.high %v3931_v42, %v3931_v42  ;;  %v3996_v32 = vsel %vm455_vm0, %v3931_v42, 0 }
 0x147   : > { %v12727_v13 = vpop.f32.mrb[44].mxu1 }
 0x148   : > { %15146 = vst [vmem:[#allocation40_spill] sm:$0xff] %v12727_v13  ;;  %v12736_v23 = vpop.f32.mrb[45].mxu1  ;;  %10011 = vmatprep.subr.msk.bf16.mxu0 %vm455_vm0, %v3939_v10 }
 0x149   : > { %15147 = vst [vmem:[#allocation41_spill] sm:$0xff] %v12736_v23  ;;  %v12740_v14 = vpop.f32.mrb[46].mxu1  ;;  %v2967_v23 = vcombine.high %v12442_v31, %v12442_v31  ;;  %4008 = vmatpush1.bf16.msra.mxu0 %v3996_v32  ;;  %v12776_v32 = vsel %vm2105_vm3, %v2934_v36, %v2936_v52 }
 0x14a   : > { %15148 = vst [vmem:[#allocation42_spill] sm:$0xff] %v12740_v14  ;;  %v12743_v13 = vpop.f32.mrb[47].mxu1 }
 0x14b   : > { %15149 = vst [vmem:[#allocation43_spill] sm:$0xff] %v12743_v13  ;;  %v12757_v13 = vrot.slane %v2967_v23, %v12162_v12  ;;  %v11797_v23 = vld [vmem:[%s12175_s29 + $0x30] sm:$0xff]  }
 0x14c   : > { %9859 = vmatmul.mubr.msk.bf16.gmra.mrb[80].mxu1 %vm400_vm1, %v12214_v53  ;;  %9956 = vmatmul.mubr.msk.bf16.gmra.mrb[8].mxu0 %vm400_vm1, %v12752_v45 }
 0x14d   : > { %1678 = vmatprep.mubr.bf16.mxu1 %v12103_v5  ;;  %v2983_v31 = vcombine.high %v12757_v13, %v12757_v13  ;;  %3112 = vmatprep.mubr.bf16.mxu0 %v12103_v5 }
 0x14f   : > { %v12759_v42 = vpop.f32.mrb[48].mxu1  ;;  %9972 = vmatprep.subr.msk.bf16.mxu1 %vm455_vm0, %v2983_v31  ;;  %v2938_v31 = vrot.slane %v11797_v23, 1 }
 0x150   : > { %15150 = vst [vmem:[#allocation44_spill] sm:$0xff] %v12759_v42  ;;  %v12763_v53 = vpop.f32.mrb[49].mxu1 }
 0x151   : > { %15151 = vst [vmem:[#allocation45_spill] sm:$0xff] %v12763_v53  ;;  %v12767_v10 = vpop.f32.mrb[50].mxu1  ;;  %v12794_v36 = vsel %vm2105_vm3, %v2936_v52, %v2938_v31 }
 0x152   : > { %15152 = vst [vmem:[#allocation46_spill] sm:$0xff] %v12767_v10  ;;  %v12770_v14 = vpop.f32.mrb[51].mxu1 }
 0x153   : > { %15153 = vst [vmem:[#allocation47_spill] sm:$0xff] %v12770_v14 }
 0x154   : > { %9860 = vmatmul.mubr.msk.bf16.gmra.mrb[84].mxu1 %vm400_vm1, %v12225_v58  ;;  %9957 = vmatmul.mubr.msk.bf16.gmra.mrb[12].mxu0 %vm400_vm1, %v12776_v32 }
 0x155   : > { %1688 = vmatprep.mubr.bf16.mxu1 %v12103_v5  ;;  %3122 = vmatprep.mubr.bf16.mxu0 %v12103_v5 }
 0x157   : > { %v12780_v53 = vpop.f32.mrb[52].mxu1 }
 0x158   : > { %15154 = vst [vmem:[#allocation48_spill] sm:$0xff] %v12780_v53  ;;  %v12784_v44 = vpop.f32.mrb[53].mxu1  ;;  %v11798_v53 = vld [vmem:[%s12175_s29 + $0x38] sm:$0xff]  }
 0x159   : > { %15155 = vst [vmem:[#allocation49_spill] sm:$0xff] %v12784_v44  ;;  %v12786_v14 = vpop.f32.mrb[54].mxu1 }
 0x15a   : > { %15156 = vst [vmem:[#allocation50_spill] sm:$0xff] %v12786_v14  ;;  %v12789_v58 = vpop.f32.mrb[55].mxu1 }
 0x15b   : > { %15157 = vst [vmem:[#allocation51_spill] sm:$0xff] %v12789_v58  ;;  %v2940_v58 = vrot.slane %v11798_v53, 1 }
 0x15c   : > { %9861 = vmatmul.mubr.msk.bf16.gmra.mrb[88].mxu1 %vm400_vm1, %v12240_v4  ;;  %9958 = vmatmul.mubr.msk.bf16.gmra.mrb[16].mxu0 %vm400_vm1, %v12794_v36 }
 0x15d   : > { %1698 = vmatprep.mubr.bf16.mxu1 %v12103_v5  ;;  %3132 = vmatprep.mubr.bf16.mxu0 %v12103_v5  ;;  %v12812_v52 = vsel %vm2105_vm3, %v2938_v31, %v2940_v58 }
 0x15f   : > { %v12798_v10 = vpop.f32.mrb[56].mxu1 }
 0x160   : > { %15158 = vst [vmem:[#allocation52_spill] sm:$0xff] %v12798_v10  ;;  %v12802_v14 = vpop.f32.mrb[57].mxu1  ;;  %v11799_v10 = vld [vmem:[%s12175_s29 + $0x40] sm:$0xff]  }
 0x161   : > { %15159 = vst [vmem:[#allocation53_spill] sm:$0xff] %v12802_v14  ;;  %v12804_v23 = vpop.f32.mrb[58].mxu1 }
 0x162   : > { %15160 = vst [vmem:[#allocation54_spill] sm:$0xff] %v12804_v23  ;;  %v12807_v4 = vpop.f32.mrb[59].mxu1 }
 0x163   : > { %15161 = vst [vmem:[#allocation55_spill] sm:$0xff] %v12807_v4  ;;  %v2942_v4 = vrot.slane %v11799_v10, 1 }
 0x164   : > { %9862 = vmatmul.mubr.msk.bf16.gmra.mrb[92].mxu1 %vm400_vm1, %v12258_v20  ;;  %9959 = vmatmul.mubr.msk.bf16.gmra.mrb[20].mxu0 %vm400_vm1, %v12812_v52 }
 0x165   : > { %1708 = vmatprep.mubr.bf16.mxu1 %v12103_v5  ;;  %3142 = vmatprep.mubr.bf16.mxu0 %v12103_v5  ;;  %v12830_v31 = vsel %vm2105_vm3, %v2940_v58, %v2942_v4 }
 0x167   : > { %v12816_v44 = vpop.f32.mrb[60].mxu1 }
 0x168   : > { %15162 = vst [vmem:[#allocation56_spill] sm:$0xff] %v12816_v44  ;;  %v12820_v23 = vpop.f32.mrb[61].mxu1  ;;  %v11800_v44 = vld [vmem:[%s12175_s29 + $0x48] sm:$0xff]  }
 0x169   : > { %15163 = vst [vmem:[#allocation57_spill] sm:$0xff] %v12820_v23  ;;  %v12822_v53 = vpop.f32.mrb[62].mxu1 }
 0x16a   : > { %15164 = vst [vmem:[#allocation58_spill] sm:$0xff] %v12822_v53  ;;  %v12825_v20 = vpop.f32.mrb[63].mxu1 }
 0x16b   : > { %15165 = vst [vmem:[#allocation59_spill] sm:$0xff] %v12825_v20  ;;  %v2944_v20 = vrot.slane %v11800_v44, 1 }
 0x16c   : > { %9863 = vmatmul.mubr.msk.bf16.gmra.mrb[96].mxu1 %vm400_vm1, %v12271_v27  ;;  %9960 = vmatmul.mubr.msk.bf16.gmra.mrb[24].mxu0 %vm400_vm1, %v12830_v31 }
 0x16d   : > { %1718 = vmatprep.mubr.bf16.mxu1 %v12103_v5  ;;  %3152 = vmatprep.mubr.bf16.mxu0 %v12103_v5  ;;  %v12848_v58 = vsel %vm2105_vm3, %v2942_v4, %v2944_v20 }
 0x16f   : > { %v12834_v14 = vpop.f32.mrb[64].mxu1 }
 0x170   : > { %15166 = vst [vmem:[#allocation60_spill] sm:$0xff] %v12834_v14  ;;  %v12838_v53 = vpop.f32.mrb[65].mxu1  ;;  %v11801_v14 = vld [vmem:[%s12175_s29 + $0x50] sm:$0xff]  }
 0x171   : > { %15167 = vst [vmem:[#allocation61_spill] sm:$0xff] %v12838_v53  ;;  %v12840_v10 = vpop.f32.mrb[66].mxu1 }
 0x172   : > { %15168 = vst [vmem:[#allocation62_spill] sm:$0xff] %v12840_v10  ;;  %v12843_v27 = vpop.f32.mrb[67].mxu1 }
 0x173   : > { %15169 = vst [vmem:[#allocation63_spill] sm:$0xff] %v12843_v27  ;;  %v2946_v27 = vrot.slane %v11801_v14, 1 }
 0x174   : > { %9864 = vmatmul.mubr.msk.bf16.gmra.mrb[100].mxu1 %vm400_vm1, %v12284_v34  ;;  %9961 = vmatmul.mubr.msk.bf16.gmra.mrb[28].mxu0 %vm400_vm1, %v12848_v58 }
 0x175   : > { %1728 = vmatprep.mubr.bf16.mxu1 %v12103_v5  ;;  %3162 = vmatprep.mubr.bf16.mxu0 %v12103_v5  ;;  %v12866_v4 = vsel %vm2105_vm3, %v2944_v20, %v2946_v27 }
 0x177   : > { %v12852_v23 = vpop.f32.mrb[68].mxu1 }
 0x178   : > { %15170 = vst [vmem:[#allocation64_spill] sm:$0xff] %v12852_v23  ;;  %v12856_v10 = vpop.f32.mrb[69].mxu1  ;;  %v11802_v23 = vld [vmem:[%s12175_s29 + $0x58] sm:$0xff]  }
 0x179   : > { %15171 = vst [vmem:[#allocation65_spill] sm:$0xff] %v12856_v10  ;;  %v12858_v44 = vpop.f32.mrb[70].mxu1 }
 0x17a   : > { %15172 = vst [vmem:[#allocation66_spill] sm:$0xff] %v12858_v44  ;;  %v12861_v34 = vpop.f32.mrb[71].mxu1  ;;  %v2948_v44 = vrot.slane %v11802_v23, 1 }
 0x17b   : > { %15173 = vst [vmem:[#allocation67_spill] sm:$0xff] %v12861_v34  ;;  %v11810_v34 = vld [vmem:[%s12175_s29 + $0x98] ss:$0 sps:$4 sm:$0x11]  }
 0x17c   : > { %9865 = vmatmul.mubr.msk.bf16.gmra.mrb[104].mxu1 %vm400_vm1, %v12297_v43  ;;  %9962 = vmatmul.mubr.msk.bf16.gmra.mrb[32].mxu0 %vm400_vm1, %v12866_v4  ;;  %v12876_v14 = vsel %vm2105_vm3, %v2946_v27, %v2948_v44  ;;  %v11803_v43 = vld [vmem:[%s12175_s29 + $0x60] sm:$0xff]   ;;  %v2964_v10 = vrot.slane %v11810_v34, 1  ;;  %v11814_v34 = vld [vmem:[%s12175_s29 + $0x18] sm:$0xff]  }
 0x17d   : > { %1738 = vmatprep.mubr.bf16.mxu1 %v12103_v5  ;;  %3172 = vmatprep.mubr.bf16.mxu0 %v12103_v5  ;;  %v2950_v20 = vrot.slane %v11803_v43, 1  ;;  %v3771_v16 = vshrl.u32 %v11814_v34, 16 }
 0x17f   : > { %v12886_v23 = vsel %vm2105_vm3, %v2948_v44, %v2950_v20 }
 0x184   : > { %9866 = vmatmul.mubr.msk.bf16.gmra.mrb[108].mxu1 %vm400_vm1, %v12310_v51  ;;  %9963 = vmatmul.mubr.msk.bf16.gmra.mrb[36].mxu0 %vm400_vm1, %v12876_v14  ;;  %v11804_v51 = vld [vmem:[%s12175_s29 + $0x68] sm:$0xff]  }
 0x185   : > { %1748 = vmatprep.mubr.bf16.mxu1 %v12103_v5  ;;  %3182 = vmatprep.mubr.bf16.mxu0 %v12103_v5  ;;  %v2952_v27 = vrot.slane %v11804_v51, 1 }
 0x187   : > { %v12896_v43 = vsel %vm2105_vm3, %v2950_v20, %v2952_v27 }
 0x18c   : > { %9867 = vmatmul.mubr.msk.bf16.gmra.mrb[112].mxu1 %vm400_vm1, %v12323_v60  ;;  %9964 = vmatmul.mubr.msk.bf16.gmra.mrb[40].mxu0 %vm400_vm1, %v12886_v23  ;;  %v11805_v60 = vld [vmem:[%s12175_s29 + $0x70] sm:$0xff]  }
 0x18d   : > { %1758 = vmatprep.mubr.bf16.mxu1 %v12103_v5  ;;  %3192 = vmatprep.mubr.bf16.mxu0 %v12103_v5  ;;  %v2954_v44 = vrot.slane %v11805_v60, 1 }
 0x18f   : > { %v12906_v51 = vsel %vm2105_vm3, %v2952_v27, %v2954_v44 }
 0x194   : > { %9868 = vmatmul.mubr.msk.bf16.gmra.mrb[116].mxu1 %vm400_vm1, %v12336_v7  ;;  %9965 = vmatmul.mubr.msk.bf16.gmra.mrb[44].mxu0 %vm400_vm1, %v12896_v43  ;;  %v11806_v7 = vld [vmem:[%s12175_s29 + $0x78] sm:$0xff]  }
 0x195   : > { %1768 = vmatprep.mubr.bf16.mxu1 %v12103_v5  ;;  %3202 = vmatprep.mubr.bf16.mxu0 %v12103_v5  ;;  %v2956_v20 = vrot.slane %v11806_v7, 1 }
 0x197   : > { %v12916_v60 = vsel %vm2105_vm3, %v2954_v44, %v2956_v20 }
 0x19c   : > { %9869 = vmatmul.mubr.msk.bf16.gmra.mrb[120].mxu1 %vm400_vm1, %v12349_v18  ;;  %9966 = vmatmul.mubr.msk.bf16.gmra.mrb[48].mxu0 %vm400_vm1, %v12906_v51  ;;  %v11807_v18 = vld [vmem:[%s12175_s29 + $0x80] sm:$0xff]  }
 0x19d   : > { %1778 = vmatprep.mubr.bf16.mxu1 %v12103_v5  ;;  %3212 = vmatprep.mubr.bf16.mxu0 %v12103_v5  ;;  %v2958_v27 = vrot.slane %v11807_v18, 1 }
 0x19f   : > { %v12926_v7 = vsel %vm2105_vm3, %v2956_v20, %v2958_v27 }
 0x1a4   : > { %9870 = vmatmul.mubr.msk.bf16.gmra.mrb[124].mxu1 %vm400_vm1, %v12362_v28  ;;  %9967 = vmatmul.mubr.msk.bf16.gmra.mrb[52].mxu0 %vm400_vm1, %v12916_v60  ;;  %v11808_v28 = vld [vmem:[%s12175_s29 + $0x88] sm:$0xff]  }
 0x1a5   : > { %1788 = vmatprep.mubr.bf16.mxu1 %v12103_v5  ;;  %3222 = vmatprep.mubr.bf16.mxu0 %v12103_v5  ;;  %v2960_v44 = vrot.slane %v11808_v28, 1 }
 0x1a7   : > { %v12936_v18 = vsel %vm2105_vm3, %v2958_v27, %v2960_v44  ;;  %v11813_v27 = vld [vmem:[%s12175_s29 + $0x10] sm:$0xff]  }
 0x1a8   : > { %v3762_v42 = vshrl.u32 %v11813_v27, 16  ;;  %v3765_v33 = vshll.u32 %v11813_v27, 16 }
 0x1aa   : > { %v3764_v21 = vrot.slane %v3762_v42, 1  ;;  %v3767_v19 = vrot.slane %v3765_v33, 2  ;;  %v3773_v42 = vrot.slane %v3771_v16, 1 }
 0x1ac   : > { %9871 = vmatmul.mubr.msk.bf16.gmra.mrb[128].mxu1 %vm400_vm1, %v12375_v39  ;;  %9968 = vmatmul.mubr.msk.bf16.gmra.mrb[56].mxu0 %vm400_vm1, %v12926_v7  ;;  %v11809_v39 = vld [vmem:[%s12175_s29 + $0x90] sm:$0xff]   ;;  %v3768_v27 = vor.u32 %v3767_v19, %v3764_v21 }
 0x1ad   : > { %1798 = vmatprep.mubr.bf16.mxu1 %v12103_v5  ;;  %3232 = vmatprep.mubr.bf16.mxu0 %v12103_v5  ;;  %v2962_v20 = vrot.slane %v11809_v39, 1 }
 0x1af   : > { %v12947_v28 = vsel %vm2105_vm3, %v2960_v44, %v2962_v20 }
 0x1b4   : > { %9872 = vmatmul.mubr.msk.bf16.gmra.mrb[132].mxu1 %vm400_vm1, %v12388_v50  ;;  %9969 = vmatmul.mubr.msk.bf16.gmra.mrb[60].mxu0 %vm400_vm1, %v12936_v18  ;;  %v11812_v50 = vld [vmem:[%s12175_s29 + $0x8] sm:$0xfe]  }
 0x1b5   : > { %1808 = vmatprep.mubr.bf16.mxu1 %v12103_v5  ;;  %3242 = vmatprep.mubr.bf16.mxu0 %v12103_v5  ;;  %v3754_v53 = vshrl.u32 %v11812_v50, 16  ;;  %v3757_v39 = vshll.u32 %v11812_v50, 16 }
 0x1b7   : > { %v3756_v44 = vrot.slane %v3754_v53, 1  ;;  %v3759_v55 = vrot.slane %v3757_v39, 2  ;;  %v11816_v39 = vld [vmem:[%s12175_s29 + $0x28] sm:$0xff]  }
 0x1b9   : > { %v3760_v50 = vor.u32 %v3759_v55, %v3756_v44  ;;  %v11815_v55 = vld [vmem:[%s12175_s29 + $0x20] sm:$0xff]   ;;  %v12987_v44 = vld [vmem:[%s15085_s1 + $0x28] sm:$0xff] }
 0x1ba   : > { %v3780_v21 = vshrl.u32 %v11815_v55, 16 }
 0x1bb   : > { %v12970_v33 = vsel %vm3752_vm4, %v3760_v50, %v3768_v27  ;;  %v3789_v50 = vshrl.u32 %v11816_v39, 16 }
 0x1bc   : > { %9873 = vmatmul.mubr.msk.bf16.gmra.mrb[136].mxu1 %vm400_vm1, %v12400_v59  ;;  %9970 = vmatmul.mubr.msk.bf16.gmra.mrb[64].mxu0 %vm400_vm1, %v12947_v28  ;;  %v12958_v59 = vsel %vm2105_vm3, %v2962_v20, %v2964_v10  ;;  %v3045_v10 = vsel %vm455_vm0, %v12757_v13, 0  ;;  %v3783_v13 = vshll.u32 %v11815_v55, 16  ;;  %v3782_v20 = vrot.slane %v3780_v21, 1 }
 0x1bd   : > { %1818 = vmatprep.mubr.bf16.mxu1 %v12103_v5  ;;  %3252 = vmatprep.mubr.bf16.mxu0 %v12103_v5  ;;  %v3791_v55 = vrot.slane %v3789_v50, 1 }
 0x1be   : > { %v3785_v16 = vrot.slane %v3783_v13, 2  ;;  %v11817_v13 = vld [vmem:[%s12175_s29 + $0x30] sm:$0xff]  }
 0x1c4   : > { %9874 = vmatmul.mubr.msk.bf16.gmra.mrb[140].mxu1 %vm400_vm1, %v12416_v15  ;;  %9971 = vmatmul.mubr.msk.bf16.gmra.mrb[68].mxu0 %vm400_vm1, %v12958_v59  ;;  %v3774_v15 = vshll.u32 %v11814_v34, 16  ;;  %v3786_v34 = vor.u32 %v3785_v16, %v3782_v20  ;;  %v3801_v16 = vshll.u32 %v11817_v13, 16 }
 0x1c5   : > { %2472 = vmatprep.mubr.bf16.mxu1 %v12103_v5  ;;  %4039 = vmatprep.mubr.bf16.mxu0 %v12103_v5 }
 0x1c6   : > { %v3776_v53 = vrot.slane %v3774_v15, 2  ;;  %v3803_v50 = vrot.slane %v3801_v16, 2 }
 0x1c8   : > { %v3777_v19 = vor.u32 %v3776_v53, %v3773_v42  ;;  %v3924_v42 = vcombine.high %v12732_v22, %v12732_v22 }
 0x1ca   : > { %v13001_v53 = vsel %vm3752_vm4, %v3777_v19, %v3786_v34  ;;  %v13006_v20 = vrot.slane %v3924_v42, %v12162_v12 }
 0x1cc   : > { %9915 = vmatmul.mubr.msk.bf16.vlgmr.msra.gmra.mrb[72].mxu1 %vm400_vm1, %v12425_v46  ;;  %10012 = vmatmul.mubr.msk.bf16.vlgmr.msra.gmra.mrb[0].mxu0 %vm400_vm1, %v12970_v33  ;;  %v12980_v46 = vsel %vm3752_vm4, %v3768_v27, %v3777_v19  ;;  %v3792_v27 = vshll.u32 %v11816_v39, 16  ;;  %v3798_v19 = vshrl.u32 %v11817_v13, 16 }
 0x1cd   : > { %3264 = vmatpush1.bf16.msra.mxu1 %v3045_v10  ;;  %2482 = vmatprep.mubr.bf16.mxu1 %v12103_v5 }
 0x1ce   : > { %4049 = vmatprep.mubr.bf16.mxu0 %v12103_v5  ;;  %v3794_v21 = vrot.slane %v3792_v27, 2  ;;  %v11818_v27 = vld [vmem:[%s12175_s29 + $0x38] sm:$0xff]  }
 0x1cf   : > { %v3810_v42 = vshll.u32 %v11818_v27, 16 }
 0x1d0   : > { %v3795_v22 = vor.u32 %v3794_v21, %v3791_v55  ;;  %v11819_v21 = vld [vmem:[%s12175_s29 + $0x40] sm:$0xff]  }
 0x1d1   : > { %v3812_v55 = vrot.slane %v3810_v42, 2 }
 0x1d2   : > { %v13017_v39 = vsel %vm3752_vm4, %v3786_v34, %v3795_v22 }
 0x1d4   : > { %9916 = vmatmul.mubr.msk.bf16.gmra.mrb[76].mxu1 %vm400_vm1, %v12435_v26  ;;  %10013 = vmatmul.mubr.msk.bf16.gmra.mrb[4].mxu0 %vm400_vm1, %v12980_v46  ;;  %v4755_v26 = vrot.slane %v12987_v44, %v12162_v12 }
 0x1d5   : > { %2492 = vmatprep.mubr.bf16.mxu1 %v12103_v5  ;;  %4059 = vmatprep.mubr.bf16.mxu0 %v12103_v5 }
 0x1d6   : > { %v4763_v15 = vcombine.high %v4755_v26, %v4755_v26  ;;  %v4820_v10 = vsel %vm455_vm0, %v4755_v26, 0  ;;  %v3800_v26 = vrot.slane %v3798_v19, 1  ;;  %v3819_v19 = vshll.u32 %v11819_v21, 16 }
 0x1d8   : > { %10069 = vmatprep.subr.msk.bf16.mxu0 %vm455_vm0, %v4763_v15  ;;  %v3804_v15 = vor.u32 %v3803_v50, %v3800_v26  ;;  %v3821_v16 = vrot.slane %v3819_v19, 2  ;;  %v11820_v26 = vld [vmem:[%s12175_s29 + $0x48] sm:$0xff]  }
 0x1d9   : > { %4832 = vmatpush1.bf16.msra.mxu0 %v4820_v10  ;;  %v3807_v10 = vshrl.u32 %v11818_v27, 16  ;;  %v3825_v27 = vshrl.u32 %v11820_v26, 16 }
 0x1db   : > { %v3809_v34 = vrot.slane %v3807_v10, 1  ;;  %v3828_v10 = vshll.u32 %v11820_v26, 16 }
 0x1dc   : > { %9917 = vmatmul.mubr.msk.bf16.gmra.mrb[80].mxu1 %vm400_vm1, %v12456_v48  ;;  %10014 = vmatmul.mubr.msk.bf16.gmra.mrb[8].mxu0 %vm400_vm1, %v13001_v53  ;;  %v3940_v48 = vcombine.high %v13006_v20, %v13006_v20 }
 0x1dd   : > { %2502 = vmatprep.mubr.bf16.mxu1 %v12103_v5  ;;  %4069 = vmatprep.mubr.bf16.mxu0 %v12103_v5  ;;  %v3813_v13 = vor.u32 %v3812_v55, %v3809_v34  ;;  %v3830_v42 = vrot.slane %v3828_v10, 2  ;;  %v11821_v34 = vld [vmem:[%s12175_s29 + $0x50] sm:$0xff]  }
 0x1de   : > { %10030 = vmatprep.subr.msk.bf16.mxu1 %vm455_vm0, %v3940_v48  ;;  %v3816_v48 = vshrl.u32 %v11819_v21, 16  ;;  %v3834_v21 = vshrl.u32 %v11821_v34, 16 }
 0x1e4   : > { %9918 = vmatmul.mubr.msk.bf16.gmra.mrb[84].mxu1 %vm400_vm1, %v12472_v61  ;;  %10015 = vmatmul.mubr.msk.bf16.gmra.mrb[12].mxu0 %vm400_vm1, %v13017_v39  ;;  %v13027_v61 = vsel %vm3752_vm4, %v3795_v22, %v3804_v15  ;;  %v3818_v22 = vrot.slane %v3816_v48, 1  ;;  %v3837_v48 = vshll.u32 %v11821_v34, 16 }
 0x1e5   : > { %2512 = vmatprep.mubr.bf16.mxu1 %v12103_v5  ;;  %4079 = vmatprep.mubr.bf16.mxu0 %v12103_v5 }
 0x1e6   : > { %v3822_v50 = vor.u32 %v3821_v16, %v3818_v22  ;;  %v3839_v19 = vrot.slane %v3837_v48, 2  ;;  %v11822_v22 = vld [vmem:[%s12175_s29 + $0x58] sm:$0xff]  }
 0x1e7   : > { %v3843_v26 = vshrl.u32 %v11822_v22, 16 }
 0x1ec   : > { %9919 = vmatmul.mubr.msk.bf16.gmra.mrb[88].mxu1 %vm400_vm1, %v12482_v8  ;;  %10016 = vmatmul.mubr.msk.bf16.gmra.mrb[16].mxu0 %vm400_vm1, %v13027_v61  ;;  %v13037_v8 = vsel %vm3752_vm4, %v3804_v15, %v3813_v13  ;;  %v3827_v15 = vrot.slane %v3825_v27, 1  ;;  %v3846_v27 = vshll.u32 %v11822_v22, 16 }
 0x1ed   : > { %2522 = vmatprep.mubr.bf16.mxu1 %v12103_v5  ;;  %4089 = vmatprep.mubr.bf16.mxu0 %v12103_v5 }
 0x1ee   : > { %v3831_v55 = vor.u32 %v3830_v42, %v3827_v15  ;;  %v3848_v10 = vrot.slane %v3846_v27, 2  ;;  %v11823_v15 = vld [vmem:[%s12175_s29 + $0x60] sm:$0xff]  }
 0x1ef   : > { %v3852_v34 = vshrl.u32 %v11823_v15, 16 }
 0x1f4   : > { %9920 = vmatmul.mubr.msk.bf16.gmra.mrb[92].mxu1 %vm400_vm1, %v12492_v17  ;;  %10017 = vmatmul.mubr.msk.bf16.gmra.mrb[20].mxu0 %vm400_vm1, %v13037_v8  ;;  %v13047_v17 = vsel %vm3752_vm4, %v3813_v13, %v3822_v50  ;;  %v3836_v13 = vrot.slane %v3834_v21, 1  ;;  %v3855_v21 = vshll.u32 %v11823_v15, 16 }
 0x1f5   : > { %2532 = vmatprep.mubr.bf16.mxu1 %v12103_v5  ;;  %4099 = vmatprep.mubr.bf16.mxu0 %v12103_v5 }
 0x1f6   : > { %v3840_v16 = vor.u32 %v3839_v19, %v3836_v13  ;;  %v3857_v48 = vrot.slane %v3855_v21, 2  ;;  %v11824_v13 = vld [vmem:[%s12175_s29 + $0x68] sm:$0xff]  }
 0x1f7   : > { %v3861_v22 = vshrl.u32 %v11824_v13, 16 }
 0x1fc   : > { %9921 = vmatmul.mubr.msk.bf16.gmra.mrb[96].mxu1 %vm400_vm1, %v12502_v24  ;;  %10018 = vmatmul.mubr.msk.bf16.gmra.mrb[24].mxu0 %vm400_vm1, %v13047_v17  ;;  %v13057_v24 = vsel %vm3752_vm4, %v3822_v50, %v3831_v55  ;;  %v3845_v50 = vrot.slane %v3843_v26, 1  ;;  %v3864_v26 = vshll.u32 %v11824_v13, 16 }
 0x1fd   : > { %2542 = vmatprep.mubr.bf16.mxu1 %v12103_v5  ;;  %4109 = vmatprep.mubr.bf16.mxu0 %v12103_v5 }
 0x1fe   : > { %v3849_v42 = vor.u32 %v3848_v10, %v3845_v50  ;;  %v3866_v27 = vrot.slane %v3864_v26, 2  ;;  %v11825_v50 = vld [vmem:[%s12175_s29 + $0x70] sm:$0xff]  }
 0x1ff   : > { %v3870_v15 = vshrl.u32 %v11825_v50, 16 }
 0x204   : > { %9922 = vmatmul.mubr.msk.bf16.gmra.mrb[100].mxu1 %vm400_vm1, %v12512_v29  ;;  %10019 = vmatmul.mubr.msk.bf16.gmra.mrb[28].mxu0 %vm400_vm1, %v13057_v24  ;;  %v13067_v29 = vsel %vm3752_vm4, %v3831_v55, %v3840_v16  ;;  %v3854_v55 = vrot.slane %v3852_v34, 1  ;;  %v3873_v34 = vshll.u32 %v11825_v50, 16 }
 0x205   : > { %2552 = vmatprep.mubr.bf16.mxu1 %v12103_v5  ;;  %4119 = vmatprep.mubr.bf16.mxu0 %v12103_v5 }
 0x206   : > { %v3858_v19 = vor.u32 %v3857_v48, %v3854_v55  ;;  %v3875_v21 = vrot.slane %v3873_v34, 2  ;;  %v11826_v55 = vld [vmem:[%s12175_s29 + $0x78] sm:$0xff]  }
 0x207   : > { %v3879_v13 = vshrl.u32 %v11826_v55, 16 }
 0x20c   : > { %9923 = vmatmul.mubr.msk.bf16.gmra.mrb[104].mxu1 %vm400_vm1, %v12522_v35  ;;  %10020 = vmatmul.mubr.msk.bf16.gmra.mrb[32].mxu0 %vm400_vm1, %v13067_v29  ;;  %v13077_v35 = vsel %vm3752_vm4, %v3840_v16, %v3849_v42  ;;  %v3863_v16 = vrot.slane %v3861_v22, 1  ;;  %v3882_v22 = vshll.u32 %v11826_v55, 16 }
 0x20d   : > { %2562 = vmatprep.mubr.bf16.mxu1 %v12103_v5  ;;  %4129 = vmatprep.mubr.bf16.mxu0 %v12103_v5 }
 0x20e   : > { %v3867_v10 = vor.u32 %v3866_v27, %v3863_v16  ;;  %v3884_v26 = vrot.slane %v3882_v22, 2  ;;  %v11827_v16 = vld [vmem:[%s12175_s29 + $0x80] sm:$0xff]  }
 0x20f   : > { %v3888_v50 = vshrl.u32 %v11827_v16, 16 }
 0x214   : > { %9924 = vmatmul.mubr.msk.bf16.gmra.mrb[108].mxu1 %vm400_vm1, %v12540_v49  ;;  %10021 = vmatmul.mubr.msk.bf16.gmra.mrb[36].mxu0 %vm400_vm1, %v13077_v35  ;;  %v13087_v49 = vsel %vm3752_vm4, %v3849_v42, %v3858_v19  ;;  %v3872_v42 = vrot.slane %v3870_v15, 1  ;;  %v3891_v15 = vshll.u32 %v11827_v16, 16 }
 0x215   : > { %2572 = vmatprep.mubr.bf16.mxu1 %v12103_v5  ;;  %4139 = vmatprep.mubr.bf16.mxu0 %v12103_v5 }
 0x216   : > { %v3876_v48 = vor.u32 %v3875_v21, %v3872_v42  ;;  %v3893_v34 = vrot.slane %v3891_v15, 2  ;;  %v11828_v42 = vld [vmem:[%s12175_s29 + $0x88] sm:$0xff]  }
 0x217   : > { %v3897_v55 = vshrl.u32 %v11828_v42, 16 }
 0x21c   : > { %9925 = vmatmul.mubr.msk.bf16.gmra.mrb[112].mxu1 %vm400_vm1, %v12558_v6  ;;  %10022 = vmatmul.mubr.msk.bf16.gmra.mrb[40].mxu0 %vm400_vm1, %v13087_v49  ;;  %v13097_v6 = vsel %vm3752_vm4, %v3858_v19, %v3867_v10  ;;  %v3881_v19 = vrot.slane %v3879_v13, 1  ;;  %v3900_v13 = vshll.u32 %v11828_v42, 16 }
 0x21d   : > { %2582 = vmatprep.mubr.bf16.mxu1 %v12103_v5  ;;  %4149 = vmatprep.mubr.bf16.mxu0 %v12103_v5 }
 0x21e   : > { %v3885_v27 = vor.u32 %v3884_v26, %v3881_v19  ;;  %v3902_v22 = vrot.slane %v3900_v13, 2  ;;  %v11829_v19 = vld [vmem:[%s12175_s29 + $0x90] sm:$0xff]  }
 0x21f   : > { %v3906_v16 = vshrl.u32 %v11829_v19, 16 }
 0x224   : > { %9926 = vmatmul.mubr.msk.bf16.gmra.mrb[116].mxu1 %vm400_vm1, %v12576_v25  ;;  %10023 = vmatmul.mubr.msk.bf16.gmra.mrb[44].mxu0 %vm400_vm1, %v13097_v6  ;;  %v13107_v25 = vsel %vm3752_vm4, %v3867_v10, %v3876_v48  ;;  %v3890_v10 = vrot.slane %v3888_v50, 1  ;;  %v3909_v50 = vshll.u32 %v11829_v19, 16  ;;  %v11833_v19 = vld [vmem:[%s12175_s29 + $0x10] sm:$0xff]  }
 0x225   : > { %2592 = vmatprep.mubr.bf16.mxu1 %v12103_v5  ;;  %4159 = vmatprep.mubr.bf16.mxu0 %v12103_v5 }
 0x226   : > { %v3894_v21 = vor.u32 %v3893_v34, %v3890_v10  ;;  %v3911_v15 = vrot.slane %v3909_v50, 2  ;;  %v11830_v10 = vld [vmem:[%s12175_s29 + $0x98] ss:$0 sps:$4 sm:$0x33]   ;;  %v4002_v50 = vsel %vm455_vm0, %v13006_v20, 0 }
 0x227   : > { %v3915_v42 = vshrl.u32 %v11830_v10, 16 }
 0x22c   : > { %9927 = vmatmul.mubr.msk.bf16.gmra.mrb[120].mxu1 %vm400_vm1, %v12594_v1  ;;  %10024 = vmatmul.mubr.msk.bf16.gmra.mrb[48].mxu0 %vm400_vm1, %v13107_v25  ;;  %v13117_v1 = vsel %vm3752_vm4, %v3876_v48, %v3885_v27  ;;  %v3899_v48 = vrot.slane %v3897_v55, 1  ;;  %v3918_v55 = vshll.u32 %v11830_v10, 16  ;;  %v13186_v10 = vld [vmem:[%s15085_s1 + $0x30] sm:$0xff] }
 0x22d   : > { %2602 = vmatprep.mubr.bf16.mxu1 %v12103_v5  ;;  %4169 = vmatprep.mubr.bf16.mxu0 %v12103_v5 }
 0x22e   : > { %v3903_v26 = vor.u32 %v3902_v22, %v3899_v48  ;;  %v3920_v13 = vrot.slane %v3918_v55, 2 }
 0x234   : > { %9928 = vmatmul.mubr.msk.bf16.gmra.mrb[124].mxu1 %vm400_vm1, %v12612_v9  ;;  %10025 = vmatmul.mubr.msk.bf16.gmra.mrb[52].mxu0 %vm400_vm1, %v13117_v1  ;;  %v13127_v9 = vsel %vm3752_vm4, %v3885_v27, %v3894_v21  ;;  %v3908_v27 = vrot.slane %v3906_v16, 1  ;;  %v4711_v16 = vrot.slane %v11833_v19, 2 }
 0x235   : > { %2612 = vmatprep.mubr.bf16.mxu1 %v12103_v5  ;;  %4179 = vmatprep.mubr.bf16.mxu0 %v12103_v5 }
 0x236   : > { %v3912_v34 = vor.u32 %v3911_v15, %v3908_v27  ;;  %v11834_v27 = vld [vmem:[%s12175_s29 + $0x18] sm:$0xff]  }
 0x237   : > { %v4713_v15 = vrot.slane %v11834_v27, 2 }
 0x239   : > { %v13179_v20 = vsel %vm4709_vm5, %v4711_v16, %v4713_v15 }
 0x23c   : > { %9929 = vmatmul.mubr.msk.bf16.gmra.mrb[128].mxu1 %vm400_vm1, %v12630_v54  ;;  %10026 = vmatmul.mubr.msk.bf16.gmra.mrb[56].mxu0 %vm400_vm1, %v13127_v9  ;;  %v13137_v54 = vsel %vm3752_vm4, %v3894_v21, %v3903_v26  ;;  %v3917_v21 = vrot.slane %v3915_v42, 1 }
 0x23d   : > { %2622 = vmatprep.mubr.bf16.mxu1 %v12103_v5  ;;  %4189 = vmatprep.mubr.bf16.mxu0 %v12103_v5 }
 0x23e   : > { %v3921_v48 = vor.u32 %v3920_v13, %v3917_v21  ;;  %v4748_v21 = vcombine.high %v12987_v44, %v12987_v44 }
 0x240   : > { %v13156_v22 = vsel %vm3752_vm4, %v3912_v34, %v3921_v48  ;;  %v11836_v48 = vld [vmem:[%s12175_s29 + $0x28] sm:$0xff]  }
 0x241   : > { %v4717_v44 = vrot.slane %v11836_v48, 2 }
 0x244   : > { %9930 = vmatmul.mubr.msk.bf16.gmra.mrb[132].mxu1 %vm400_vm1, %v12648_v63  ;;  %10027 = vmatmul.mubr.msk.bf16.gmra.mrb[60].mxu0 %vm400_vm1, %v13137_v54  ;;  %v13147_v63 = vsel %vm3752_vm4, %v3903_v26, %v3912_v34  ;;  %v5578_v34 = vrot.slane %v13186_v10, %v12162_v12 }
 0x245   : > { %2632 = vmatprep.mubr.bf16.mxu1 %v12103_v5  ;;  %4199 = vmatprep.mubr.bf16.mxu0 %v12103_v5 }
 0x246   : > { %v5586_v42 = vcombine.high %v5578_v34, %v5578_v34  ;;  %v5643_v55 = vsel %vm455_vm0, %v5578_v34, 0 }
 0x248   : > { %10127 = vmatprep.subr.msk.bf16.mxu0 %vm455_vm0, %v5586_v42 }
 0x24c   : > { %9931 = vmatmul.mubr.msk.bf16.gmra.mrb[136].mxu1 %vm400_vm1, %v12666_v11  ;;  %10028 = vmatmul.mubr.msk.bf16.gmra.mrb[64].mxu0 %vm400_vm1, %v13147_v63  ;;  %v11832_v11 = vld [vmem:[%s12175_s29 + $0x8] sm:$0xfc]  }
 0x24d   : > { %2642 = vmatprep.mubr.bf16.mxu1 %v12103_v5  ;;  %4209 = vmatprep.mubr.bf16.mxu0 %v12103_v5  ;;  %v4710_v26 = vrot.slane %v11832_v11, 2  ;;  %v13205_v11 = vrot.slane %v4748_v21, %v12162_v12 }
 0x254   : > { %9932 = vmatmul.mubr.msk.bf16.gmra.mrb[140].mxu1 %vm400_vm1, %v12684_v56  ;;  %10029 = vmatmul.mubr.msk.bf16.gmra.mrb[68].mxu0 %vm400_vm1, %v13156_v22  ;;  %v13169_v56 = vsel %vm4709_vm5, %v4710_v26, %v4711_v16  ;;  %v11837_v26 = vld [vmem:[%s12175_s29 + $0x30] sm:$0xff]  }
 0x255   : > { %3295 = vmatprep.mubr.bf16.mxu1 %v12103_v5  ;;  %4863 = vmatprep.mubr.bf16.mxu0 %v12103_v5  ;;  %v4719_v16 = vrot.slane %v11837_v26, 2 }
 0x25c   : > { %9973 = vmatmul.mubr.msk.bf16.vlgmr.msra.gmra.mrb[72].mxu1 %vm400_vm1, %v12705_v30  ;;  %10070 = vmatmul.mubr.msk.bf16.vlgmr.msra.gmra.mrb[0].mxu0 %vm400_vm1, %v13169_v56  ;;  %v11835_v30 = vld [vmem:[%s12175_s29 + $0x20] sm:$0xff]  }
 0x25d   : > { %4221 = vmatpush1.bf16.msra.mxu1 %v4002_v50  ;;  %3305 = vmatprep.mubr.bf16.mxu1 %v12103_v5  ;;  %v13226_v50 = vsel %vm4709_vm5, %v4717_v44, %v4719_v16 }
 0x25e   : > { %4873 = vmatprep.mubr.bf16.mxu0 %v12103_v5  ;;  %5655 = vmatpush1.bf16.msra.mxu0 %v5643_v55 }
 0x264   : > { %9974 = vmatmul.mubr.msk.bf16.gmra.mrb[76].mxu1 %vm400_vm1, %v12723_v0  ;;  %10071 = vmatmul.mubr.msk.bf16.gmra.mrb[4].mxu0 %vm400_vm1, %v13179_v20  ;;  %v4715_v0 = vrot.slane %v11835_v30, 2 }
 0x265   : > { %3315 = vmatprep.mubr.bf16.mxu1 %v12103_v5  ;;  %4883 = vmatprep.mubr.bf16.mxu0 %v12103_v5 }
 0x266   : > { %v13200_v13 = vsel %vm4709_vm5, %v4713_v15, %v4715_v0  ;;  %v13216_v19 = vsel %vm4709_vm5, %v4715_v0, %v4717_v44 }
 0x26c   : > { %9975 = vmatmul.mubr.msk.bf16.gmra.mrb[80].mxu1 %vm400_vm1, %v12752_v45  ;;  %10072 = vmatmul.mubr.msk.bf16.gmra.mrb[8].mxu0 %vm400_vm1, %v13200_v13  ;;  %v4764_v45 = vcombine.high %v13205_v11, %v13205_v11 }
 0x26d   : > { %3325 = vmatprep.mubr.bf16.mxu1 %v12103_v5  ;;  %4893 = vmatprep.mubr.bf16.mxu0 %v12103_v5 }
 0x26e   : > { %10088 = vmatprep.subr.msk.bf16.mxu1 %vm455_vm0, %v4764_v45 }
 0x274   : > { %9976 = vmatmul.mubr.msk.bf16.gmra.mrb[84].mxu1 %vm400_vm1, %v12776_v32  ;;  %10073 = vmatmul.mubr.msk.bf16.gmra.mrb[12].mxu0 %vm400_vm1, %v13216_v19  ;;  %v11838_v32 = vld [vmem:[%s12175_s29 + $0x38] sm:$0xff]  }
 0x275   : > { %3335 = vmatprep.mubr.bf16.mxu1 %v12103_v5  ;;  %4903 = vmatprep.mubr.bf16.mxu0 %v12103_v5  ;;  %v4721_v27 = vrot.slane %v11838_v32, 2 }
 0x277   : > { %v13236_v15 = vsel %vm4709_vm5, %v4719_v16, %v4721_v27 }
 0x27c   : > { %9977 = vmatmul.mubr.msk.bf16.gmra.mrb[88].mxu1 %vm400_vm1, %v12794_v36  ;;  %10074 = vmatmul.mubr.msk.bf16.gmra.mrb[16].mxu0 %vm400_vm1, %v13226_v50  ;;  %v11839_v36 = vld [vmem:[%s12175_s29 + $0x40] sm:$0xff]  }
 0x27d   : > { %3345 = vmatprep.mubr.bf16.mxu1 %v12103_v5  ;;  %4913 = vmatprep.mubr.bf16.mxu0 %v12103_v5  ;;  %v4723_v30 = vrot.slane %v11839_v36, 2 }
 0x27f   : > { %v13246_v34 = vsel %vm4709_vm5, %v4721_v27, %v4723_v30 }
 0x284   : > { %9978 = vmatmul.mubr.msk.bf16.gmra.mrb[92].mxu1 %vm400_vm1, %v12812_v52  ;;  %10075 = vmatmul.mubr.msk.bf16.gmra.mrb[20].mxu0 %vm400_vm1, %v13236_v15  ;;  %v11840_v52 = vld [vmem:[%s12175_s29 + $0x48] sm:$0xff]  }
 0x285   : > { %3355 = vmatprep.mubr.bf16.mxu1 %v12103_v5  ;;  %4923 = vmatprep.mubr.bf16.mxu0 %v12103_v5  ;;  %v4725_v0 = vrot.slane %v11840_v52, 2 }
 0x287   : > { %v13256_v42 = vsel %vm4709_vm5, %v4723_v30, %v4725_v0 }
 0x28c   : > { %9979 = vmatmul.mubr.msk.bf16.gmra.mrb[96].mxu1 %vm400_vm1, %v12830_v31  ;;  %10076 = vmatmul.mubr.msk.bf16.gmra.mrb[24].mxu0 %vm400_vm1, %v13246_v34  ;;  %v11841_v31 = vld [vmem:[%s12175_s29 + $0x50] sm:$0xff]  }
 0x28d   : > { %3365 = vmatprep.mubr.bf16.mxu1 %v12103_v5  ;;  %4933 = vmatprep.mubr.bf16.mxu0 %v12103_v5  ;;  %v4727_v55 = vrot.slane %v11841_v31, 2 }
 0x28f   : > { %v13266_v21 = vsel %vm4709_vm5, %v4725_v0, %v4727_v55 }
 0x294   : > { %9980 = vmatmul.mubr.msk.bf16.gmra.mrb[100].mxu1 %vm400_vm1, %v12848_v58  ;;  %10077 = vmatmul.mubr.msk.bf16.gmra.mrb[28].mxu0 %vm400_vm1, %v13256_v42  ;;  %v11842_v58 = vld [vmem:[%s12175_s29 + $0x58] sm:$0xff]  }
 0x295   : > { %3375 = vmatprep.mubr.bf16.mxu1 %v12103_v5  ;;  %4943 = vmatprep.mubr.bf16.mxu0 %v12103_v5  ;;  %v4729_v48 = vrot.slane %v11842_v58, 2 }
 0x297   : > { %v13276_v45 = vsel %vm4709_vm5, %v4727_v55, %v4729_v48 }
 0x29c   : > { %9981 = vmatmul.mubr.msk.bf16.gmra.mrb[104].mxu1 %vm400_vm1, %v12866_v4  ;;  %10078 = vmatmul.mubr.msk.bf16.gmra.mrb[32].mxu0 %vm400_vm1, %v13266_v21  ;;  %v11843_v4 = vld [vmem:[%s12175_s29 + $0x60] sm:$0xff]  }
 0x29d   : > { %3385 = vmatprep.mubr.bf16.mxu1 %v12103_v5  ;;  %4953 = vmatprep.mubr.bf16.mxu0 %v12103_v5  ;;  %v4731_v44 = vrot.slane %v11843_v4, 2 }
 0x29f   : > { %v13286_v26 = vsel %vm4709_vm5, %v4729_v48, %v4731_v44 }
 0x2a4   : > { %9982 = vmatmul.mubr.msk.bf16.gmra.mrb[108].mxu1 %vm400_vm1, %v12876_v14  ;;  %10079 = vmatmul.mubr.msk.bf16.gmra.mrb[36].mxu0 %vm400_vm1, %v13276_v45  ;;  %v11844_v14 = vld [vmem:[%s12175_s29 + $0x68] sm:$0xff]  }
 0x2a5   : > { %3395 = vmatprep.mubr.bf16.mxu1 %v12103_v5  ;;  %4963 = vmatprep.mubr.bf16.mxu0 %v12103_v5  ;;  %v4733_v16 = vrot.slane %v11844_v14, 2 }
 0x2a7   : > { %v13296_v32 = vsel %vm4709_vm5, %v4731_v44, %v4733_v16 }
 0x2ac   : > { %9983 = vmatmul.mubr.msk.bf16.gmra.mrb[112].mxu1 %vm400_vm1, %v12886_v23  ;;  %10080 = vmatmul.mubr.msk.bf16.gmra.mrb[40].mxu0 %vm400_vm1, %v13286_v26  ;;  %v11845_v23 = vld [vmem:[%s12175_s29 + $0x70] sm:$0xff]  }
 0x2ad   : > { %3405 = vmatprep.mubr.bf16.mxu1 %v12103_v5  ;;  %4973 = vmatprep.mubr.bf16.mxu0 %v12103_v5  ;;  %v4735_v27 = vrot.slane %v11845_v23, 2 }
 0x2af   : > { %v13306_v36 = vsel %vm4709_vm5, %v4733_v16, %v4735_v27  ;;  %v11853_v16 = vld [vmem:[%s12175_s29 + $0x18] sm:$0xff]  }
 0x2b4   : > { %9984 = vmatmul.mubr.msk.bf16.gmra.mrb[116].mxu1 %vm400_vm1, %v12896_v43  ;;  %10081 = vmatmul.mubr.msk.bf16.gmra.mrb[44].mxu0 %vm400_vm1, %v13296_v32  ;;  %v11846_v43 = vld [vmem:[%s12175_s29 + $0x78] sm:$0xff]  }
 0x2b5   : > { %3415 = vmatprep.mubr.bf16.mxu1 %v12103_v5  ;;  %4983 = vmatprep.mubr.bf16.mxu0 %v12103_v5  ;;  %v4737_v30 = vrot.slane %v11846_v43, 2  ;;  %v4826_v43 = vsel %vm455_vm0, %v13205_v11, 0 }
 0x2b7   : > { %v13316_v52 = vsel %vm4709_vm5, %v4735_v27, %v4737_v30  ;;  %v5534_v27 = vrot.slane %v11853_v16, 2 }
 0x2bc   : > { %9985 = vmatmul.mubr.msk.bf16.gmra.mrb[120].mxu1 %vm400_vm1, %v12906_v51  ;;  %10082 = vmatmul.mubr.msk.bf16.gmra.mrb[48].mxu0 %vm400_vm1, %v13306_v36  ;;  %v11847_v51 = vld [vmem:[%s12175_s29 + $0x80] sm:$0xff]  }
 0x2bd   : > { %3425 = vmatprep.mubr.bf16.mxu1 %v12103_v5  ;;  %4993 = vmatprep.mubr.bf16.mxu0 %v12103_v5  ;;  %v4739_v0 = vrot.slane %v11847_v51, 2 }
 0x2bf   : > { %v13326_v31 = vsel %vm4709_vm5, %v4737_v30, %v4739_v0  ;;  %v11854_v30 = vld [vmem:[%s12175_s29 + $0x20] sm:$0xff]  }
 0x2c0   : > { %v5536_v51 = vrot.slane %v11854_v30, 2 }
 0x2c2   : > { %v13379_v11 = vsel %vm4709_vm5, %v5534_v27, %v5536_v51 }
 0x2c4   : > { %9986 = vmatmul.mubr.msk.bf16.gmra.mrb[124].mxu1 %vm400_vm1, %v12916_v60  ;;  %10083 = vmatmul.mubr.msk.bf16.gmra.mrb[52].mxu0 %vm400_vm1, %v13316_v52  ;;  %v11848_v60 = vld [vmem:[%s12175_s29 + $0x88] sm:$0xff]  }
 0x2c5   : > { %3435 = vmatprep.mubr.bf16.mxu1 %v12103_v5  ;;  %5003 = vmatprep.mubr.bf16.mxu0 %v12103_v5  ;;  %v4741_v55 = vrot.slane %v11848_v60, 2 }
 0x2c7   : > { %v13336_v58 = vsel %vm4709_vm5, %v4739_v0, %v4741_v55  ;;  %v13386_v0 = vld [vmem:[%s15085_s1 + $0x38] sm:$0xff] }
 0x2c8   : > { %v6535_v60 = vrot.slane %v13386_v0, %v12162_v12 }
 0x2cc   : > { %9987 = vmatmul.mubr.msk.bf16.gmra.mrb[128].mxu1 %vm400_vm1, %v12926_v7  ;;  %10084 = vmatmul.mubr.msk.bf16.gmra.mrb[56].mxu0 %vm400_vm1, %v13326_v31  ;;  %v11849_v7 = vld [vmem:[%s12175_s29 + $0x90] sm:$0xff]  }
 0x2cd   : > { %3445 = vmatprep.mubr.bf16.mxu1 %v12103_v5  ;;  %5013 = vmatprep.mubr.bf16.mxu0 %v12103_v5  ;;  %v4743_v48 = vrot.slane %v11849_v7, 2  ;;  %v6600_v7 = vsel %vm455_vm0, %v6535_v60, 0 }
 0x2cf   : > { %v13346_v4 = vsel %vm4709_vm5, %v4741_v55, %v4743_v48  ;;  %v6543_v55 = vcombine.high %v6535_v60, %v6535_v60 }
 0x2d1   : > { %10185 = vmatprep.subr.msk.bf16.mxu0 %vm455_vm0, %v6543_v55 }
 0x2d4   : > { %9988 = vmatmul.mubr.msk.bf16.gmra.mrb[132].mxu1 %vm400_vm1, %v12936_v18  ;;  %10085 = vmatmul.mubr.msk.bf16.gmra.mrb[60].mxu0 %vm400_vm1, %v13336_v58  ;;  %v11850_v18 = vld [vmem:[%s12175_s29 + $0x98] ss:$0 sps:$4 sm:$0x33]  }
 0x2d5   : > { %3455 = vmatprep.mubr.bf16.mxu1 %v12103_v5  ;;  %5023 = vmatprep.mubr.bf16.mxu0 %v12103_v5  ;;  %v4745_v44 = vrot.slane %v11850_v18, 2 }
 0x2d7   : > { %v13356_v14 = vsel %vm4709_vm5, %v4743_v48, %v4745_v44  ;;  %v5571_v48 = vcombine.high %v13186_v10, %v13186_v10  ;;  %v11856_v44 = vld [vmem:[%s12175_s29 + $0x30] sm:$0xff]  }
 0x2d8   : > { %v5540_v10 = vrot.slane %v11856_v44, 2 }
 0x2dc   : > { %9989 = vmatmul.mubr.msk.bf16.gmra.mrb[136].mxu1 %vm400_vm1, %v12947_v28  ;;  %10086 = vmatmul.mubr.msk.bf16.gmra.mrb[64].mxu0 %vm400_vm1, %v13346_v4  ;;  %v11852_v28 = vld [vmem:[%s12175_s29 + $0x10] sm:$0xfc]  }
 0x2dd   : > { %3465 = vmatprep.mubr.bf16.mxu1 %v12103_v5  ;;  %5033 = vmatprep.mubr.bf16.mxu0 %v12103_v5  ;;  %v5533_v23 = vrot.slane %v11852_v28, 2  ;;  %v13405_v28 = vrot.slane %v5571_v48, %v12162_v12 }
 0x2e4   : > { %9990 = vmatmul.mubr.msk.bf16.gmra.mrb[140].mxu1 %vm400_vm1, %v12958_v59  ;;  %10087 = vmatmul.mubr.msk.bf16.gmra.mrb[68].mxu0 %vm400_vm1, %v13356_v14  ;;  %v13369_v59 = vsel %vm4709_vm5, %v5533_v23, %v5534_v27  ;;  %v11857_v23 = vld [vmem:[%s12175_s29 + $0x38] sm:$0xff]  }
 0x2e5   : > { %4252 = vmatprep.mubr.bf16.mxu1 %v12103_v5  ;;  %5686 = vmatprep.mubr.bf16.mxu0 %v12103_v5  ;;  %v5542_v27 = vrot.slane %v11857_v23, 2 }
 0x2ec   : > { %10031 = vmatmul.mubr.msk.bf16.vlgmr.msra.gmra.mrb[72].mxu1 %vm400_vm1, %v12970_v33  ;;  %10128 = vmatmul.mubr.msk.bf16.vlgmr.msra.gmra.mrb[0].mxu0 %vm400_vm1, %v13369_v59  ;;  %v11855_v33 = vld [vmem:[%s12175_s29 + $0x28] sm:$0xff]  }
 0x2ed   : > { %5045 = vmatpush1.bf16.msra.mxu1 %v4826_v43  ;;  %4262 = vmatprep.mubr.bf16.mxu1 %v12103_v5  ;;  %v13426_v43 = vsel %vm4709_vm5, %v5540_v10, %v5542_v27 }
 0x2ee   : > { %5696 = vmatprep.mubr.bf16.mxu0 %v12103_v5  ;;  %6612 = vmatpush1.bf16.msra.mxu0 %v6600_v7 }
 0x2f4   : > { %10032 = vmatmul.mubr.msk.bf16.gmra.mrb[76].mxu1 %vm400_vm1, %v12980_v46  ;;  %10129 = vmatmul.mubr.msk.bf16.gmra.mrb[4].mxu0 %vm400_vm1, %v13379_v11  ;;  %v5538_v46 = vrot.slane %v11855_v33, 2 }
 0x2f5   : > { %4272 = vmatprep.mubr.bf16.mxu1 %v12103_v5  ;;  %5706 = vmatprep.mubr.bf16.mxu0 %v12103_v5 }
 0x2f6   : > { %v13400_v18 = vsel %vm4709_vm5, %v5536_v51, %v5538_v46  ;;  %v13416_v16 = vsel %vm4709_vm5, %v5538_v46, %v5540_v10 }
 0x2fc   : > { %10033 = vmatmul.mubr.msk.bf16.gmra.mrb[80].mxu1 %vm400_vm1, %v13001_v53  ;;  %10130 = vmatmul.mubr.msk.bf16.gmra.mrb[8].mxu0 %vm400_vm1, %v13400_v18  ;;  %v5587_v53 = vcombine.high %v13405_v28, %v13405_v28 }
 0x2fd   : > { %4282 = vmatprep.mubr.bf16.mxu1 %v12103_v5  ;;  %5716 = vmatprep.mubr.bf16.mxu0 %v12103_v5 }
 0x2fe   : > { %10146 = vmatprep.subr.msk.bf16.mxu1 %vm455_vm0, %v5587_v53 }
 0x304   : > { %10034 = vmatmul.mubr.msk.bf16.gmra.mrb[84].mxu1 %vm400_vm1, %v13017_v39  ;;  %10131 = vmatmul.mubr.msk.bf16.gmra.mrb[12].mxu0 %vm400_vm1, %v13416_v16  ;;  %v11858_v39 = vld [vmem:[%s12175_s29 + $0x40] sm:$0xff]  }
 0x305   : > { %4292 = vmatprep.mubr.bf16.mxu1 %v12103_v5  ;;  %5726 = vmatprep.mubr.bf16.mxu0 %v12103_v5  ;;  %v5544_v30 = vrot.slane %v11858_v39, 2 }
 0x307   : > { %v13436_v51 = vsel %vm4709_vm5, %v5542_v27, %v5544_v30 }
 0x30c   : > { %10035 = vmatmul.mubr.msk.bf16.gmra.mrb[88].mxu1 %vm400_vm1, %v13027_v61  ;;  %10132 = vmatmul.mubr.msk.bf16.gmra.mrb[16].mxu0 %vm400_vm1, %v13426_v43  ;;  %v11859_v61 = vld [vmem:[%s12175_s29 + $0x48] sm:$0xff]  }
 0x30d   : > { %4302 = vmatprep.mubr.bf16.mxu1 %v12103_v5  ;;  %5736 = vmatprep.mubr.bf16.mxu0 %v12103_v5  ;;  %v5546_v33 = vrot.slane %v11859_v61, 2 }
 0x30f   : > { %v13446_v60 = vsel %vm4709_vm5, %v5544_v30, %v5546_v33 }
 0x314   : > { %10036 = vmatmul.mubr.msk.bf16.gmra.mrb[92].mxu1 %vm400_vm1, %v13037_v8  ;;  %10133 = vmatmul.mubr.msk.bf16.gmra.mrb[20].mxu0 %vm400_vm1, %v13436_v51  ;;  %v11860_v8 = vld [vmem:[%s12175_s29 + $0x50] sm:$0xff]  }
 0x315   : > { %4312 = vmatprep.mubr.bf16.mxu1 %v12103_v5  ;;  %5746 = vmatprep.mubr.bf16.mxu0 %v12103_v5  ;;  %v5548_v46 = vrot.slane %v11860_v8, 2 }
 0x317   : > { %v13456_v55 = vsel %vm4709_vm5, %v5546_v33, %v5548_v46 }
 0x31c   : > { %10037 = vmatmul.mubr.msk.bf16.gmra.mrb[96].mxu1 %vm400_vm1, %v13047_v17  ;;  %10134 = vmatmul.mubr.msk.bf16.gmra.mrb[24].mxu0 %vm400_vm1, %v13446_v60  ;;  %v11861_v17 = vld [vmem:[%s12175_s29 + $0x58] sm:$0xff]  }
 0x31d   : > { %4322 = vmatprep.mubr.bf16.mxu1 %v12103_v5  ;;  %5756 = vmatprep.mubr.bf16.mxu0 %v12103_v5  ;;  %v5550_v7 = vrot.slane %v11861_v17, 2 }
 0x31f   : > { %v13466_v48 = vsel %vm4709_vm5, %v5548_v46, %v5550_v7 }
 0x324   : > { %10038 = vmatmul.mubr.msk.bf16.gmra.mrb[100].mxu1 %vm400_vm1, %v13057_v24  ;;  %10135 = vmatmul.mubr.msk.bf16.gmra.mrb[28].mxu0 %vm400_vm1, %v13456_v55  ;;  %v11862_v24 = vld [vmem:[%s12175_s29 + $0x60] sm:$0xff]  }
 0x325   : > { %4332 = vmatprep.mubr.bf16.mxu1 %v12103_v5  ;;  %5766 = vmatprep.mubr.bf16.mxu0 %v12103_v5  ;;  %v5552_v44 = vrot.slane %v11862_v24, 2 }
 0x327   : > { %v13476_v53 = vsel %vm4709_vm5, %v5550_v7, %v5552_v44 }
 0x32c   : > { %10039 = vmatmul.mubr.msk.bf16.gmra.mrb[104].mxu1 %vm400_vm1, %v13067_v29  ;;  %10136 = vmatmul.mubr.msk.bf16.gmra.mrb[32].mxu0 %vm400_vm1, %v13466_v48  ;;  %v11863_v29 = vld [vmem:[%s12175_s29 + $0x68] sm:$0xff]  }
 0x32d   : > { %4342 = vmatprep.mubr.bf16.mxu1 %v12103_v5  ;;  %5776 = vmatprep.mubr.bf16.mxu0 %v12103_v5  ;;  %v5554_v10 = vrot.slane %v11863_v29, 2  ;;  %v11870_v29 = vld [vmem:[%s12175_s29 + $0xa0] ss:$0 sps:$4 sm:$0x33]  }
 0x32f   : > { %v13486_v23 = vsel %vm4709_vm5, %v5552_v44, %v5554_v10 }
 0x334   : > { %10040 = vmatmul.mubr.msk.bf16.gmra.mrb[108].mxu1 %vm400_vm1, %v13077_v35  ;;  %10137 = vmatmul.mubr.msk.bf16.gmra.mrb[36].mxu0 %vm400_vm1, %v13476_v53  ;;  %v11864_v35 = vld [vmem:[%s12175_s29 + $0x70] sm:$0xff]  }
 0x335   : > { %4352 = vmatprep.mubr.bf16.mxu1 %v12103_v5  ;;  %5786 = vmatprep.mubr.bf16.mxu0 %v12103_v5  ;;  %v5556_v27 = vrot.slane %v11864_v35, 2  ;;  %v11873_v35 = vld [vmem:[%s12175_s29 + $0x18] sm:$0xff]  }
 0x337   : > { %v13496_v39 = vsel %vm4709_vm5, %v5554_v10, %v5556_v27 }
 0x33c   : > { %10041 = vmatmul.mubr.msk.bf16.gmra.mrb[112].mxu1 %vm400_vm1, %v13087_v49  ;;  %10138 = vmatmul.mubr.msk.bf16.gmra.mrb[40].mxu0 %vm400_vm1, %v13486_v23  ;;  %v11865_v49 = vld [vmem:[%s12175_s29 + $0x78] sm:$0xff]  }
 0x33d   : > { %4362 = vmatprep.mubr.bf16.mxu1 %v12103_v5  ;;  %5796 = vmatprep.mubr.bf16.mxu0 %v12103_v5  ;;  %v5558_v30 = vrot.slane %v11865_v49, 2 }
 0x33f   : > { %v13506_v61 = vsel %vm4709_vm5, %v5556_v27, %v5558_v30  ;;  %v5568_v27 = vrot.slane %v11870_v29, 2 }
 0x344   : > { %10042 = vmatmul.mubr.msk.bf16.gmra.mrb[116].mxu1 %vm400_vm1, %v13097_v6  ;;  %10139 = vmatmul.mubr.msk.bf16.gmra.mrb[44].mxu0 %vm400_vm1, %v13496_v39  ;;  %v11866_v6 = vld [vmem:[%s12175_s29 + $0x80] sm:$0xff]  }
 0x345   : > { %4372 = vmatprep.mubr.bf16.mxu1 %v12103_v5  ;;  %5806 = vmatprep.mubr.bf16.mxu0 %v12103_v5  ;;  %v5560_v33 = vrot.slane %v11866_v6, 2  ;;  %v6366_v6 = vshrl.u32 %v11873_v35, 16 }
 0x347   : > { %v13516_v8 = vsel %vm4709_vm5, %v5558_v30, %v5560_v33 }
 0x34c   : > { %10043 = vmatmul.mubr.msk.bf16.gmra.mrb[120].mxu1 %vm400_vm1, %v13107_v25  ;;  %10140 = vmatmul.mubr.msk.bf16.gmra.mrb[48].mxu0 %vm400_vm1, %v13506_v61  ;;  %v11867_v25 = vld [vmem:[%s12175_s29 + $0x88] sm:$0xff]  }
 0x34d   : > { %4382 = vmatprep.mubr.bf16.mxu1 %v12103_v5  ;;  %5816 = vmatprep.mubr.bf16.mxu0 %v12103_v5  ;;  %v5562_v46 = vrot.slane %v11867_v25, 2 }
 0x34f   : > { %v13526_v17 = vsel %vm4709_vm5, %v5560_v33, %v5562_v46  ;;  %v6369_v33 = vshll.u32 %v11873_v35, 16 }
 0x354   : > { %10044 = vmatmul.mubr.msk.bf16.gmra.mrb[124].mxu1 %vm400_vm1, %v13117_v1  ;;  %10141 = vmatmul.mubr.msk.bf16.gmra.mrb[52].mxu0 %vm400_vm1, %v13516_v8  ;;  %v11868_v1 = vld [vmem:[%s12175_s29 + $0x90] sm:$0xff]  }
 0x355   : > { %4392 = vmatprep.mubr.bf16.mxu1 %v12103_v5  ;;  %5826 = vmatprep.mubr.bf16.mxu0 %v12103_v5  ;;  %v5564_v7 = vrot.slane %v11868_v1, 2  ;;  %v6368_v1 = vrot.slane %v6366_v6, 2  ;;  %v11875_v6 = vld [vmem:[%s12175_s29 + $0x28] sm:$0xff]  }
 0x357   : > { %v13536_v24 = vsel %vm4709_vm5, %v5562_v46, %v5564_v7 }
 0x35c   : > { %10045 = vmatmul.mubr.msk.bf16.gmra.mrb[128].mxu1 %vm400_vm1, %v13127_v9  ;;  %10142 = vmatmul.mubr.msk.bf16.gmra.mrb[56].mxu0 %vm400_vm1, %v13526_v17  ;;  %v11869_v9 = vld [vmem:[%s12175_s29 + $0x98] sm:$0xff]  }
 0x35d   : > { %4402 = vmatprep.mubr.bf16.mxu1 %v12103_v5  ;;  %5836 = vmatprep.mubr.bf16.mxu0 %v12103_v5  ;;  %v5566_v44 = vrot.slane %v11869_v9, 2  ;;  %v11874_v9 = vld [vmem:[%s12175_s29 + $0x20] sm:$0xff]  }
 0x35e   : > { %v6375_v35 = vshrl.u32 %v11874_v9, 16 }
 0x35f   : > { %v13547_v10 = vsel %vm4709_vm5, %v5564_v7, %v5566_v44  ;;  %v6371_v7 = vrot.slane %v6369_v33, 3  ;;  %v6384_v33 = vshrl.u32 %v11875_v6, 16 }
 0x364   : > { %10046 = vmatmul.mubr.msk.bf16.gmra.mrb[132].mxu1 %vm400_vm1, %v13137_v54  ;;  %10143 = vmatmul.mubr.msk.bf16.gmra.mrb[60].mxu0 %vm400_vm1, %v13536_v24  ;;  %v11872_v54 = vld [vmem:[%s12175_s29 + $0x10] sm:$0xfc]  }
 0x365   : > { %4412 = vmatprep.mubr.bf16.mxu1 %v12103_v5  ;;  %5846 = vmatprep.mubr.bf16.mxu0 %v12103_v5  ;;  %v6358_v49 = vshrl.u32 %v11872_v54, 16  ;;  %v6361_v30 = vshll.u32 %v11872_v54, 16  ;;  %v6372_v54 = vor.u32 %v6371_v7, %v6368_v1  ;;  %v11876_v7 = vld [vmem:[%s12175_s29 + $0x30] sm:$0xff]  }
 0x367   : > { %v6360_v25 = vrot.slane %v6358_v49, 2  ;;  %v6363_v46 = vrot.slane %v6361_v30, 3  ;;  %v6377_v49 = vrot.slane %v6375_v35, 2  ;;  %v6396_v35 = vshll.u32 %v11876_v7, 16 }
 0x369   : > { %v6364_v29 = vor.u32 %v6363_v46, %v6360_v25  ;;  %v6387_v25 = vshll.u32 %v11875_v6, 16  ;;  %v6386_v46 = vrot.slane %v6384_v33, 2  ;;  %v6398_v33 = vrot.slane %v6396_v35, 3  ;;  %v11878_v35 = vld [vmem:[%s12175_s29 + $0x40] sm:$0xff]  }
 0x36b   : > { %v6389_v1 = vrot.slane %v6387_v25, 3  ;;  %v11877_v25 = vld [vmem:[%s12175_s29 + $0x38] sm:$0xff]  }
 0x36c   : > { %10047 = vmatmul.mubr.msk.bf16.gmra.mrb[136].mxu1 %vm400_vm1, %v13147_v63  ;;  %10144 = vmatmul.mubr.msk.bf16.gmra.mrb[64].mxu0 %vm400_vm1, %v13547_v10  ;;  %v13558_v63 = vsel %vm4709_vm5, %v5566_v44, %v5568_v27  ;;  %v5649_v44 = vsel %vm455_vm0, %v13405_v28, 0  ;;  %v13570_v27 = vsel %vm6356_vm6, %v6364_v29, %v6372_v54 }
 0x36d   : > { %4422 = vmatprep.mubr.bf16.mxu1 %v12103_v5  ;;  %5856 = vmatprep.mubr.bf16.mxu0 %v12103_v5  ;;  %v6390_v29 = vor.u32 %v6389_v1, %v6386_v46  ;;  %v6405_v1 = vshll.u32 %v11877_v25, 16 }
 0x374   : > { %10048 = vmatmul.mubr.msk.bf16.gmra.mrb[140].mxu1 %vm400_vm1, %v13156_v22  ;;  %10145 = vmatmul.mubr.msk.bf16.gmra.mrb[68].mxu0 %vm400_vm1, %v13558_v63  ;;  %v6378_v22 = vshll.u32 %v11874_v9, 16  ;;  %v13587_v9 = vld [vmem:[%s15085_s1 + $0x40] sm:$0xff] }
 0x375   : > { %5076 = vmatprep.mubr.bf16.mxu1 %v12103_v5  ;;  %6643 = vmatprep.mubr.bf16.mxu0 %v12103_v5 }
 0x376   : > { %v6380_v30 = vrot.slane %v6378_v22, 3 }
 0x378   : > { %v6381_v28 = vor.u32 %v6380_v30, %v6377_v49  ;;  %v6528_v49 = vcombine.high %v13386_v0, %v13386_v0 }
 0x37a   : > { %v13601_v30 = vsel %vm6356_vm6, %v6381_v28, %v6390_v29  ;;  %v13606_v46 = vrot.slane %v6528_v49, %v12162_v12  ;;  %v6414_v49 = vshll.u32 %v11878_v35, 16 }
 0x37c   : > { %10089 = vmatmul.mubr.msk.bf16.vlgmr.msra.gmra.mrb[72].mxu1 %vm400_vm1, %v13169_v56  ;;  %10186 = vmatmul.mubr.msk.bf16.vlgmr.msra.gmra.mrb[0].mxu0 %vm400_vm1, %v13570_v27  ;;  %v13580_v56 = vsel %vm6356_vm6, %v6372_v54, %v6381_v28  ;;  %v6393_v54 = vshrl.u32 %v11876_v7, 16  ;;  %v6402_v28 = vshrl.u32 %v11877_v25, 16 }
 0x37d   : > { %5868 = vmatpush1.bf16.msra.mxu1 %v5649_v44  ;;  %5086 = vmatprep.mubr.bf16.mxu1 %v12103_v5 }
 0x37e   : > { %6653 = vmatprep.mubr.bf16.mxu0 %v12103_v5  ;;  %v6395_v6 = vrot.slane %v6393_v54, 2  ;;  %v6407_v54 = vrot.slane %v6405_v1, 3 }
 0x380   : > { %v6399_v0 = vor.u32 %v6398_v33, %v6395_v6  ;;  %v6416_v6 = vrot.slane %v6414_v49, 3  ;;  %v11879_v33 = vld [vmem:[%s12175_s29 + $0x48] sm:$0xff]  }
 0x382   : > { %v13618_v7 = vsel %vm6356_vm6, %v6390_v29, %v6399_v0 }
 0x384   : > { %10090 = vmatmul.mubr.msk.bf16.gmra.mrb[76].mxu1 %vm400_vm1, %v13179_v20  ;;  %10187 = vmatmul.mubr.msk.bf16.gmra.mrb[4].mxu0 %vm400_vm1, %v13580_v56  ;;  %v7359_v20 = vrot.slane %v13587_v9, %v12162_v12 }
 0x385   : > { %5096 = vmatprep.mubr.bf16.mxu1 %v12103_v5  ;;  %6663 = vmatprep.mubr.bf16.mxu0 %v12103_v5 }
 0x386   : > { %v7367_v22 = vcombine.high %v7359_v20, %v7359_v20  ;;  %v7424_v44 = vsel %vm455_vm0, %v7359_v20, 0  ;;  %v6404_v20 = vrot.slane %v6402_v28, 2  ;;  %v6423_v28 = vshll.u32 %v11879_v33, 16 }
 0x388   : > { %10243 = vmatprep.subr.msk.bf16.mxu0 %vm455_vm0, %v7367_v22  ;;  %v6408_v22 = vor.u32 %v6407_v54, %v6404_v20  ;;  %v6425_v1 = vrot.slane %v6423_v28, 3  ;;  %v11880_v20 = vld [vmem:[%s12175_s29 + $0x50] sm:$0xff]  }
 0x389   : > { %7436 = vmatpush1.bf16.msra.mxu0 %v7424_v44  ;;  %v6411_v44 = vshrl.u32 %v11878_v35, 16  ;;  %v6429_v35 = vshrl.u32 %v11880_v20, 16 }
 0x38a   : > { %8477 = vmatprep.subr.bf16.mxu0 %v12103_v5 }
 0x38b   : > { %v6413_v29 = vrot.slane %v6411_v44, 2  ;;  %v6432_v44 = vshll.u32 %v11880_v20, 16 }
 0x38c   : > { %10091 = vmatmul.mubr.msk.bf16.gmra.mrb[80].mxu1 %vm400_vm1, %v13200_v13  ;;  %10188 = vmatmul.mubr.msk.bf16.gmra.mrb[8].mxu0 %vm400_vm1, %v13601_v30  ;;  %v6544_v13 = vcombine.high %v13606_v46, %v13606_v46 }
 0x38d   : > { %5106 = vmatprep.mubr.bf16.mxu1 %v12103_v5  ;;  %6673 = vmatprep.mubr.bf16.mxu0 %v12103_v5  ;;  %v6417_v25 = vor.u32 %v6416_v6, %v6413_v29  ;;  %v6434_v49 = vrot.slane %v6432_v44, 3  ;;  %v11881_v29 = vld [vmem:[%s12175_s29 + $0x58] sm:$0xff]  }
 0x38e   : > { %10204 = vmatprep.subr.msk.bf16.mxu1 %vm455_vm0, %v6544_v13  ;;  %v6420_v13 = vshrl.u32 %v11879_v33, 16  ;;  %v6438_v33 = vshrl.u32 %v11881_v29, 16 }
 0x394   : > { %10092 = vmatmul.mubr.msk.bf16.gmra.mrb[84].mxu1 %vm400_vm1, %v13216_v19  ;;  %10189 = vmatmul.mubr.msk.bf16.gmra.mrb[12].mxu0 %vm400_vm1, %v13618_v7  ;;  %v13628_v19 = vsel %vm6356_vm6, %v6399_v0, %v6408_v22  ;;  %v6422_v0 = vrot.slane %v6420_v13, 2  ;;  %v6441_v13 = vshll.u32 %v11881_v29, 16 }
 0x395   : > { %5116 = vmatprep.mubr.bf16.mxu1 %v12103_v5  ;;  %6683 = vmatprep.mubr.bf16.mxu0 %v12103_v5 }
 0x396   : > { %v6426_v54 = vor.u32 %v6425_v1, %v6422_v0  ;;  %v6443_v28 = vrot.slane %v6441_v13, 3  ;;  %v11882_v0 = vld [vmem:[%s12175_s29 + $0x60] sm:$0xff]  }
 0x397   : > { %v6447_v20 = vshrl.u32 %v11882_v0, 16 }
 0x39c   : > { %10093 = vmatmul.mubr.msk.bf16.gmra.mrb[88].mxu1 %vm400_vm1, %v13226_v50  ;;  %10190 = vmatmul.mubr.msk.bf16.gmra.mrb[16].mxu0 %vm400_vm1, %v13628_v19  ;;  %v13638_v50 = vsel %vm6356_vm6, %v6408_v22, %v6417_v25  ;;  %v6431_v22 = vrot.slane %v6429_v35, 2  ;;  %v6450_v35 = vshll.u32 %v11882_v0, 16 }
 0x39d   : > { %5126 = vmatprep.mubr.bf16.mxu1 %v12103_v5  ;;  %6693 = vmatprep.mubr.bf16.mxu0 %v12103_v5 }
 0x39e   : > { %v6435_v6 = vor.u32 %v6434_v49, %v6431_v22  ;;  %v6452_v44 = vrot.slane %v6450_v35, 3  ;;  %v11883_v22 = vld [vmem:[%s12175_s29 + $0x68] sm:$0xff]  }
 0x39f   : > { %v6456_v29 = vshrl.u32 %v11883_v22, 16 }
 0x3a4   : > { %10094 = vmatmul.mubr.msk.bf16.gmra.mrb[92].mxu1 %vm400_vm1, %v13236_v15  ;;  %10191 = vmatmul.mubr.msk.bf16.gmra.mrb[20].mxu0 %vm400_vm1, %v13638_v50  ;;  %v13648_v15 = vsel %vm6356_vm6, %v6417_v25, %v6426_v54  ;;  %v6440_v25 = vrot.slane %v6438_v33, 2  ;;  %v6459_v33 = vshll.u32 %v11883_v22, 16 }
 0x3a5   : > { %5136 = vmatprep.mubr.bf16.mxu1 %v12103_v5  ;;  %6703 = vmatprep.mubr.bf16.mxu0 %v12103_v5 }
 0x3a6   : > { %v6444_v1 = vor.u32 %v6443_v28, %v6440_v25  ;;  %v6461_v13 = vrot.slane %v6459_v33, 3  ;;  %v11884_v25 = vld [vmem:[%s12175_s29 + $0x70] sm:$0xff]  }
 0x3a7   : > { %v6465_v0 = vshrl.u32 %v11884_v25, 16 }
 0x3ac   : > { %10095 = vmatmul.mubr.msk.bf16.gmra.mrb[96].mxu1 %vm400_vm1, %v13246_v34  ;;  %10192 = vmatmul.mubr.msk.bf16.gmra.mrb[24].mxu0 %vm400_vm1, %v13648_v15  ;;  %v13658_v34 = vsel %vm6356_vm6, %v6426_v54, %v6435_v6  ;;  %v6449_v54 = vrot.slane %v6447_v20, 2  ;;  %v6468_v20 = vshll.u32 %v11884_v25, 16 }
 0x3ad   : > { %5146 = vmatprep.mubr.bf16.mxu1 %v12103_v5  ;;  %6713 = vmatprep.mubr.bf16.mxu0 %v12103_v5 }
 0x3ae   : > { %v6453_v49 = vor.u32 %v6452_v44, %v6449_v54  ;;  %v6470_v35 = vrot.slane %v6468_v20, 3  ;;  %v11885_v54 = vld [vmem:[%s12175_s29 + $0x78] sm:$0xff]  }
 0x3af   : > { %v6474_v22 = vshrl.u32 %v11885_v54, 16 }
 0x3b4   : > { %10096 = vmatmul.mubr.msk.bf16.gmra.mrb[100].mxu1 %vm400_vm1, %v13256_v42  ;;  %10193 = vmatmul.mubr.msk.bf16.gmra.mrb[28].mxu0 %vm400_vm1, %v13658_v34  ;;  %v13668_v42 = vsel %vm6356_vm6, %v6435_v6, %v6444_v1  ;;  %v6458_v6 = vrot.slane %v6456_v29, 2  ;;  %v6477_v29 = vshll.u32 %v11885_v54, 16 }
 0x3b5   : > { %5156 = vmatprep.mubr.bf16.mxu1 %v12103_v5  ;;  %6723 = vmatprep.mubr.bf16.mxu0 %v12103_v5 }
 0x3b6   : > { %v6462_v28 = vor.u32 %v6461_v13, %v6458_v6  ;;  %v6479_v33 = vrot.slane %v6477_v29, 3  ;;  %v11886_v6 = vld [vmem:[%s12175_s29 + $0x80] sm:$0xff]  }
 0x3b7   : > { %v6483_v25 = vshrl.u32 %v11886_v6, 16 }
 0x3bc   : > { %10097 = vmatmul.mubr.msk.bf16.gmra.mrb[104].mxu1 %vm400_vm1, %v13266_v21  ;;  %10194 = vmatmul.mubr.msk.bf16.gmra.mrb[32].mxu0 %vm400_vm1, %v13668_v42  ;;  %v13678_v21 = vsel %vm6356_vm6, %v6444_v1, %v6453_v49  ;;  %v6467_v1 = vrot.slane %v6465_v0, 2  ;;  %v6486_v0 = vshll.u32 %v11886_v6, 16 }
 0x3bd   : > { %5166 = vmatprep.mubr.bf16.mxu1 %v12103_v5  ;;  %6733 = vmatprep.mubr.bf16.mxu0 %v12103_v5 }
 0x3be   : > { %v6471_v44 = vor.u32 %v6470_v35, %v6467_v1  ;;  %v6488_v20 = vrot.slane %v6486_v0, 3  ;;  %v11887_v1 = vld [vmem:[%s12175_s29 + $0x88] sm:$0xff]  }
 0x3bf   : > { %v6492_v54 = vshrl.u32 %v11887_v1, 16 }
 0x3c4   : > { %10098 = vmatmul.mubr.msk.bf16.gmra.mrb[108].mxu1 %vm400_vm1, %v13276_v45  ;;  %10195 = vmatmul.mubr.msk.bf16.gmra.mrb[36].mxu0 %vm400_vm1, %v13678_v21  ;;  %v13688_v45 = vsel %vm6356_vm6, %v6453_v49, %v6462_v28  ;;  %v6476_v49 = vrot.slane %v6474_v22, 2  ;;  %v6495_v22 = vshll.u32 %v11887_v1, 16 }
 0x3c5   : > { %5176 = vmatprep.mubr.bf16.mxu1 %v12103_v5  ;;  %6743 = vmatprep.mubr.bf16.mxu0 %v12103_v5 }
 0x3c6   : > { %v6480_v13 = vor.u32 %v6479_v33, %v6476_v49  ;;  %v6497_v29 = vrot.slane %v6495_v22, 3  ;;  %v11888_v49 = vld [vmem:[%s12175_s29 + $0x90] sm:$0xff]  }
 0x3c7   : > { %v6501_v6 = vshrl.u32 %v11888_v49, 16 }
 0x3cc   : > { %10099 = vmatmul.mubr.msk.bf16.gmra.mrb[112].mxu1 %vm400_vm1, %v13286_v26  ;;  %10196 = vmatmul.mubr.msk.bf16.gmra.mrb[40].mxu0 %vm400_vm1, %v13688_v45  ;;  %v13698_v26 = vsel %vm6356_vm6, %v6462_v28, %v6471_v44  ;;  %v6485_v28 = vrot.slane %v6483_v25, 2  ;;  %v6504_v25 = vshll.u32 %v11888_v49, 16 }
 0x3cd   : > { %5186 = vmatprep.mubr.bf16.mxu1 %v12103_v5  ;;  %6753 = vmatprep.mubr.bf16.mxu0 %v12103_v5 }
 0x3ce   : > { %v6489_v35 = vor.u32 %v6488_v20, %v6485_v28  ;;  %v6506_v0 = vrot.slane %v6504_v25, 3  ;;  %v11889_v28 = vld [vmem:[%s12175_s29 + $0x98] sm:$0xff]  }
 0x3cf   : > { %v6510_v1 = vshrl.u32 %v11889_v28, 16 }
 0x3d4   : > { %10100 = vmatmul.mubr.msk.bf16.gmra.mrb[116].mxu1 %vm400_vm1, %v13296_v32  ;;  %10197 = vmatmul.mubr.msk.bf16.gmra.mrb[44].mxu0 %vm400_vm1, %v13698_v26  ;;  %v13708_v32 = vsel %vm6356_vm6, %v6471_v44, %v6480_v13  ;;  %v6494_v44 = vrot.slane %v6492_v54, 2  ;;  %v6513_v54 = vshll.u32 %v11889_v28, 16  ;;  %v11893_v28 = vld [vmem:[%s12175_s29 + $0x18] sm:$0xff]  }
 0x3d5   : > { %5196 = vmatprep.mubr.bf16.mxu1 %v12103_v5  ;;  %6763 = vmatprep.mubr.bf16.mxu0 %v12103_v5 }
 0x3d6   : > { %v6498_v33 = vor.u32 %v6497_v29, %v6494_v44  ;;  %v6515_v22 = vrot.slane %v6513_v54, 3  ;;  %v11890_v44 = vld [vmem:[%s12175_s29 + $0xa0] ss:$0 sps:$4 sm:$0x77]   ;;  %v6606_v54 = vsel %vm455_vm0, %v13606_v46, 0 }
 0x3d7   : > { %v6519_v49 = vshrl.u32 %v11890_v44, 16 }
 0x3dc   : > { %10101 = vmatmul.mubr.msk.bf16.gmra.mrb[120].mxu1 %vm400_vm1, %v13306_v36  ;;  %10198 = vmatmul.mubr.msk.bf16.gmra.mrb[48].mxu0 %vm400_vm1, %v13708_v32  ;;  %v13718_v36 = vsel %vm6356_vm6, %v6480_v13, %v6489_v35  ;;  %v6503_v13 = vrot.slane %v6501_v6, 2  ;;  %v6522_v6 = vshll.u32 %v11890_v44, 16 }
 0x3dd   : > { %5206 = vmatprep.mubr.bf16.mxu1 %v12103_v5  ;;  %6773 = vmatprep.mubr.bf16.mxu0 %v12103_v5 }
 0x3de   : > { %v6507_v20 = vor.u32 %v6506_v0, %v6503_v13  ;;  %v6524_v25 = vrot.slane %v6522_v6, 3 }
 0x3e4   : > { %10102 = vmatmul.mubr.msk.bf16.gmra.mrb[124].mxu1 %vm400_vm1, %v13316_v52  ;;  %10199 = vmatmul.mubr.msk.bf16.gmra.mrb[52].mxu0 %vm400_vm1, %v13718_v36  ;;  %v13728_v52 = vsel %vm6356_vm6, %v6489_v35, %v6498_v33  ;;  %v6512_v35 = vrot.slane %v6510_v1, 2  ;;  %v7315_v1 = vrot.slane %v11893_v28, 3  ;;  %v11913_v28 = vld [vmem:[%s15087_s3 + $0x8] sm:$0xff]  }
 0x3e5   : > { %5216 = vmatprep.mubr.bf16.mxu1 %v12103_v5  ;;  %6783 = vmatprep.mubr.bf16.mxu0 %v12103_v5 }
 0x3e6   : > { %v6516_v29 = vor.u32 %v6515_v22, %v6512_v35  ;;  %v11894_v35 = vld [vmem:[%s12175_s29 + $0x20] sm:$0xff]  }
 0x3e7   : > { %v7317_v22 = vrot.slane %v11894_v35, 3  ;;  %v11915_v35 = vld [vmem:[%s15087_s3 + $0x18] sm:$0xff]  }
 0x3e9   : > { %v13780_v46 = vsel %vm7313_vm7, %v7315_v1, %v7317_v22 }
 0x3ec   : > { %10103 = vmatmul.mubr.msk.bf16.gmra.mrb[128].mxu1 %vm400_vm1, %v13326_v31  ;;  %10200 = vmatmul.mubr.msk.bf16.gmra.mrb[56].mxu0 %vm400_vm1, %v13728_v52  ;;  %v13738_v31 = vsel %vm6356_vm6, %v6498_v33, %v6507_v20  ;;  %v6521_v33 = vrot.slane %v6519_v49, 2  ;;  %v11896_v49 = vld [vmem:[%s12175_s29 + $0x30] sm:$0xff]  }
 0x3ed   : > { %5226 = vmatprep.mubr.bf16.mxu1 %v12103_v5  ;;  %6793 = vmatprep.mubr.bf16.mxu0 %v12103_v5 }
 0x3ee   : > { %v6525_v13 = vor.u32 %v6524_v25, %v6521_v33 }
 0x3f0   : > { %v13757_v0 = vsel %vm6356_vm6, %v6516_v29, %v6525_v13  ;;  %v11912_v13 = vld [vmem:[%s15087_s3] sm:$0xff]  }
 0x3f4   : > { %10104 = vmatmul.mubr.msk.bf16.gmra.mrb[132].mxu1 %vm400_vm1, %v13336_v58  ;;  %10201 = vmatmul.mubr.msk.bf16.gmra.mrb[60].mxu0 %vm400_vm1, %v13738_v31  ;;  %v13748_v58 = vsel %vm6356_vm6, %v6507_v20, %v6516_v29  ;;  %v7352_v29 = vcombine.high %v13587_v9, %v13587_v9 }
 0x3f5   : > { %5236 = vmatprep.mubr.bf16.mxu1 %v12103_v5  ;;  %6803 = vmatprep.mubr.bf16.mxu0 %v12103_v5 }
 0x3f6   : > { %v13797_v6 = vrot.slane %v7352_v29, %v12162_v12  ;;  %v11897_v12 = vld [vmem:[%s12175_s29 + $0x38] sm:$0xff]   ;;  %v11917_v29 = vld [vmem:[%s15087_s3 + $0x28] sm:$0xff]  }
 0x3f7   : > { %v7323_v25 = vrot.slane %v11897_v12, 3  ;;  %v11919_v12 = vld [vmem:[%s15087_s3 + $0x38] sm:$0xff]  }
 0x3f8   : > { %v7368_v33 = vcombine.high %v13797_v6, %v13797_v6 }
 0x3fc   : > { %10105 = vmatmul.mubr.msk.bf16.gmra.mrb[136].mxu1 %vm400_vm1, %v13346_v4  ;;  %10202 = vmatmul.mubr.msk.bf16.gmra.mrb[64].mxu0 %vm400_vm1, %v13748_v58  ;;  %v11892_v4 = vld [vmem:[%s12175_s29 + $0x10] sm:$0xf8]  }
 0x3fd   : > { %5246 = vmatprep.mubr.bf16.mxu1 %v12103_v5  ;;  %6813 = vmatprep.mubr.bf16.mxu0 %v12103_v5  ;;  %v7314_v20 = vrot.slane %v11892_v4, 3  ;;  %v11898_v4 = vld [vmem:[%s12175_s29 + $0x40] sm:$0xff]  }
 0x404   : > { %10106 = vmatmul.mubr.msk.bf16.gmra.mrb[140].mxu1 %vm400_vm1, %v13356_v14  ;;  %10203 = vmatmul.mubr.msk.bf16.gmra.mrb[68].mxu0 %vm400_vm1, %v13757_v0  ;;  %v13770_v14 = vsel %vm7313_vm7, %v7314_v20, %v7315_v1  ;;  %v11914_v20 = vld [vmem:[%s15087_s3 + $0x10] sm:$0xff]  }
 0x405   : > { %5899 = vmatprep.mubr.bf16.mxu1 %v12103_v5  ;;  %7467 = vmatprep.mubr.bf16.mxu0 %v12103_v5 }
 0x40c   : > { %10147 = vmatmul.mubr.msk.bf16.vlgmr.msra.gmra.mrb[72].mxu1 %vm400_vm1, %v13369_v59  ;;  %10244 = vmatmul.mubr.msk.bf16.vlgmr.msra.gmra.mrb[0].mxu0 %vm400_vm1, %v13770_v14  ;;  %v11895_v59 = vld [vmem:[%s12175_s29 + $0x28] sm:$0xff]  }
 0x40d   : > { %6825 = vmatpush1.bf16.msra.mxu1 %v6606_v54  ;;  %5909 = vmatprep.mubr.bf16.mxu1 %v12103_v5  ;;  %v7319_v44 = vrot.slane %v11895_v59, 3  ;;  %v11899_v54 = vld [vmem:[%s12175_s29 + $0x48] sm:$0xff]  }
 0x40e   : > { %7477 = vmatprep.mubr.bf16.mxu0 %v12103_v5  ;;  %10262 = vmatprep.subr.msk.bf16.mxu1 %vm455_vm0, %v7368_v33 }
 0x40f   : > { %8478 = vmatpush1.bf16.msra.mxu0 %v11912_v13 }
 0x410   : > { %8479 = vmatprep.subr.bf16.mxu0 %v12103_v5 }
 0x413   : > { %8480 = vmatpush1.bf16.msra.mxu0 %v11913_v28  ;;  %v11921_v28 = vld [vmem:[%s15087_s3 + $0x48] sm:$0xff]  }
 0x414   : > { %10148 = vmatmul.mubr.msk.bf16.gmra.mrb[76].mxu1 %vm400_vm1, %v13379_v11  ;;  %10245 = vmatmul.mubr.msk.bf16.gmra.mrb[4].mxu0 %vm400_vm1, %v13780_v46  ;;  %v13792_v11 = vsel %vm7313_vm7, %v7317_v22, %v7319_v44  ;;  %v11916_v22 = vld [vmem:[%s15087_s3 + $0x20] sm:$0xff]  }
 0x415   : > { %5919 = vmatprep.mubr.bf16.mxu1 %v12103_v5  ;;  %7487 = vmatprep.mubr.bf16.mxu0 %v12103_v5 }
 0x416   : > { %8481 = vmatprep.subr.bf16.mxu0 %v12103_v5 }
 0x417   : > { %8482 = vmatpush1.bf16.msra.mxu0 %v11914_v20 }
 0x418   : > { %8483 = vmatprep.subr.bf16.mxu0 %v12103_v5 }
 0x41b   : > { %8484 = vmatpush1.bf16.msra.mxu0 %v11915_v35  ;;  %v11923_v35 = vld [vmem:[%s15087_s3 + $0x58] sm:$0xff]  }
 0x41c   : > { %10149 = vmatmul.mubr.msk.bf16.gmra.mrb[80].mxu1 %vm400_vm1, %v13400_v18  ;;  %10246 = vmatmul.mubr.msk.bf16.gmra.mrb[8].mxu0 %vm400_vm1, %v13792_v11  ;;  %v7321_v18 = vrot.slane %v11896_v49, 3  ;;  %v11918_v49 = vld [vmem:[%s15087_s3 + $0x30] sm:$0xff]  }
 0x41d   : > { %5929 = vmatprep.mubr.bf16.mxu1 %v12103_v5  ;;  %7497 = vmatprep.mubr.bf16.mxu0 %v12103_v5 }
 0x41e   : > { %v13808_v9 = vsel %vm7313_vm7, %v7319_v44, %v7321_v18  ;;  %8485 = vmatprep.subr.bf16.mxu0 %v12103_v5  ;;  %v11900_v44 = vld [vmem:[%s12175_s29 + $0x50] sm:$0xff]  }
 0x41f   : > { %8486 = vmatpush1.bf16.msra.mxu0 %v11916_v22 }
 0x420   : > { %8487 = vmatprep.subr.bf16.mxu0 %v12103_v5 }
 0x423   : > { %8488 = vmatpush1.bf16.msra.mxu0 %v11917_v29  ;;  %v11925_v29 = vld [vmem:[%s15087_s3 + $0x68] sm:$0xff]  }
 0x424   : > { %10150 = vmatmul.mubr.msk.bf16.gmra.mrb[84].mxu1 %vm400_vm1, %v13416_v16  ;;  %10247 = vmatmul.mubr.msk.bf16.gmra.mrb[12].mxu0 %vm400_vm1, %v13808_v9  ;;  %v13821_v16 = vsel %vm7313_vm7, %v7321_v18, %v7323_v25  ;;  %v11901_v18 = vld [vmem:[%s12175_s29 + $0x58] sm:$0xff]  }
 0x425   : > { %5939 = vmatprep.mubr.bf16.mxu1 %v12103_v5  ;;  %7507 = vmatprep.mubr.bf16.mxu0 %v12103_v5 }
 0x426   : > { %8489 = vmatprep.subr.bf16.mxu0 %v12103_v5 }
 0x427   : > { %8490 = vmatpush1.bf16.msra.mxu0 %v11918_v49  ;;  %v11905_v49 = vld [vmem:[%s12175_s29 + $0x78] sm:$0xff]  }
 0x428   : > { %8491 = vmatprep.subr.bf16.mxu0 %v12103_v5 }
 0x42b   : > { %8492 = vmatpush1.bf16.msra.mxu0 %v11919_v12  ;;  %v11927_v12 = vld [vmem:[%s15087_s3 + $0x78] sm:$0xff]  }
 0x42c   : > { %10151 = vmatmul.mubr.msk.bf16.gmra.mrb[88].mxu1 %vm400_vm1, %v13426_v43  ;;  %10248 = vmatmul.mubr.msk.bf16.gmra.mrb[16].mxu0 %vm400_vm1, %v13821_v16  ;;  %v7325_v43 = vrot.slane %v11898_v4, 3  ;;  %v11902_v4 = vld [vmem:[%s12175_s29 + $0x60] sm:$0xff]  }
 0x42d   : > { %5949 = vmatprep.mubr.bf16.mxu1 %v12103_v5  ;;  %7517 = vmatprep.mubr.bf16.mxu0 %v12103_v5 }
 0x42e   : > { %v13839_v1 = vsel %vm7313_vm7, %v7323_v25, %v7325_v43  ;;  %8493 = vmatprep.subr.bf16.mxu0 %v12103_v5  ;;  %v11920_v25 = vld [vmem:[%s15087_s3 + $0x40] sm:$0xff]  }
 0x42f   : > { %8494 = vmatpush1.bf16.msra.mxu0 %v11920_v25  ;;  %v11906_v25 = vld [vmem:[%s12175_s29 + $0x80] sm:$0xff]  }
 0x430   : > { %8495 = vmatprep.subr.bf16.mxu0 %v12103_v5 }
 0x433   : > { %8496 = vmatpush1.bf16.msra.mxu0 %v11921_v28  ;;  %v11907_v28 = vld [vmem:[%s12175_s29 + $0x88] sm:$0xff]  }
 0x434   : > { %10152 = vmatmul.mubr.msk.bf16.gmra.mrb[92].mxu1 %vm400_vm1, %v13436_v51  ;;  %10249 = vmatmul.mubr.msk.bf16.gmra.mrb[20].mxu0 %vm400_vm1, %v13839_v1  ;;  %v7327_v51 = vrot.slane %v11899_v54, 3  ;;  %v11903_v54 = vld [vmem:[%s12175_s29 + $0x68] sm:$0xff]  }
 0x435   : > { %5959 = vmatprep.mubr.bf16.mxu1 %v12103_v5  ;;  %7527 = vmatprep.mubr.bf16.mxu0 %v12103_v5 }
 0x436   : > { %v13857_v59 = vsel %vm7313_vm7, %v7325_v43, %v7327_v51  ;;  %8497 = vmatprep.subr.bf16.mxu0 %v12103_v5  ;;  %v11922_v43 = vld [vmem:[%s15087_s3 + $0x50] sm:$0xff]  }
 0x437   : > { %8498 = vmatpush1.bf16.msra.mxu0 %v11922_v43 }
 0x438   : > { %8499 = vmatprep.subr.bf16.mxu0 %v12103_v5 }
 0x43b   : > { %8500 = vmatpush1.bf16.msra.mxu0 %v11923_v35 }
 0x43c   : > { %10153 = vmatmul.mubr.msk.bf16.gmra.mrb[96].mxu1 %vm400_vm1, %v13446_v60  ;;  %10250 = vmatmul.mubr.msk.bf16.gmra.mrb[24].mxu0 %vm400_vm1, %v13857_v59  ;;  %v7329_v60 = vrot.slane %v11900_v44, 3  ;;  %v11904_v44 = vld [vmem:[%s12175_s29 + $0x70] sm:$0xff]  }
 0x43d   : > { %5969 = vmatprep.mubr.bf16.mxu1 %v12103_v5  ;;  %7537 = vmatprep.mubr.bf16.mxu0 %v12103_v5 }
 0x43e   : > { %v13875_v33 = vsel %vm7313_vm7, %v7327_v51, %v7329_v60  ;;  %8501 = vmatprep.subr.bf16.mxu0 %v12103_v5  ;;  %v11924_v51 = vld [vmem:[%s15087_s3 + $0x60] sm:$0xff]  }
 0x43f   : > { %8502 = vmatpush1.bf16.msra.mxu0 %v11924_v51 }
 0x440   : > { %8503 = vmatprep.subr.bf16.mxu0 %v12103_v5 }
 0x443   : > { %8504 = vmatpush1.bf16.msra.mxu0 %v11925_v29 }
 0x444   : > { %10154 = vmatmul.mubr.msk.bf16.gmra.mrb[100].mxu1 %vm400_vm1, %v13456_v55  ;;  %10251 = vmatmul.mubr.msk.bf16.gmra.mrb[28].mxu0 %vm400_vm1, %v13875_v33  ;;  %v7331_v55 = vrot.slane %v11901_v18, 3  ;;  %v11926_v18 = vld [vmem:[%s15087_s3 + $0x70] sm:$0xff]  }
 0x445   : > { %5979 = vmatprep.mubr.bf16.mxu1 %v12103_v5  ;;  %7547 = vmatprep.mubr.bf16.mxu0 %v12103_v5 }
 0x446   : > { %v13893_v13 = vsel %vm7313_vm7, %v7329_v60, %v7331_v55  ;;  %8505 = vmatprep.subr.bf16.mxu0 %v12103_v5 }
 0x447   : > { %8506 = vmatpush1.bf16.msra.mxu0 %v11926_v18 }
 0x448   : > { %8507 = vmatprep.subr.bf16.mxu0 %v12103_v5 }
 0x44b   : > { %8508 = vmatpush1.bf16.msra.mxu0 %v11927_v12 }
 0x44c   : > { %10155 = vmatmul.mubr.msk.bf16.gmra.mrb[104].mxu1 %vm400_vm1, %v13466_v48  ;;  %10252 = vmatmul.mubr.msk.bf16.gmra.mrb[32].mxu0 %vm400_vm1, %v13893_v13  ;;  %v7333_v48 = vrot.slane %v11902_v4, 3  ;;  %v7341_v4 = vrot.slane %v11906_v25, 3 }
 0x44d   : > { %5989 = vmatprep.mubr.bf16.mxu1 %v12103_v5  ;;  %7557 = vmatprep.mubr.bf16.mxu0 %v12103_v5 }
 0x44e   : > { %v13911_v20 = vsel %vm7313_vm7, %v7331_v55, %v7333_v48  ;;  %8654 = vmatprep.subr.bf16.mxu0 %v12103_v5 }
 0x454   : > { %10156 = vmatmul.mubr.msk.bf16.gmra.mrb[108].mxu1 %vm400_vm1, %v13476_v53  ;;  %10253 = vmatmul.mubr.msk.bf16.gmra.mrb[36].mxu0 %vm400_vm1, %v13911_v20  ;;  %v7335_v53 = vrot.slane %v11903_v54, 3 }
 0x455   : > { %5999 = vmatprep.mubr.bf16.mxu1 %v12103_v5  ;;  %7567 = vmatprep.mubr.bf16.mxu0 %v12103_v5 }
 0x456   : > { %v13929_v22 = vsel %vm7313_vm7, %v7333_v48, %v7335_v53  ;;  %v7343_v48 = vrot.slane %v11907_v28, 3 }
 0x458   : > { %v13982_v43 = vsel %vm7313_vm7, %v7341_v4, %v7343_v48 }
 0x45c   : > { %10157 = vmatmul.mubr.msk.bf16.gmra.mrb[112].mxu1 %vm400_vm1, %v13486_v23  ;;  %10254 = vmatmul.mubr.msk.bf16.gmra.mrb[40].mxu0 %vm400_vm1, %v13929_v22  ;;  %v7337_v23 = vrot.slane %v11904_v44, 3 }
 0x45d   : > { %6009 = vmatprep.mubr.bf16.mxu1 %v12103_v5  ;;  %7577 = vmatprep.mubr.bf16.mxu0 %v12103_v5 }
 0x45e   : > { %v13944_v60 = vsel %vm7313_vm7, %v7335_v53, %v7337_v23 }
 0x464   : > { %10158 = vmatmul.mubr.msk.bf16.gmra.mrb[116].mxu1 %vm400_vm1, %v13496_v39  ;;  %10255 = vmatmul.mubr.msk.bf16.gmra.mrb[44].mxu0 %vm400_vm1, %v13944_v60  ;;  %v7339_v39 = vrot.slane %v11905_v49, 3 }
 0x465   : > { %6019 = vmatprep.mubr.bf16.mxu1 %v12103_v5  ;;  %7587 = vmatprep.mubr.bf16.mxu0 %v12103_v5 }
 0x466   : > { %v13962_v55 = vsel %vm7313_vm7, %v7337_v23, %v7339_v39 }
 0x46c   : > { %10159 = vmatmul.mubr.msk.bf16.gmra.mrb[120].mxu1 %vm400_vm1, %v13506_v61  ;;  %10256 = vmatmul.mubr.msk.bf16.gmra.mrb[48].mxu0 %vm400_vm1, %v13962_v55  ;;  %v13972_v61 = vsel %vm7313_vm7, %v7339_v39, %v7341_v4 }
 0x46d   : > { %6029 = vmatprep.mubr.bf16.mxu1 %v12103_v5  ;;  %7597 = vmatprep.mubr.bf16.mxu0 %v12103_v5 }
 0x474   : > { %10160 = vmatmul.mubr.msk.bf16.gmra.mrb[124].mxu1 %vm400_vm1, %v13516_v8  ;;  %10257 = vmatmul.mubr.msk.bf16.gmra.mrb[52].mxu0 %vm400_vm1, %v13972_v61  ;;  %v11908_v8 = vld [vmem:[%s12175_s29 + $0x90] sm:$0xff]  }
 0x475   : > { %6039 = vmatprep.mubr.bf16.mxu1 %v12103_v5  ;;  %7607 = vmatprep.mubr.bf16.mxu0 %v12103_v5  ;;  %v7345_v54 = vrot.slane %v11908_v8, 3 }
 0x477   : > { %v13992_v35 = vsel %vm7313_vm7, %v7343_v48, %v7345_v54 }
 0x47c   : > { %10161 = vmatmul.mubr.msk.bf16.gmra.mrb[128].mxu1 %vm400_vm1, %v13526_v17  ;;  %10258 = vmatmul.mubr.msk.bf16.gmra.mrb[56].mxu0 %vm400_vm1, %v13982_v43  ;;  %v11909_v17 = vld [vmem:[%s12175_s29 + $0x98] sm:$0xff]  }
 0x47d   : > { %6049 = vmatprep.mubr.bf16.mxu1 %v12103_v5  ;;  %7617 = vmatprep.mubr.bf16.mxu0 %v12103_v5  ;;  %v7347_v53 = vrot.slane %v11909_v17, 3 }
 0x47f   : > { %v14002_v51 = vsel %vm7313_vm7, %v7345_v54, %v7347_v53 }
 0x484   : > { %10162 = vmatmul.mubr.msk.bf16.gmra.mrb[132].mxu1 %vm400_vm1, %v13536_v24  ;;  %10259 = vmatmul.mubr.msk.bf16.gmra.mrb[60].mxu0 %vm400_vm1, %v13992_v35  ;;  %v11910_v24 = vld [vmem:[%s12175_s29 + $0xa0] ss:$0 sps:$4 sm:$0x77]  }
 0x485   : > { %6059 = vmatprep.mubr.bf16.mxu1 %v12103_v5  ;;  %7627 = vmatprep.mubr.bf16.mxu0 %v12103_v5  ;;  %v7349_v44 = vrot.slane %v11910_v24, 3 }
 0x487   : > { %v14012_v23 = vsel %vm7313_vm7, %v7347_v53, %v7349_v44 }
 0x48c   : > { %10163 = vmatmul.mubr.msk.bf16.gmra.mrb[136].mxu1 %vm400_vm1, %v13547_v10  ;;  %10260 = vmatmul.mubr.msk.bf16.gmra.mrb[64].mxu0 %vm400_vm1, %v14002_v51  ;;  %v7430_v10 = vsel %vm455_vm0, %v13797_v6, 0 }
 0x48d   : > { %6069 = vmatprep.mubr.bf16.mxu1 %v12103_v5  ;;  %7637 = vmatprep.mubr.bf16.mxu0 %v12103_v5 }
 0x494   : > { %10164 = vmatmul.mubr.msk.bf16.gmra.mrb[140].mxu1 %vm400_vm1, %v13558_v63  ;;  %10261 = vmatmul.mubr.msk.bf16.gmra.mrb[68].mxu0 %vm400_vm1, %v14012_v23  ;;  %v230_v63 = vsub.s32 0, %v12144_v3 }
 0x495   : > { %6856 = vmatprep.mubr.bf16.mxu1 %v12103_v5 }
 0x49c   : > { %10205 = vmatmul.mubr.msk.bf16.vlgmr.msra.gmra.mrb[72].mxu1 %vm400_vm1, %v13570_v27  ;;  %v234_v27 = vsub.s32 1, %v12144_v3 }
 0x49d   : > { %7649 = vmatpush1.bf16.msra.mxu1 %v7430_v10  ;;  %6866 = vmatprep.mubr.bf16.mxu1 %v12103_v5 }
 0x4a4   : > { %10206 = vmatmul.mubr.msk.bf16.gmra.mrb[76].mxu1 %vm400_vm1, %v13580_v56  ;;  %v12093_v56 = vld [vmem:[%s15086_s2] sm:$0xf] }
 0x4a5   : > { %6876 = vmatprep.mubr.bf16.mxu1 %v12103_v5 }
 0x4ac   : > { %10207 = vmatmul.mubr.msk.bf16.gmra.mrb[80].mxu1 %vm400_vm1, %v13601_v30  ;;  %v14051_v30 = vrot.slane %v12093_v56, %v230_v63 }
 0x4ad   : > { %6886 = vmatprep.mubr.bf16.mxu1 %v12103_v5 }
 0x4ae   : > { %v906_v8 = vadd.f32 %v12550_v62, %v14051_v30 }
 0x4b4   : > { %10208 = vmatmul.mubr.msk.bf16.gmra.mrb[84].mxu1 %vm400_vm1, %v13618_v7  ;;  %v14053_v7 = vrot.slane %v12093_v56, %v234_v27 }
 0x4b5   : > { %6896 = vmatprep.mubr.bf16.mxu1 %v12103_v5 }
 0x4b6   : > { %v899_v6 = vadd.f32 %v12535_v38, %v14053_v7  ;;  %v907_v53 = vadd.f32 %v12553_v47, %v14053_v7 }
 0x4bc   : > { %10209 = vmatmul.mubr.msk.bf16.gmra.mrb[88].mxu1 %vm400_vm1, %v13628_v19  ;;  %v894_v19 = vadd.f32 %v12526_v37, %v14051_v30 }
 0x4bd   : > { %6906 = vmatprep.mubr.bf16.mxu1 %v12103_v5 }
 0x4c4   : > { %10210 = vmatmul.mubr.msk.bf16.gmra.mrb[92].mxu1 %vm400_vm1, %v13638_v50  ;;  %v895_v50 = vadd.f32 %v12530_v40, %v14053_v7 }
 0x4c5   : > { %6916 = vmatprep.mubr.bf16.mxu1 %v12103_v5 }
 0x4cc   : > { %10211 = vmatmul.mubr.msk.bf16.gmra.mrb[96].mxu1 %vm400_vm1, %v13648_v15  ;;  %v898_v15 = vadd.f32 %v12532_v41, %v14051_v30  ;;  %v902_v41 = vadd.f32 %v12544_v2, %v14051_v30 }
 0x4cd   : > { %6926 = vmatprep.mubr.bf16.mxu1 %v12103_v5 }
 0x4d4   : > { %10212 = vmatmul.mubr.msk.bf16.gmra.mrb[100].mxu1 %vm400_vm1, %v13658_v34 }
 0x4d5   : > { %6936 = vmatprep.mubr.bf16.mxu1 %v12103_v5 }
 0x4dc   : > { %10213 = vmatmul.mubr.msk.bf16.gmra.mrb[104].mxu1 %vm400_vm1, %v13668_v42 }
 0x4dd   : > { %6946 = vmatprep.mubr.bf16.mxu1 %v12103_v5 }
 0x4df   : > { %v7469_v3 = vpop.f32.mrb[0].mxu0 }
 0x4e0   : > { %v10316_v34 = vadd.f32 %v7469_v3, %v894_v19  ;;  %v7471_v42 = vpop.f32.mrb[1].mxu0  ;;  %v15174_v19 = vld [vmem:[#allocation4_spill] sm:$0xff]  ;;  %v15175_v3 = vld [vmem:[#allocation5_spill] sm:$0xff] }
 0x4e1   : > { %v10318_v29 = vadd.f32 %v7471_v42, %v895_v50  ;;  %v7473_v49 = vpop.f32.mrb[2].mxu0  ;;  %v910_v50 = vadd.f32 %v15174_v19, %v14051_v30  ;;  %v911_v47 = vadd.f32 %v15175_v3, %v14053_v7  ;;  %v15176_v42 = vld [vmem:[#allocation6_spill] sm:$0xff] }
 0x4e2   : > { %v10320_v37 = vadd.f32 %v7473_v49, %v898_v15  ;;  %v7475_v18 = vpop.f32.mrb[3].mxu0  ;;  %v8005_v40 = vmax.f32 %v10316_v34, 0.0 }
 0x4e3   : > { %v10322_v39 = vadd.f32 %v7475_v18, %v899_v6  ;;  %v8006_v25 = vmax.f32 %v10318_v29, 0.0  ;;  %v914_v6 = vadd.f32 %v15176_v42, %v14051_v30 }
 0x4e4   : > { %10214 = vmatmul.mubr.msk.bf16.gmra.mrb[108].mxu1 %vm400_vm1, %v13678_v21  ;;  %v8009_v12 = vmax.f32 %v10320_v37, 0.0  ;;  %v903_v21 = vadd.f32 %v12548_v57, %v14053_v7  ;;  %v15177_v37 = vld [vmem:[#allocation7_spill] sm:$0xff] }
 0x4e5   : > { %6956 = vmatprep.mubr.bf16.mxu1 %v12103_v5  ;;  %v8010_v4 = vmax.f32 %v10322_v39, 0.0  ;;  %v915_v18 = vadd.f32 %v15177_v37, %v14053_v7 }
 0x4e6   : > { %v8149_v28 = vpack.c.bf16 %v8009_v12, %v8005_v40 }
 0x4e7   : > { %v8150_v48 = vpack.c.bf16 %v8010_v4, %v8006_v25  ;;  %v7479_v38 = vpop.f32.mrb[4].mxu0  ;;  %v11928_v4 = vld [vmem:[%s15087_s3 + $0x80] sm:$0xff]  }
 0x4e8   : > { %v10324_v54 = vadd.f32 %v7479_v38, %v902_v41  ;;  %v7481_v17 = vpop.f32.mrb[5].mxu0  ;;  %v15178_v38 = vld [vmem:[#allocation8_spill] sm:$0xff] }
 0x4e9   : > { %v10326_v24 = vadd.f32 %v7481_v17, %v903_v21  ;;  %v7483_v44 = vpop.f32.mrb[6].mxu0  ;;  %8509 = vmatprep.mubr.bf16.mxu0 %v8150_v48  ;;  %v15179_v17 = vld [vmem:[#allocation9_spill] sm:$0xff] }
 0x4ea   : > { %v10328_v2 = vadd.f32 %v7483_v44, %v906_v8  ;;  %v7485_v57 = vpop.f32.mrb[7].mxu0  ;;  %8510 = vmatmul.mubr.bf16.vlgmr.msra.gmra.mrb[72].mxu0 %v8149_v28  ;;  %v8013_v63 = vmax.f32 %v10324_v54, 0.0  ;;  %v918_v8 = vadd.f32 %v15178_v38, %v14051_v30 }
 0x4eb   : > { %v10330_v10 = vadd.f32 %v7485_v57, %v907_v53  ;;  %v8014_v62 = vmax.f32 %v10326_v24, 0.0  ;;  %8655 = vmatpush1.bf16.msra.mxu0 %v11928_v4  ;;  %v919_v53 = vadd.f32 %v15179_v17, %v14053_v7 }
 0x4ec   : > { %10215 = vmatmul.mubr.msk.bf16.gmra.mrb[112].mxu1 %vm400_vm1, %v13688_v45  ;;  %v8017_v27 = vmax.f32 %v10328_v2, 0.0  ;;  %8656 = vmatprep.subr.bf16.mxu0 %v12103_v5  ;;  %v15180_v2 = vld [vmem:[#allocation10_spill] sm:$0xff] }
 0x4ed   : > { %6966 = vmatprep.mubr.bf16.mxu1 %v12103_v5  ;;  %v8018_v56 = vmax.f32 %v10330_v10, 0.0  ;;  %v922_v57 = vadd.f32 %v15180_v2, %v14051_v30 }
 0x4ee   : > { %v8153_v45 = vpack.c.bf16 %v8017_v27, %v8013_v63  ;;  %v15181_v27 = vld [vmem:[#allocation11_spill] sm:$0xff] }
 0x4ef   : > { %v8154_v15 = vpack.c.bf16 %v8018_v56, %v8014_v62  ;;  %v7489_v34 = vpop.f32.mrb[8].mxu0  ;;  %v923_v62 = vadd.f32 %v15181_v27, %v14053_v7 }
 0x4f0   : > { %v10332_v29 = vadd.f32 %v7489_v34, %v910_v50  ;;  %v7491_v49 = vpop.f32.mrb[9].mxu0 }
 0x4f1   : > { %v10334_v39 = vadd.f32 %v7491_v49, %v911_v47  ;;  %v7493_v40 = vpop.f32.mrb[10].mxu0  ;;  %8517 = vmatprep.mubr.bf16.mxu0 %v8154_v15  ;;  %v15183_v49 = vld [vmem:[#allocation13_spill] sm:$0xff] }
 0x4f2   : > { %v10336_v12 = vadd.f32 %v7493_v40, %v914_v6  ;;  %v7495_v25 = vpop.f32.mrb[11].mxu0  ;;  %8518 = vmatmul.mubr.bf16.gmra.mrb[76].mxu0 %v8153_v45  ;;  %v8021_v28 = vmax.f32 %v10332_v29, 0.0  ;;  %v15182_v6 = vld [vmem:[#allocation12_spill] sm:$0xff]  ;;  %v927_v37 = vadd.f32 %v15183_v49, %v14053_v7  ;;  %v15184_v40 = vld [vmem:[#allocation14_spill] sm:$0xff] }
 0x4f3   : > { %v10338_v41 = vadd.f32 %v7495_v25, %v915_v18  ;;  %v926_v29 = vadd.f32 %v15182_v6, %v14051_v30 }
 0x4f4   : > { %10216 = vmatmul.mubr.msk.bf16.gmra.mrb[116].mxu1 %vm400_vm1, %v13698_v26  ;;  %v8025_v21 = vmax.f32 %v10336_v12, 0.0  ;;  %v8022_v26 = vmax.f32 %v10334_v39, 0.0  ;;  %v930_v12 = vadd.f32 %v15184_v40, %v14051_v30 }
 0x4f5   : > { %6976 = vmatprep.mubr.bf16.mxu1 %v12103_v5  ;;  %v8026_v48 = vmax.f32 %v10338_v41, 0.0  ;;  %v11929_v41 = vld [vmem:[%s15087_s3 + $0x88] sm:$0xff]  }
 0x4f6   : > { %v8157_v54 = vpack.c.bf16 %v8025_v21, %v8021_v28  ;;  %v15185_v28 = vld [vmem:[#allocation15_spill] sm:$0xff]  ;;  %8657 = vmatpush1.bf16.msra.mxu0 %v11929_v41 }
 0x4f7   : > { %v8158_v24 = vpack.c.bf16 %v8026_v48, %v8022_v26  ;;  %v7499_v44 = vpop.f32.mrb[12].mxu0  ;;  %v931_v21 = vadd.f32 %v15185_v28, %v14053_v7  ;;  %8658 = vmatprep.subr.bf16.mxu0 %v12103_v5 }
 0x4f8   : > { %v10340_v10 = vadd.f32 %v7499_v44, %v918_v8  ;;  %v7501_v63 = vpop.f32.mrb[13].mxu0  ;;  %v15186_v44 = vld [vmem:[#allocation16_spill] sm:$0xff] }
 0x4f9   : > { %v10342_v56 = vadd.f32 %v7501_v63, %v919_v53  ;;  %v7503_v19 = vpop.f32.mrb[14].mxu0  ;;  %8525 = vmatprep.mubr.bf16.mxu0 %v8158_v24  ;;  %v934_v2 = vadd.f32 %v15186_v44, %v14051_v30 }
 0x4fa   : > { %v10344_v50 = vadd.f32 %v7503_v19, %v922_v57  ;;  %v7505_v45 = vpop.f32.mrb[15].mxu0  ;;  %8526 = vmatmul.mubr.bf16.gmra.mrb[80].mxu0 %v8157_v54  ;;  %v8029_v47 = vmax.f32 %v10340_v10, 0.0  ;;  %v15187_v10 = vld [vmem:[#allocation17_spill] sm:$0xff] }
 0x4fb   : > { %v10346_v3 = vadd.f32 %v7505_v45, %v923_v62  ;;  %v8030_v34 = vmax.f32 %v10342_v56, 0.0  ;;  %v935_v63 = vadd.f32 %v15187_v10, %v14053_v7  ;;  %v15188_v56 = vld [vmem:[#allocation18_spill] sm:$0xff] }
 0x4fc   : > { %10217 = vmatmul.mubr.msk.bf16.gmra.mrb[120].mxu1 %vm400_vm1, %v13708_v32  ;;  %v8033_v15 = vmax.f32 %v10344_v50, 0.0  ;;  %v938_v19 = vadd.f32 %v15188_v56, %v14051_v30 }
 0x4fd   : > { %6986 = vmatprep.mubr.bf16.mxu1 %v12103_v5  ;;  %v8034_v42 = vmax.f32 %v10346_v3, 0.0  ;;  %v11930_v3 = vld [vmem:[%s15087_s3 + $0x90] sm:$0xff]  }
 0x4fe   : > { %v8161_v32 = vpack.c.bf16 %v8033_v15, %v8029_v47  ;;  %v15189_v47 = vld [vmem:[#allocation19_spill] sm:$0xff]  ;;  %8659 = vmatpush1.bf16.msra.mxu0 %v11930_v3 }
 0x4ff   : > { %v8162_v18 = vpack.c.bf16 %v8034_v42, %v8030_v34  ;;  %v7509_v39 = vpop.f32.mrb[16].mxu0  ;;  %v939_v15 = vadd.f32 %v15189_v47, %v14053_v7  ;;  %8660 = vmatprep.subr.bf16.mxu0 %v12103_v5  ;;  %v15196_v47 = vld [vmem:[#allocation26_spill] sm:$0xff] }
 0x500   : > { %v10348_v25 = vadd.f32 %v7509_v39, %v926_v29  ;;  %v7511_v4 = vpop.f32.mrb[17].mxu0  ;;  %v15190_v39 = vld [vmem:[#allocation20_spill] sm:$0xff] }
 0x501   : > { %v10350_v26 = vadd.f32 %v7511_v4, %v927_v37  ;;  %v7513_v48 = vpop.f32.mrb[18].mxu0  ;;  %8533 = vmatprep.mubr.bf16.mxu0 %v8162_v18  ;;  %v942_v40 = vadd.f32 %v15190_v39, %v14051_v30 }
 0x502   : > { %v10352_v38 = vadd.f32 %v7513_v48, %v930_v12  ;;  %v7515_v8 = vpop.f32.mrb[19].mxu0  ;;  %8534 = vmatmul.mubr.bf16.gmra.mrb[84].mxu0 %v8161_v32  ;;  %v8037_v17 = vmax.f32 %v10348_v25, 0.0  ;;  %v15191_v25 = vld [vmem:[#allocation21_spill] sm:$0xff] }
 0x503   : > { %v10354_v54 = vadd.f32 %v7515_v8, %v931_v21  ;;  %v943_v4 = vadd.f32 %v15191_v25, %v14053_v7  ;;  %v15192_v21 = vld [vmem:[#allocation22_spill] sm:$0xff]  ;;  %v11931_v8 = vld [vmem:[%s15087_s3 + $0x98] sm:$0xff]  }
 0x504   : > { %10218 = vmatmul.mubr.msk.bf16.gmra.mrb[124].mxu1 %vm400_vm1, %v13718_v36  ;;  %v8041_v53 = vmax.f32 %v10352_v38, 0.0  ;;  %v8038_v36 = vmax.f32 %v10350_v26, 0.0  ;;  %v946_v26 = vadd.f32 %v15192_v21, %v14051_v30  ;;  %8661 = vmatpush1.bf16.msra.mxu0 %v11931_v8  ;;  %v15199_v21 = vld [vmem:[#allocation29_spill] sm:$0xff]  ;;  %v15200_v8 = vld [vmem:[#allocation30_spill] sm:$0xff] }
 0x505   : > { %6996 = vmatprep.mubr.bf16.mxu1 %v12103_v5  ;;  %v8042_v24 = vmax.f32 %v10354_v54, 0.0  ;;  %v15193_v54 = vld [vmem:[#allocation23_spill] sm:$0xff]  ;;  %8662 = vmatprep.subr.bf16.mxu0 %v12103_v5 }
 0x506   : > { %v8165_v57 = vpack.c.bf16 %v8041_v53, %v8037_v17  ;;  %v947_v17 = vadd.f32 %v15193_v54, %v14053_v7  ;;  %v962_v54 = vadd.f32 %v15200_v8, %v14051_v30 }
 0x507   : > { %v8166_v27 = vpack.c.bf16 %v8042_v24, %v8038_v36  ;;  %v7519_v62 = vpop.f32.mrb[20].mxu0 }
 0x508   : > { %v10356_v50 = vadd.f32 %v7519_v62, %v934_v2  ;;  %v7521_v45 = vpop.f32.mrb[21].mxu0 }
 0x509   : > { %v10358_v34 = vadd.f32 %v7521_v45, %v935_v63  ;;  %v7523_v42 = vpop.f32.mrb[22].mxu0  ;;  %8541 = vmatprep.mubr.bf16.mxu0 %v8166_v27  ;;  %v15194_v27 = vld [vmem:[#allocation24_spill] sm:$0xff] }
 0x50a   : > { %v10360_v6 = vadd.f32 %v7523_v42, %v938_v19  ;;  %v7525_v29 = vpop.f32.mrb[23].mxu0  ;;  %8542 = vmatmul.mubr.bf16.gmra.mrb[88].mxu0 %v8165_v57  ;;  %v8045_v49 = vmax.f32 %v10356_v50, 0.0  ;;  %v950_v62 = vadd.f32 %v15194_v27, %v14051_v30  ;;  %v15195_v19 = vld [vmem:[#allocation25_spill] sm:$0xff] }
 0x50b   : > { %v10362_v32 = vadd.f32 %v7525_v29, %v939_v15  ;;  %v951_v50 = vadd.f32 %v15195_v19, %v14053_v7  ;;  %v954_v15 = vadd.f32 %v15196_v47, %v14051_v30  ;;  %v15197_v29 = vld [vmem:[#allocation27_spill] sm:$0xff]  ;;  %v15202_v19 = vld [vmem:[#allocation32_spill] sm:$0xff] }
 0x50c   : > { %10219 = vmatmul.mubr.msk.bf16.gmra.mrb[128].mxu1 %vm400_vm1, %v13728_v52  ;;  %v8049_v37 = vmax.f32 %v10360_v6, 0.0  ;;  %v8046_v52 = vmax.f32 %v10358_v34, 0.0  ;;  %v11932_v6 = vld [vmem:[%s15087_s3 + $0xa0] sm:$0xff]  }
 0x50d   : > { %7006 = vmatprep.mubr.bf16.mxu1 %v12103_v5  ;;  %v8050_v18 = vmax.f32 %v10362_v32, 0.0  ;;  %v955_v32 = vadd.f32 %v15197_v29, %v14053_v7  ;;  %8663 = vmatpush1.bf16.msra.mxu0 %v11932_v6 }
 0x50e   : > { %v8169_v12 = vpack.c.bf16 %v8049_v37, %v8045_v49  ;;  %8664 = vmatprep.subr.bf16.mxu0 %v12103_v5 }
 0x50f   : > { %v8170_v41 = vpack.c.bf16 %v8050_v18, %v8046_v52  ;;  %v7529_v28 = vpop.f32.mrb[24].mxu0 }
 0x510   : > { %v10364_v48 = vadd.f32 %v7529_v28, %v942_v40  ;;  %v7531_v38 = vpop.f32.mrb[25].mxu0 }
 0x511   : > { %v10366_v53 = vadd.f32 %v7531_v38, %v943_v4  ;;  %v7533_v36 = vpop.f32.mrb[26].mxu0  ;;  %8549 = vmatprep.mubr.bf16.mxu0 %v8170_v41  ;;  %v15198_v4 = vld [vmem:[#allocation28_spill] sm:$0xff] }
 0x512   : > { %v10368_v24 = vadd.f32 %v7533_v36, %v946_v26  ;;  %v7535_v44 = vpop.f32.mrb[27].mxu0  ;;  %8550 = vmatmul.mubr.bf16.gmra.mrb[92].mxu0 %v8169_v12  ;;  %v8053_v57 = vmax.f32 %v10364_v48, 0.0  ;;  %v958_v41 = vadd.f32 %v15198_v4, %v14051_v30  ;;  %v959_v26 = vadd.f32 %v15199_v21, %v14053_v7  ;;  %v11933_v36 = vld [vmem:[%s15087_s3 + $0xa8] sm:$0xff]  }
 0x513   : > { %v10370_v2 = vadd.f32 %v7535_v44, %v947_v17  ;;  %8665 = vmatpush1.bf16.msra.mxu0 %v11933_v36 }
 0x514   : > { %10220 = vmatmul.mubr.msk.bf16.gmra.mrb[132].mxu1 %vm400_vm1, %v13738_v31  ;;  %v8057_v10 = vmax.f32 %v10368_v24, 0.0  ;;  %v8054_v31 = vmax.f32 %v10366_v53, 0.0  ;;  %v15201_v24 = vld [vmem:[#allocation31_spill] sm:$0xff]  ;;  %8666 = vmatprep.subr.bf16.mxu0 %v12103_v5 }
 0x515   : > { %7016 = vmatprep.mubr.bf16.mxu1 %v12103_v5  ;;  %v8058_v63 = vmax.f32 %v10370_v2, 0.0  ;;  %v963_v44 = vadd.f32 %v15201_v24, %v14053_v7 }
 0x516   : > { %v8173_v56 = vpack.c.bf16 %v8057_v10, %v8053_v57 }
 0x517   : > { %v8174_v45 = vpack.c.bf16 %v8058_v63, %v8054_v31  ;;  %v7539_v3 = vpop.f32.mrb[28].mxu0 }
 0x518   : > { %v10372_v34 = vadd.f32 %v7539_v3, %v950_v62  ;;  %v7541_v42 = vpop.f32.mrb[29].mxu0  ;;  %v15203_v3 = vld [vmem:[#allocation33_spill] sm:$0xff] }
 0x519   : > { %v10374_v49 = vadd.f32 %v7541_v42, %v951_v50  ;;  %v7543_v37 = vpop.f32.mrb[30].mxu0  ;;  %8557 = vmatprep.mubr.bf16.mxu0 %v8174_v45  ;;  %v966_v50 = vadd.f32 %v15202_v19, %v14051_v30  ;;  %v967_v47 = vadd.f32 %v15203_v3, %v14053_v7  ;;  %v15204_v42 = vld [vmem:[#allocation34_spill] sm:$0xff] }
 0x51a   : > { %v10376_v52 = vadd.f32 %v7543_v37, %v954_v15  ;;  %v7545_v18 = vpop.f32.mrb[31].mxu0  ;;  %8558 = vmatmul.mubr.bf16.gmra.mrb[96].mxu0 %v8173_v56  ;;  %v8061_v40 = vmax.f32 %v10372_v34, 0.0  ;;  %v970_v6 = vadd.f32 %v15204_v42, %v14051_v30  ;;  %v15205_v37 = vld [vmem:[#allocation35_spill] sm:$0xff] }
 0x51b   : > { %v10378_v39 = vadd.f32 %v7545_v18, %v955_v32 }
 0x51c   : > { %10221 = vmatmul.mubr.msk.bf16.gmra.mrb[136].mxu1 %vm400_vm1, %v13748_v58  ;;  %v8065_v12 = vmax.f32 %v10376_v52, 0.0  ;;  %v8062_v58 = vmax.f32 %v10374_v49, 0.0  ;;  %v11934_v49 = vld [vmem:[%s15087_s3 + $0xb0] sm:$0xff]   ;;  %v971_v52 = vadd.f32 %v15205_v37, %v14053_v7 }
 0x51d   : > { %7026 = vmatprep.mubr.bf16.mxu1 %v12103_v5  ;;  %v8066_v25 = vmax.f32 %v10378_v39, 0.0  ;;  %8667 = vmatpush1.bf16.msra.mxu0 %v11934_v49 }
 0x51e   : > { %v8177_v28 = vpack.c.bf16 %v8065_v12, %v8061_v40  ;;  %8668 = vmatprep.subr.bf16.mxu0 %v12103_v5 }
 0x51f   : > { %v8178_v48 = vpack.c.bf16 %v8066_v25, %v8062_v58  ;;  %v7549_v38 = vpop.f32.mrb[32].mxu0 }
 0x520   : > { %v10380_v17 = vadd.f32 %v7549_v38, %v958_v41  ;;  %v7551_v53 = vpop.f32.mrb[33].mxu0 }
 0x521   : > { %v10382_v2 = vadd.f32 %v7551_v53, %v959_v26  ;;  %v7553_v57 = vpop.f32.mrb[34].mxu0  ;;  %8565 = vmatprep.mubr.bf16.mxu0 %v8178_v48  ;;  %v15207_v48 = vld [vmem:[#allocation37_spill] sm:$0xff] }
 0x522   : > { %v10384_v10 = vadd.f32 %v7553_v57, %v962_v54  ;;  %v7555_v31 = vpop.f32.mrb[35].mxu0  ;;  %8566 = vmatmul.mubr.bf16.gmra.mrb[100].mxu0 %v8177_v28  ;;  %v8069_v27 = vmax.f32 %v10380_v17, 0.0  ;;  %v15206_v28 = vld [vmem:[#allocation36_spill] sm:$0xff]  ;;  %v975_v38 = vadd.f32 %v15207_v48, %v14053_v7  ;;  %v15208_v17 = vld [vmem:[#allocation38_spill] sm:$0xff] }
 0x523   : > { %v10386_v63 = vadd.f32 %v7555_v31, %v963_v44  ;;  %v974_v21 = vadd.f32 %v15206_v28, %v14051_v30  ;;  %v978_v53 = vadd.f32 %v15208_v17, %v14051_v30  ;;  %v11935_v44 = vld [vmem:[%s15087_s3 + $0xb8] sm:$0xff]  }
 0x524   : > { %10222 = vmatmul.mubr.msk.bf16.gmra.mrb[140].mxu1 %vm400_vm1, %v13757_v0  ;;  %v8073_v62 = vmax.f32 %v10384_v10, 0.0  ;;  %v8070_v0 = vmax.f32 %v10382_v2, 0.0  ;;  %v15209_v2 = vld [vmem:[#allocation39_spill] sm:$0xff]  ;;  %8669 = vmatpush1.bf16.msra.mxu0 %v11935_v44 }
 0x525   : > { %7680 = vmatprep.mubr.bf16.mxu1 %v12103_v5  ;;  %v8074_v56 = vmax.f32 %v10386_v63, 0.0  ;;  %v979_v57 = vadd.f32 %v15209_v2, %v14053_v7  ;;  %8670 = vmatprep.subr.bf16.mxu0 %v12103_v5 }
 0x526   : > { %v8181_v45 = vpack.c.bf16 %v8073_v62, %v8069_v27 }
 0x527   : > { %v8182_v15 = vpack.c.bf16 %v8074_v56, %v8070_v0  ;;  %v7559_v34 = vpop.f32.mrb[36].mxu0 }
 0x528   : > { %v10388_v29 = vadd.f32 %v7559_v34, %v966_v50  ;;  %v7561_v32 = vpop.f32.mrb[37].mxu0 }
 0x529   : > { %v10390_v18 = vadd.f32 %v7561_v32, %v967_v47  ;;  %v7563_v39 = vpop.f32.mrb[38].mxu0  ;;  %8573 = vmatprep.mubr.bf16.mxu0 %v8182_v15  ;;  %v15211_v15 = vld [vmem:[#allocation41_spill] sm:$0xff]  ;;  %v15212_v32 = vld [vmem:[#allocation42_spill] sm:$0xff] }
 0x52a   : > { %v10392_v40 = vadd.f32 %v7563_v39, %v970_v6  ;;  %v7565_v12 = vpop.f32.mrb[39].mxu0  ;;  %8574 = vmatmul.mubr.bf16.gmra.mrb[104].mxu0 %v8181_v45  ;;  %v8077_v25 = vmax.f32 %v10388_v29, 0.0  ;;  %v15210_v45 = vld [vmem:[#allocation40_spill] sm:$0xff]  ;;  %v983_v34 = vadd.f32 %v15211_v15, %v14053_v7  ;;  %v11937_v29 = vld [vmem:[%s15087_s3 + $0xc8] sm:$0xff]   ;;  %v986_v49 = vadd.f32 %v15212_v32, %v14051_v30 }
 0x52b   : > { %v10394_v58 = vadd.f32 %v7565_v12, %v971_v52  ;;  %v982_v3 = vadd.f32 %v15210_v45, %v14051_v30  ;;  %v11941_v32 = vld [vmem:[%s15087_s3 + $0xe8] sm:$0xff]  }
 0x52c   : > { %10263 = vmatmul.mubr.msk.bf16.vlgmr.msra.gmra.mrb[72].mxu1 %vm400_vm1, %v13770_v14  ;;  %v8081_v4 = vmax.f32 %v10392_v40, 0.0  ;;  %v8078_v14 = vmax.f32 %v10390_v18, 0.0  ;;  %v15213_v18 = vld [vmem:[#allocation43_spill] sm:$0xff] }
 0x52d   : > { %7690 = vmatprep.mubr.bf16.mxu1 %v12103_v5  ;;  %v8082_v41 = vmax.f32 %v10394_v58, 0.0  ;;  %v987_v39 = vadd.f32 %v15213_v18, %v14053_v7 }
 0x52e   : > { %v8185_v26 = vpack.c.bf16 %v8081_v4, %v8077_v25 }
 0x52f   : > { %v8186_v8 = vpack.c.bf16 %v8082_v41, %v8078_v14  ;;  %v7569_v54 = vpop.f32.mrb[40].mxu0  ;;  %v11938_v14 = vld [vmem:[%s15087_s3 + $0xd0] sm:$0xff]  }
 0x530   : > { %v10396_v36 = vadd.f32 %v7569_v54, %v974_v21  ;;  %v7571_v24 = vpop.f32.mrb[41].mxu0 }
 0x531   : > { %v10398_v10 = vadd.f32 %v7571_v24, %v975_v38  ;;  %v7573_v31 = vpop.f32.mrb[42].mxu0  ;;  %8581 = vmatprep.mubr.bf16.mxu0 %v8186_v8  ;;  %v15215_v8 = vld [vmem:[#allocation45_spill] sm:$0xff]  ;;  %v15216_v24 = vld [vmem:[#allocation46_spill] sm:$0xff] }
 0x532   : > { %v10400_v63 = vadd.f32 %v7573_v31, %v978_v53  ;;  %v7575_v27 = vpop.f32.mrb[43].mxu0  ;;  %8582 = vmatmul.mubr.bf16.gmra.mrb[108].mxu0 %v8185_v26  ;;  %v8085_v0 = vmax.f32 %v10396_v36, 0.0  ;;  %v15214_v26 = vld [vmem:[#allocation44_spill] sm:$0xff]  ;;  %v991_v54 = vadd.f32 %v15215_v8, %v14053_v7  ;;  %v11939_v36 = vld [vmem:[%s15087_s3 + $0xd8] sm:$0xff]   ;;  %v994_v44 = vadd.f32 %v15216_v24, %v14051_v30 }
 0x533   : > { %v10402_v62 = vadd.f32 %v7575_v27, %v979_v57  ;;  %v8086_v19 = vmax.f32 %v10398_v10, 0.0  ;;  %v990_v48 = vadd.f32 %v15214_v26, %v14051_v30  ;;  %v15217_v10 = vld [vmem:[#allocation47_spill] sm:$0xff]  ;;  %v15222_v26 = vld [vmem:[#allocation52_spill] sm:$0xff]  ;;  %v15223_v8 = vld [vmem:[#allocation53_spill] sm:$0xff] }
 0x534   : > { %10264 = vmatmul.mubr.msk.bf16.gmra.mrb[76].mxu1 %vm400_vm1, %v13780_v46  ;;  %v11936_v46 = vld [vmem:[%s15087_s3 + $0xc0] sm:$0xff]   ;;  %v8089_v56 = vmax.f32 %v10400_v63, 0.0  ;;  %v995_v31 = vadd.f32 %v15217_v10, %v14053_v7 }
 0x535   : > { %7700 = vmatprep.mubr.bf16.mxu1 %v12103_v5  ;;  %v8090_v50 = vmax.f32 %v10402_v62, 0.0  ;;  %8671 = vmatpush1.bf16.msra.mxu0 %v11936_v46 }
 0x536   : > { %v8189_v47 = vpack.c.bf16 %v8089_v56, %v8085_v0  ;;  %8672 = vmatprep.subr.bf16.mxu0 %v12103_v5  ;;  %v11940_v56 = vld [vmem:[%s15087_s3 + $0xe0] sm:$0xff]  }
 0x537   : > { %v8190_v42 = vpack.c.bf16 %v8090_v50, %v8086_v19  ;;  %v7579_v6 = vpop.f32.mrb[44].mxu0 }
 0x538   : > { %v10404_v37 = vadd.f32 %v7579_v6, %v982_v3  ;;  %v7581_v52 = vpop.f32.mrb[45].mxu0  ;;  %v15218_v3 = vld [vmem:[#allocation48_spill] sm:$0xff] }
 0x539   : > { %v10406_v40 = vadd.f32 %v7581_v52, %v983_v34  ;;  %v7583_v12 = vpop.f32.mrb[46].mxu0  ;;  %8589 = vmatprep.mubr.bf16.mxu0 %v8190_v42  ;;  %8673 = vmatpush1.bf16.msra.mxu0 %v11937_v29  ;;  %v15219_v34 = vld [vmem:[#allocation49_spill] sm:$0xff] }
 0x53a   : > { %v10408_v58 = vadd.f32 %v7583_v12, %v986_v49  ;;  %v7585_v25 = vpop.f32.mrb[47].mxu0  ;;  %8590 = vmatmul.mubr.bf16.gmra.mrb[112].mxu0 %v8189_v47  ;;  %8674 = vmatprep.subr.bf16.mxu0 %v12103_v5  ;;  %v998_v47 = vadd.f32 %v15218_v3, %v14051_v30  ;;  %v999_v42 = vadd.f32 %v15219_v34, %v14053_v7  ;;  %v15220_v49 = vld [vmem:[#allocation50_spill] sm:$0xff]  ;;  %v15227_v3 = vld [vmem:[#allocation57_spill] sm:$0xff] }
 0x53b   : > { %v10410_v4 = vadd.f32 %v7585_v25, %v987_v39  ;;  %v8094_v28 = vmax.f32 %v10406_v40, 0.0  ;;  %v15221_v39 = vld [vmem:[#allocation51_spill] sm:$0xff] }
 0x53c   : > { %10265 = vmatmul.mubr.msk.bf16.gmra.mrb[80].mxu1 %vm400_vm1, %v13792_v11  ;;  %v8093_v11 = vmax.f32 %v10404_v37, 0.0  ;;  %v8097_v41 = vmax.f32 %v10408_v58, 0.0  ;;  %v1002_v37 = vadd.f32 %v15220_v49, %v14051_v30  ;;  %v1003_v40 = vadd.f32 %v15221_v39, %v14053_v7  ;;  %v15229_v49 = vld [vmem:[#allocation59_spill] sm:$0xff] }
 0x53d   : > { %7710 = vmatprep.mubr.bf16.mxu1 %v12103_v5  ;;  %v8098_v21 = vmax.f32 %v10410_v4, 0.0  ;;  %8675 = vmatpush1.bf16.msra.mxu0 %v11938_v14 }
 0x53e   : > { %v8193_v38 = vpack.c.bf16 %v8097_v41, %v8093_v11  ;;  %8676 = vmatprep.subr.bf16.mxu0 %v12103_v5  ;;  %v11942_v11 = vld [vmem:[%s15087_s3 + $0xf0] sm:$0xff]  }
 0x53f   : > { %v8194_v17 = vpack.c.bf16 %v8098_v21, %v8094_v28  ;;  %v7589_v53 = vpop.f32.mrb[48].mxu0 }
 0x540   : > { %v10412_v2 = vadd.f32 %v7589_v53, %v990_v48  ;;  %v7591_v57 = vpop.f32.mrb[49].mxu0  ;;  %v1006_v48 = vadd.f32 %v15222_v26, %v14051_v30 }
 0x541   : > { %v10414_v63 = vadd.f32 %v7591_v57, %v991_v54  ;;  %v7593_v27 = vpop.f32.mrb[50].mxu0  ;;  %8597 = vmatprep.mubr.bf16.mxu0 %v8194_v17  ;;  %8677 = vmatpush1.bf16.msra.mxu0 %v11939_v36  ;;  %v1007_v54 = vadd.f32 %v15223_v8, %v14053_v7  ;;  %v15224_v36 = vld [vmem:[#allocation54_spill] sm:$0xff]  ;;  %v15225_v57 = vld [vmem:[#allocation55_spill] sm:$0xff] }
 0x542   : > { %v10416_v62 = vadd.f32 %v7593_v27, %v994_v44  ;;  %v7595_v46 = vpop.f32.mrb[51].mxu0  ;;  %8598 = vmatmul.mubr.bf16.gmra.mrb[116].mxu0 %v8193_v38  ;;  %8678 = vmatprep.subr.bf16.mxu0 %v12103_v5  ;;  %v1010_v24 = vadd.f32 %v15224_v36, %v14051_v30  ;;  %v1011_v10 = vadd.f32 %v15225_v57, %v14053_v7 }
 0x543   : > { %v10418_v0 = vadd.f32 %v7595_v46, %v995_v31  ;;  %v8102_v50 = vmax.f32 %v10414_v63, 0.0 }
 0x544   : > { %10266 = vmatmul.mubr.msk.bf16.gmra.mrb[84].mxu1 %vm400_vm1, %v13808_v9  ;;  %v8101_v9 = vmax.f32 %v10412_v2, 0.0  ;;  %v8105_v19 = vmax.f32 %v10416_v62, 0.0 }
 0x545   : > { %7720 = vmatprep.mubr.bf16.mxu1 %v12103_v5  ;;  %v8106_v45 = vmax.f32 %v10418_v0, 0.0  ;;  %8679 = vmatpush1.bf16.msra.mxu0 %v11940_v56 }
 0x546   : > { %v8197_v15 = vpack.c.bf16 %v8105_v19, %v8101_v9  ;;  %8680 = vmatprep.subr.bf16.mxu0 %v12103_v5 }
 0x547   : > { %v8198_v6 = vpack.c.bf16 %v8106_v45, %v8102_v50  ;;  %v7599_v29 = vpop.f32.mrb[52].mxu0 }
 0x548   : > { %v10420_v52 = vadd.f32 %v7599_v29, %v998_v47  ;;  %v7601_v18 = vpop.f32.mrb[53].mxu0  ;;  %v1015_v47 = vadd.f32 %v15227_v3, %v14053_v7 }
 0x549   : > { %v10422_v12 = vadd.f32 %v7601_v18, %v999_v42  ;;  %v7603_v58 = vpop.f32.mrb[54].mxu0  ;;  %8605 = vmatprep.mubr.bf16.mxu0 %v8198_v6  ;;  %8681 = vmatpush1.bf16.msra.mxu0 %v11941_v32  ;;  %v15228_v42 = vld [vmem:[#allocation58_spill] sm:$0xff] }
 0x54a   : > { %v10424_v25 = vadd.f32 %v7603_v58, %v1002_v37  ;;  %v7605_v4 = vpop.f32.mrb[55].mxu0  ;;  %8606 = vmatmul.mubr.bf16.gmra.mrb[120].mxu0 %v8197_v15  ;;  %8682 = vmatprep.subr.bf16.mxu0 %v12103_v5  ;;  %v1018_v6 = vadd.f32 %v15228_v42, %v14051_v30  ;;  %v1019_v37 = vadd.f32 %v15229_v49, %v14053_v7 }
 0x54b   : > { %v10426_v14 = vadd.f32 %v7605_v4, %v1003_v40  ;;  %v8110_v28 = vmax.f32 %v10422_v12, 0.0 }
 0x54c   : > { %10267 = vmatmul.mubr.msk.bf16.gmra.mrb[88].mxu1 %vm400_vm1, %v13821_v16  ;;  %v8109_v16 = vmax.f32 %v10420_v52, 0.0  ;;  %v8113_v41 = vmax.f32 %v10424_v25, 0.0 }
 0x54d   : > { %7730 = vmatprep.mubr.bf16.mxu1 %v12103_v5  ;;  %v8114_v21 = vmax.f32 %v10426_v14, 0.0  ;;  %8683 = vmatpush1.bf16.msra.mxu0 %v11942_v11  ;;  %v15230_v11 = vld [vmem:[#allocation60_spill] sm:$0xff] }
 0x54e   : > { %v8201_v38 = vpack.c.bf16 %v8113_v41, %v8109_v16  ;;  %8684 = vmatprep.subr.bf16.mxu0 %v12103_v5  ;;  %v1022_v16 = vadd.f32 %v15230_v11, %v14051_v30  ;;  %v15231_v41 = vld [vmem:[#allocation61_spill] sm:$0xff] }
 0x54f   : > { %v8202_v17 = vpack.c.bf16 %v8114_v21, %v8110_v28  ;;  %v7609_v53 = vpop.f32.mrb[56].mxu0  ;;  %v1023_v28 = vadd.f32 %v15231_v41, %v14053_v7 }
 0x550   : > { %v10428_v44 = vadd.f32 %v7609_v53, %v1006_v48  ;;  %v7611_v2 = vpop.f32.mrb[57].mxu0  ;;  %v15232_v48 = vld [vmem:[#allocation62_spill] sm:$0xff] }
 0x551   : > { %v10430_v31 = vadd.f32 %v7611_v2, %v1007_v54  ;;  %v7613_v63 = vpop.f32.mrb[58].mxu0  ;;  %8613 = vmatprep.mubr.bf16.mxu0 %v8202_v17  ;;  %v15233_v17 = vld [vmem:[#allocation63_spill] sm:$0xff] }
 0x552   : > { %v10432_v27 = vadd.f32 %v7613_v63, %v1010_v24  ;;  %v7615_v62 = vpop.f32.mrb[59].mxu0  ;;  %8614 = vmatmul.mubr.bf16.gmra.mrb[124].mxu0 %v8201_v38  ;;  %v8117_v0 = vmax.f32 %v10428_v44, 0.0  ;;  %v1026_v38 = vadd.f32 %v15232_v48, %v14051_v30  ;;  %v1027_v53 = vadd.f32 %v15233_v17, %v14053_v7 }
 0x553   : > { %v10434_v46 = vadd.f32 %v7615_v62, %v1011_v10  ;;  %v8118_v9 = vmax.f32 %v10430_v31, 0.0  ;;  %v15234_v62 = vld [vmem:[#allocation64_spill] sm:$0xff] }
 0x554   : > { %10268 = vmatmul.mubr.msk.bf16.gmra.mrb[92].mxu1 %vm400_vm1, %v13839_v1  ;;  %v8121_v56 = vmax.f32 %v10432_v27, 0.0  ;;  %v15226_v1 = vld [vmem:[#allocation56_spill] sm:$0xff] }
 0x555   : > { %7740 = vmatprep.mubr.bf16.mxu1 %v12103_v5  ;;  %v8122_v19 = vmax.f32 %v10434_v46, 0.0  ;;  %v1014_v50 = vadd.f32 %v15226_v1, %v14051_v30  ;;  %v1030_v46 = vadd.f32 %v15234_v62, %v14051_v30  ;;  %v15236_v1 = vld [vmem:[#allocation66_spill] sm:$0xff] }
 0x556   : > { %v8205_v45 = vpack.c.bf16 %v8121_v56, %v8117_v0  ;;  %v15235_v0 = vld [vmem:[#allocation65_spill] sm:$0xff] }
 0x557   : > { %v8206_v15 = vpack.c.bf16 %v8122_v19, %v8118_v9  ;;  %v7619_v34 = vpop.f32.mrb[60].mxu0  ;;  %v1031_v56 = vadd.f32 %v15235_v0, %v14053_v7 }
 0x558   : > { %v10436_v29 = vadd.f32 %v7619_v34, %v1014_v50  ;;  %v7621_v32 = vpop.f32.mrb[61].mxu0  ;;  %v1034_v50 = vadd.f32 %v15236_v1, %v14051_v30 }
 0x559   : > { %v10438_v52 = vadd.f32 %v7621_v32, %v1015_v47  ;;  %v7623_v18 = vpop.f32.mrb[62].mxu0  ;;  %8621 = vmatprep.mubr.bf16.mxu0 %v8206_v15  ;;  %v15237_v47 = vld [vmem:[#allocation67_spill] sm:$0xff] }
 0x55a   : > { %v10440_v39 = vadd.f32 %v7623_v18, %v1018_v6  ;;  %v7625_v40 = vpop.f32.mrb[63].mxu0  ;;  %8622 = vmatmul.mubr.bf16.gmra.mrb[128].mxu0 %v8205_v45  ;;  %v8125_v58 = vmax.f32 %v10436_v29, 0.0  ;;  %v1035_v15 = vadd.f32 %v15237_v47, %v14053_v7 }
 0x55b   : > { %v10442_v12 = vadd.f32 %v7625_v40, %v1019_v37  ;;  %v8126_v4 = vmax.f32 %v10438_v52, 0.0 }
 0x55c   : > { %10269 = vmatmul.mubr.msk.bf16.gmra.mrb[96].mxu1 %vm400_vm1, %v13857_v59  ;;  %v8129_v25 = vmax.f32 %v10440_v39, 0.0 }
 0x55d   : > { %7750 = vmatprep.mubr.bf16.mxu1 %v12103_v5  ;;  %v8130_v14 = vmax.f32 %v10442_v12, 0.0 }
 0x55e   : > { %v8209_v59 = vpack.c.bf16 %v8129_v25, %v8125_v58 }
 0x55f   : > { %v8210_v21 = vpack.c.bf16 %v8130_v14, %v8126_v4  ;;  %v7629_v26 = vpop.f32.mrb[64].mxu0 }
 0x560   : > { %v10444_v8 = vadd.f32 %v7629_v26, %v1022_v16  ;;  %v7631_v54 = vpop.f32.mrb[65].mxu0 }
 0x561   : > { %v10446_v36 = vadd.f32 %v7631_v54, %v1023_v28  ;;  %v7633_v24 = vpop.f32.mrb[66].mxu0  ;;  %8629 = vmatprep.mubr.bf16.mxu0 %v8210_v21 }
 0x562   : > { %v10448_v44 = vadd.f32 %v7633_v24, %v1026_v38  ;;  %v7635_v2 = vpop.f32.mrb[67].mxu0  ;;  %8630 = vmatmul.mubr.bf16.gmra.mrb[132].mxu0 %v8209_v59  ;;  %v8133_v10 = vmax.f32 %v10444_v8, 0.0 }
 0x563   : > { %v10450_v57 = vadd.f32 %v7635_v2, %v1027_v53  ;;  %v8134_v63 = vmax.f32 %v10446_v36, 0.0 }
 0x564   : > { %10270 = vmatmul.mubr.msk.bf16.gmra.mrb[100].mxu1 %vm400_vm1, %v13875_v33  ;;  %v8137_v31 = vmax.f32 %v10448_v44, 0.0 }
 0x565   : > { %7760 = vmatprep.mubr.bf16.mxu1 %v12103_v5  ;;  %v8138_v27 = vmax.f32 %v10450_v57, 0.0 }
 0x566   : > { %v8213_v33 = vpack.c.bf16 %v8137_v31, %v8133_v10 }
 0x567   : > { %v8214_v9 = vpack.c.bf16 %v8138_v27, %v8134_v63  ;;  %v7639_v19 = vpop.f32.mrb[68].mxu0 }
 0x568   : > { %v10452_v45 = vadd.f32 %v7639_v19, %v1030_v46  ;;  %v7641_v3 = vpop.f32.mrb[69].mxu0 }
 0x569   : > { %v10454_v34 = vadd.f32 %v7641_v3, %v1031_v56  ;;  %v7643_v42 = vpop.f32.mrb[70].mxu0  ;;  %8637 = vmatprep.mubr.bf16.mxu0 %v8214_v9 }
 0x56a   : > { %v10456_v6 = vadd.f32 %v7643_v42, %v1034_v50  ;;  %v7645_v29 = vpop.f32.mrb[71].mxu0  ;;  %8638 = vmatmul.mubr.bf16.gmra.mrb[136].mxu0 %v8213_v33  ;;  %v8141_v49 = vmax.f32 %v10452_v45, 0.0 }
 0x56b   : > { %v10458_v32 = vadd.f32 %v7645_v29, %v1035_v15  ;;  %v8142_v30 = vmax.f32 %v10454_v34, 0.0 }
 0x56c   : > { %10271 = vmatmul.mubr.msk.bf16.gmra.mrb[104].mxu1 %vm400_vm1, %v13893_v13  ;;  %v8145_v37 = vmax.f32 %v10456_v6, 0.0  ;;  %v11943_v13 = vld [vmem:[%s15087_s3 + $0xf8] sm:$0xff]  }
 0x56d   : > { %7770 = vmatprep.mubr.bf16.mxu1 %v12103_v5  ;;  %v8146_v52 = vmax.f32 %v10458_v32, 0.0  ;;  %8685 = vmatpush1.bf16.msra.mxu0 %v11943_v13 }
 0x56e   : > { %v8217_v18 = vpack.c.bf16 %v8145_v37, %v8141_v49 }
 0x56f   : > { %v8218_v39 = vpack.c.bf16 %v8146_v52, %v8142_v30 }
 0x571   : > { %8645 = vmatprep.mubr.bf16.mxu0 %v8218_v39 }
 0x572   : > { %8646 = vmatmul.mubr.bf16.gmra.mrb[140].mxu0 %v8217_v18 }
 0x574   : > { %10272 = vmatmul.mubr.msk.bf16.gmra.mrb[108].mxu1 %vm400_vm1, %v13911_v20 }
 0x575   : > { %7780 = vmatprep.mubr.bf16.mxu1 %v12103_v5 }
 0x57c   : > { %10273 = vmatmul.mubr.msk.bf16.gmra.mrb[112].mxu1 %vm400_vm1, %v13929_v22  ;;  %v15238_v22 = vld [vmem:[#allocation2_spill] sm:$0xff] }
 0x57d   : > { %7790 = vmatprep.mubr.bf16.mxu1 %v12103_v5 }
 0x584   : > { %10274 = vmatmul.mubr.msk.bf16.gmra.mrb[116].mxu1 %vm400_vm1, %v13944_v60 }
 0x585   : > { %7800 = vmatprep.mubr.bf16.mxu1 %v12103_v5 }
 0x58c   : > { %10275 = vmatmul.mubr.msk.bf16.gmra.mrb[120].mxu1 %vm400_vm1, %v13962_v55 }
 0x58d   : > { %7810 = vmatprep.mubr.bf16.mxu1 %v12103_v5 }
 0x594   : > { %10276 = vmatmul.mubr.msk.bf16.gmra.mrb[124].mxu1 %vm400_vm1, %v13972_v61  ;;  %v15239_v61 = vld [vmem:[#allocation3_spill] sm:$0xff] }
 0x595   : > { %7820 = vmatprep.mubr.bf16.mxu1 %v12103_v5 }
 0x59c   : > { %10277 = vmatmul.mubr.msk.bf16.gmra.mrb[128].mxu1 %vm400_vm1, %v13982_v43 }
 0x59d   : > { %7830 = vmatprep.mubr.bf16.mxu1 %v12103_v5 }
 0x5a4   : > { %10278 = vmatmul.mubr.msk.bf16.gmra.mrb[132].mxu1 %vm400_vm1, %v13992_v35 }
 0x5a5   : > { %7840 = vmatprep.mubr.bf16.mxu1 %v12103_v5 }
 0x5ac   : > { %10279 = vmatmul.mubr.msk.bf16.gmra.mrb[136].mxu1 %vm400_vm1, %v14002_v51 }
 0x5ad   : > { %7850 = vmatprep.mubr.bf16.mxu1 %v12103_v5 }
 0x5b4   : > { %10280 = vmatmul.mubr.msk.bf16.gmra.mrb[140].mxu1 %vm400_vm1, %v14012_v23 }
 0x5ff   : > { %v7682_v20 = vpop.f32.mrb[72].mxu1 }
 0x600   : > { %v10459_v60 = vadd.f32 %v7682_v20, %v15238_v22  ;;  %v7684_v55 = vpop.f32.mrb[73].mxu1 }
 0x601   : > { %v10460_v43 = vadd.f32 %v7684_v55, %v15239_v61  ;;  %v7686_v7 = vpop.f32.mrb[74].mxu1 }
 0x602   : > { %v10461_v40 = vadd.f32 %v7686_v7, %v15238_v22  ;;  %v7688_v35 = vpop.f32.mrb[75].mxu1  ;;  %v8007_v58 = vmax.f32 %v10459_v60, 0.0 }
 0x603   : > { %v10462_v12 = vadd.f32 %v7688_v35, %v15239_v61  ;;  %v8008_v51 = vmax.f32 %v10460_v43, 0.0 }
 0x604   : > { %v8011_v25 = vmax.f32 %v10461_v40, 0.0 }
 0x605   : > { %v8012_v4 = vmax.f32 %v10462_v12, 0.0 }
 0x606   : > { %v8151_v5 = vpack.c.bf16 %v8011_v25, %v8007_v58 }
 0x607   : > { %v8152_v14 = vpack.c.bf16 %v8012_v4, %v8008_v51  ;;  %v7692_v11 = vpop.f32.mrb[76].mxu1 }
 0x608   : > { %v10463_v23 = vadd.f32 %v7692_v11, %v15238_v22  ;;  %v7694_v16 = vpop.f32.mrb[77].mxu1 }
 0x609   : > { %v10464_v59 = vadd.f32 %v7694_v16, %v15239_v61  ;;  %v7696_v41 = vpop.f32.mrb[78].mxu1  ;;  %8686 = vmatprep.mubr.bf16.mxu0 %v8152_v14 }
 0x60a   : > { %v10465_v28 = vadd.f32 %v7696_v41, %v15238_v22  ;;  %v7698_v21 = vpop.f32.mrb[79].mxu1  ;;  %8687 = vmatmul.mubr.bf16.vlgmr.msra.gmra.mrb[72].mxu0 %v8151_v5  ;;  %v8015_v48 = vmax.f32 %v10463_v23, 0.0 }
 0x60b   : > { %v10466_v26 = vadd.f32 %v7698_v21, %v15239_v61  ;;  %v8016_v8 = vmax.f32 %v10464_v59, 0.0 }
 0x60c   : > { %v8019_v38 = vmax.f32 %v10465_v28, 0.0 }
 0x60d   : > { %v8020_v54 = vmax.f32 %v10466_v26, 0.0 }
 0x60e   : > { %v8155_v17 = vpack.c.bf16 %v8019_v38, %v8015_v48 }
 0x60f   : > { %v8156_v53 = vpack.c.bf16 %v8020_v54, %v8016_v8  ;;  %v7702_v36 = vpop.f32.mrb[80].mxu1 }
 0x610   : > { %v10467_v24 = vadd.f32 %v7702_v36, %v15238_v22  ;;  %v7704_v44 = vpop.f32.mrb[81].mxu1 }
 0x611   : > { %v10468_v2 = vadd.f32 %v7704_v44, %v15239_v61  ;;  %v7706_v57 = vpop.f32.mrb[82].mxu1  ;;  %8694 = vmatprep.mubr.bf16.mxu0 %v8156_v53 }
 0x612   : > { %v10469_v10 = vadd.f32 %v7706_v57, %v15238_v22  ;;  %v7708_v31 = vpop.f32.mrb[83].mxu1  ;;  %8695 = vmatmul.mubr.bf16.gmra.mrb[76].mxu0 %v8155_v17  ;;  %v8023_v27 = vmax.f32 %v10467_v24, 0.0 }
 0x613   : > { %v10470_v63 = vadd.f32 %v7708_v31, %v15239_v61  ;;  %v8024_v46 = vmax.f32 %v10468_v2, 0.0 }
 0x614   : > { %v8027_v62 = vmax.f32 %v10469_v10, 0.0 }
 0x615   : > { %v8028_v33 = vmax.f32 %v10470_v63, 0.0 }
 0x616   : > { %v8159_v0 = vpack.c.bf16 %v8027_v62, %v8023_v27 }
 0x617   : > { %v8160_v56 = vpack.c.bf16 %v8028_v33, %v8024_v46  ;;  %v7712_v9 = vpop.f32.mrb[84].mxu1 }
 0x618   : > { %v10471_v19 = vadd.f32 %v7712_v9, %v15238_v22  ;;  %v7714_v1 = vpop.f32.mrb[85].mxu1 }
 0x619   : > { %v10472_v50 = vadd.f32 %v7714_v1, %v15239_v61  ;;  %v7716_v45 = vpop.f32.mrb[86].mxu1  ;;  %8702 = vmatprep.mubr.bf16.mxu0 %v8160_v56 }
 0x61a   : > { %v10473_v3 = vadd.f32 %v7716_v45, %v15238_v22  ;;  %v7718_v47 = vpop.f32.mrb[87].mxu1  ;;  %8703 = vmatmul.mubr.bf16.gmra.mrb[80].mxu0 %v8159_v0  ;;  %v8031_v34 = vmax.f32 %v10471_v19, 0.0 }
 0x61b   : > { %v10474_v15 = vadd.f32 %v7718_v47, %v15239_v61  ;;  %v8032_v6 = vmax.f32 %v10472_v50, 0.0 }
 0x61c   : > { %v8035_v42 = vmax.f32 %v10473_v3, 0.0 }
 0x61d   : > { %v8036_v29 = vmax.f32 %v10474_v15, 0.0 }
 0x61e   : > { %v8163_v32 = vpack.c.bf16 %v8035_v42, %v8031_v34 }
 0x61f   : > { %v8164_v49 = vpack.c.bf16 %v8036_v29, %v8032_v6  ;;  %v7722_v37 = vpop.f32.mrb[88].mxu1 }
 0x620   : > { %v10475_v30 = vadd.f32 %v7722_v37, %v15238_v22  ;;  %v7724_v52 = vpop.f32.mrb[89].mxu1 }
 0x621   : > { %v10476_v18 = vadd.f32 %v7724_v52, %v15239_v61  ;;  %v7726_v39 = vpop.f32.mrb[90].mxu1  ;;  %8710 = vmatprep.mubr.bf16.mxu0 %v8164_v49 }
 0x622   : > { %v10477_v13 = vadd.f32 %v7726_v39, %v15238_v22  ;;  %v7728_v20 = vpop.f32.mrb[91].mxu1  ;;  %8711 = vmatmul.mubr.bf16.gmra.mrb[84].mxu0 %v8163_v32  ;;  %v8039_v55 = vmax.f32 %v10475_v30, 0.0 }
 0x623   : > { %v10478_v60 = vadd.f32 %v7728_v20, %v15239_v61  ;;  %v8040_v7 = vmax.f32 %v10476_v18, 0.0 }
 0x624   : > { %v8043_v43 = vmax.f32 %v10477_v13, 0.0 }
 0x625   : > { %v8044_v40 = vmax.f32 %v10478_v60, 0.0 }
 0x626   : > { %v8167_v35 = vpack.c.bf16 %v8043_v43, %v8039_v55 }
 0x627   : > { %v8168_v12 = vpack.c.bf16 %v8044_v40, %v8040_v7  ;;  %v7732_v58 = vpop.f32.mrb[92].mxu1 }
 0x628   : > { %v10479_v25 = vadd.f32 %v7732_v58, %v15238_v22  ;;  %v7734_v51 = vpop.f32.mrb[93].mxu1 }
 0x629   : > { %v10480_v4 = vadd.f32 %v7734_v51, %v15239_v61  ;;  %v7736_v5 = vpop.f32.mrb[94].mxu1  ;;  %8718 = vmatprep.mubr.bf16.mxu0 %v8168_v12 }
 0x62a   : > { %v10481_v14 = vadd.f32 %v7736_v5, %v15238_v22  ;;  %v7738_v11 = vpop.f32.mrb[95].mxu1  ;;  %8719 = vmatmul.mubr.bf16.gmra.mrb[88].mxu0 %v8167_v35  ;;  %v8047_v16 = vmax.f32 %v10479_v25, 0.0 }
 0x62b   : > { %v10482_v23 = vadd.f32 %v7738_v11, %v15239_v61  ;;  %v8048_v41 = vmax.f32 %v10480_v4, 0.0 }
 0x62c   : > { %v8051_v59 = vmax.f32 %v10481_v14, 0.0 }
 0x62d   : > { %v8052_v28 = vmax.f32 %v10482_v23, 0.0 }
 0x62e   : > { %v8171_v21 = vpack.c.bf16 %v8051_v59, %v8047_v16 }
 0x62f   : > { %v8172_v26 = vpack.c.bf16 %v8052_v28, %v8048_v41  ;;  %v7742_v48 = vpop.f32.mrb[96].mxu1 }
 0x630   : > { %v10483_v38 = vadd.f32 %v7742_v48, %v15238_v22  ;;  %v7744_v8 = vpop.f32.mrb[97].mxu1 }
 0x631   : > { %v10484_v54 = vadd.f32 %v7744_v8, %v15239_v61  ;;  %v7746_v17 = vpop.f32.mrb[98].mxu1  ;;  %8726 = vmatprep.mubr.bf16.mxu0 %v8172_v26 }
 0x632   : > { %v10485_v53 = vadd.f32 %v7746_v17, %v15238_v22  ;;  %v7748_v36 = vpop.f32.mrb[99].mxu1  ;;  %8727 = vmatmul.mubr.bf16.gmra.mrb[92].mxu0 %v8171_v21  ;;  %v8055_v44 = vmax.f32 %v10483_v38, 0.0 }
 0x633   : > { %v10486_v24 = vadd.f32 %v7748_v36, %v15239_v61  ;;  %v8056_v57 = vmax.f32 %v10484_v54, 0.0 }
 0x634   : > { %v8059_v2 = vmax.f32 %v10485_v53, 0.0 }
 0x635   : > { %v8060_v10 = vmax.f32 %v10486_v24, 0.0 }
 0x636   : > { %v8175_v31 = vpack.c.bf16 %v8059_v2, %v8055_v44 }
 0x637   : > { %v8176_v63 = vpack.c.bf16 %v8060_v10, %v8056_v57  ;;  %v7752_v27 = vpop.f32.mrb[100].mxu1 }
 0x638   : > { %v10487_v62 = vadd.f32 %v7752_v27, %v15238_v22  ;;  %v7754_v46 = vpop.f32.mrb[101].mxu1 }
 0x639   : > { %v10488_v33 = vadd.f32 %v7754_v46, %v15239_v61  ;;  %v7756_v0 = vpop.f32.mrb[102].mxu1  ;;  %8734 = vmatprep.mubr.bf16.mxu0 %v8176_v63 }
 0x63a   : > { %v10489_v56 = vadd.f32 %v7756_v0, %v15238_v22  ;;  %v7758_v9 = vpop.f32.mrb[103].mxu1  ;;  %8735 = vmatmul.mubr.bf16.gmra.mrb[96].mxu0 %v8175_v31  ;;  %v8063_v1 = vmax.f32 %v10487_v62, 0.0 }
 0x63b   : > { %v10490_v19 = vadd.f32 %v7758_v9, %v15239_v61  ;;  %v8064_v45 = vmax.f32 %v10488_v33, 0.0 }
 0x63c   : > { %v8067_v50 = vmax.f32 %v10489_v56, 0.0 }
 0x63d   : > { %v8068_v3 = vmax.f32 %v10490_v19, 0.0 }
 0x63e   : > { %v8179_v47 = vpack.c.bf16 %v8067_v50, %v8063_v1 }
 0x63f   : > { %v8180_v15 = vpack.c.bf16 %v8068_v3, %v8064_v45  ;;  %v7762_v34 = vpop.f32.mrb[104].mxu1 }
 0x640   : > { %v10491_v42 = vadd.f32 %v7762_v34, %v15238_v22  ;;  %v7764_v6 = vpop.f32.mrb[105].mxu1 }
 0x641   : > { %v10492_v29 = vadd.f32 %v7764_v6, %v15239_v61  ;;  %v7766_v32 = vpop.f32.mrb[106].mxu1  ;;  %8742 = vmatprep.mubr.bf16.mxu0 %v8180_v15 }
 0x642   : > { %v10493_v49 = vadd.f32 %v7766_v32, %v15238_v22  ;;  %v7768_v37 = vpop.f32.mrb[107].mxu1  ;;  %8743 = vmatmul.mubr.bf16.gmra.mrb[100].mxu0 %v8179_v47  ;;  %v8071_v52 = vmax.f32 %v10491_v42, 0.0 }
 0x643   : > { %v10494_v30 = vadd.f32 %v7768_v37, %v15239_v61  ;;  %v8072_v39 = vmax.f32 %v10492_v29, 0.0 }
 0x644   : > { %v8075_v18 = vmax.f32 %v10493_v49, 0.0 }
 0x645   : > { %v8076_v13 = vmax.f32 %v10494_v30, 0.0 }
 0x646   : > { %v8183_v20 = vpack.c.bf16 %v8075_v18, %v8071_v52 }
 0x647   : > { %v8184_v60 = vpack.c.bf16 %v8076_v13, %v8072_v39  ;;  %v7772_v55 = vpop.f32.mrb[108].mxu1 }
 0x648   : > { %v10495_v43 = vadd.f32 %v7772_v55, %v15238_v22  ;;  %v7774_v7 = vpop.f32.mrb[109].mxu1 }
 0x649   : > { %v10496_v40 = vadd.f32 %v7774_v7, %v15239_v61  ;;  %v7776_v35 = vpop.f32.mrb[110].mxu1  ;;  %8750 = vmatprep.mubr.bf16.mxu0 %v8184_v60 }
 0x64a   : > { %v10497_v12 = vadd.f32 %v7776_v35, %v15238_v22  ;;  %v7778_v58 = vpop.f32.mrb[111].mxu1  ;;  %8751 = vmatmul.mubr.bf16.gmra.mrb[104].mxu0 %v8183_v20  ;;  %v8079_v51 = vmax.f32 %v10495_v43, 0.0 }
 0x64b   : > { %v10498_v25 = vadd.f32 %v7778_v58, %v15239_v61  ;;  %v8080_v5 = vmax.f32 %v10496_v40, 0.0 }
 0x64c   : > { %v8083_v4 = vmax.f32 %v10497_v12, 0.0 }
 0x64d   : > { %v8084_v14 = vmax.f32 %v10498_v25, 0.0 }
 0x64e   : > { %v8187_v11 = vpack.c.bf16 %v8083_v4, %v8079_v51 }
 0x64f   : > { %v8188_v23 = vpack.c.bf16 %v8084_v14, %v8080_v5  ;;  %v7782_v16 = vpop.f32.mrb[112].mxu1 }
 0x650   : > { %v10499_v59 = vadd.f32 %v7782_v16, %v15238_v22  ;;  %v7784_v41 = vpop.f32.mrb[113].mxu1 }
 0x651   : > { %v10500_v28 = vadd.f32 %v7784_v41, %v15239_v61  ;;  %v7786_v21 = vpop.f32.mrb[114].mxu1  ;;  %8758 = vmatprep.mubr.bf16.mxu0 %v8188_v23 }
 0x652   : > { %v10501_v26 = vadd.f32 %v7786_v21, %v15238_v22  ;;  %v7788_v48 = vpop.f32.mrb[115].mxu1  ;;  %8759 = vmatmul.mubr.bf16.gmra.mrb[108].mxu0 %v8187_v11  ;;  %v8087_v8 = vmax.f32 %v10499_v59, 0.0 }
 0x653   : > { %v10502_v38 = vadd.f32 %v7788_v48, %v15239_v61  ;;  %v8088_v17 = vmax.f32 %v10500_v28, 0.0 }
 0x654   : > { %v8091_v54 = vmax.f32 %v10501_v26, 0.0 }
 0x655   : > { %v8092_v53 = vmax.f32 %v10502_v38, 0.0 }
 0x656   : > { %v8191_v36 = vpack.c.bf16 %v8091_v54, %v8087_v8 }
 0x657   : > { %v8192_v24 = vpack.c.bf16 %v8092_v53, %v8088_v17  ;;  %v7792_v44 = vpop.f32.mrb[116].mxu1 }
 0x658   : > { %v10503_v2 = vadd.f32 %v7792_v44, %v15238_v22  ;;  %v7794_v57 = vpop.f32.mrb[117].mxu1 }
 0x659   : > { %v10504_v10 = vadd.f32 %v7794_v57, %v15239_v61  ;;  %v7796_v31 = vpop.f32.mrb[118].mxu1  ;;  %8766 = vmatprep.mubr.bf16.mxu0 %v8192_v24 }
 0x65a   : > { %v10505_v63 = vadd.f32 %v7796_v31, %v15238_v22  ;;  %v7798_v27 = vpop.f32.mrb[119].mxu1  ;;  %8767 = vmatmul.mubr.bf16.gmra.mrb[112].mxu0 %v8191_v36  ;;  %v8095_v46 = vmax.f32 %v10503_v2, 0.0 }
 0x65b   : > { %v10506_v62 = vadd.f32 %v7798_v27, %v15239_v61  ;;  %v8096_v0 = vmax.f32 %v10504_v10, 0.0 }
 0x65c   : > { %v8099_v33 = vmax.f32 %v10505_v63, 0.0 }
 0x65d   : > { %v8100_v56 = vmax.f32 %v10506_v62, 0.0 }
 0x65e   : > { %v8195_v9 = vpack.c.bf16 %v8099_v33, %v8095_v46 }
 0x65f   : > { %v8196_v19 = vpack.c.bf16 %v8100_v56, %v8096_v0  ;;  %v7802_v1 = vpop.f32.mrb[120].mxu1 }
 0x660   : > { %v10507_v50 = vadd.f32 %v7802_v1, %v15238_v22  ;;  %v7804_v45 = vpop.f32.mrb[121].mxu1 }
 0x661   : > { %v10508_v3 = vadd.f32 %v7804_v45, %v15239_v61  ;;  %v7806_v47 = vpop.f32.mrb[122].mxu1  ;;  %8774 = vmatprep.mubr.bf16.mxu0 %v8196_v19 }
 0x662   : > { %v10509_v15 = vadd.f32 %v7806_v47, %v15238_v22  ;;  %v7808_v34 = vpop.f32.mrb[123].mxu1  ;;  %8775 = vmatmul.mubr.bf16.gmra.mrb[116].mxu0 %v8195_v9  ;;  %v8103_v6 = vmax.f32 %v10507_v50, 0.0 }
 0x663   : > { %v10510_v42 = vadd.f32 %v7808_v34, %v15239_v61  ;;  %v8104_v32 = vmax.f32 %v10508_v3, 0.0 }
 0x664   : > { %v8107_v29 = vmax.f32 %v10509_v15, 0.0 }
 0x665   : > { %v8108_v49 = vmax.f32 %v10510_v42, 0.0 }
 0x666   : > { %v8199_v37 = vpack.c.bf16 %v8107_v29, %v8103_v6 }
 0x667   : > { %v8200_v30 = vpack.c.bf16 %v8108_v49, %v8104_v32  ;;  %v7812_v52 = vpop.f32.mrb[124].mxu1 }
 0x668   : > { %v10511_v18 = vadd.f32 %v7812_v52, %v15238_v22  ;;  %v7814_v39 = vpop.f32.mrb[125].mxu1 }
 0x669   : > { %v10512_v13 = vadd.f32 %v7814_v39, %v15239_v61  ;;  %v7816_v20 = vpop.f32.mrb[126].mxu1  ;;  %8782 = vmatprep.mubr.bf16.mxu0 %v8200_v30 }
 0x66a   : > { %v10513_v60 = vadd.f32 %v7816_v20, %v15238_v22  ;;  %v7818_v55 = vpop.f32.mrb[127].mxu1  ;;  %8783 = vmatmul.mubr.bf16.gmra.mrb[120].mxu0 %v8199_v37  ;;  %v8111_v7 = vmax.f32 %v10511_v18, 0.0 }
 0x66b   : > { %v10514_v43 = vadd.f32 %v7818_v55, %v15239_v61  ;;  %v8112_v35 = vmax.f32 %v10512_v13, 0.0 }
 0x66c   : > { %v8115_v40 = vmax.f32 %v10513_v60, 0.0 }
 0x66d   : > { %v8116_v12 = vmax.f32 %v10514_v43, 0.0 }
 0x66e   : > { %v8203_v58 = vpack.c.bf16 %v8115_v40, %v8111_v7  ;;  %v14417_v7 = vld [vmem:[%s15088_s4] ss:$0 sm:$0xff] }
 0x66f   : > { %v8204_v25 = vpack.c.bf16 %v8116_v12, %v8112_v35  ;;  %v7822_v51 = vpop.f32.mrb[128].mxu1 }
 0x670   : > { %v10515_v4 = vadd.f32 %v7822_v51, %v15238_v22  ;;  %v7824_v5 = vpop.f32.mrb[129].mxu1 }
 0x671   : > { %v10516_v14 = vadd.f32 %v7824_v5, %v15239_v61  ;;  %v7826_v11 = vpop.f32.mrb[130].mxu1  ;;  %8790 = vmatprep.mubr.bf16.mxu0 %v8204_v25 }
 0x672   : > { %v10517_v23 = vadd.f32 %v7826_v11, %v15238_v22  ;;  %v7828_v16 = vpop.f32.mrb[131].mxu1  ;;  %8791 = vmatmul.mubr.bf16.gmra.mrb[124].mxu0 %v8203_v58  ;;  %v8119_v41 = vmax.f32 %v10515_v4, 0.0 }
 0x673   : > { %v10518_v59 = vadd.f32 %v7828_v16, %v15239_v61  ;;  %v8120_v21 = vmax.f32 %v10516_v14, 0.0 }
 0x674   : > { %v8123_v28 = vmax.f32 %v10517_v23, 0.0 }
 0x675   : > { %v8124_v26 = vmax.f32 %v10518_v59, 0.0 }
 0x676   : > { %v8207_v48 = vpack.c.bf16 %v8123_v28, %v8119_v41 }
 0x677   : > { %v8208_v38 = vpack.c.bf16 %v8124_v26, %v8120_v21  ;;  %v7832_v8 = vpop.f32.mrb[132].mxu1 }
 0x678   : > { %v10519_v54 = vadd.f32 %v7832_v8, %v15238_v22  ;;  %v7834_v17 = vpop.f32.mrb[133].mxu1 }
 0x679   : > { %v10520_v53 = vadd.f32 %v7834_v17, %v15239_v61  ;;  %v7836_v36 = vpop.f32.mrb[134].mxu1  ;;  %8798 = vmatprep.mubr.bf16.mxu0 %v8208_v38 }
 0x67a   : > { %v10521_v24 = vadd.f32 %v7836_v36, %v15238_v22  ;;  %v7838_v44 = vpop.f32.mrb[135].mxu1  ;;  %8799 = vmatmul.mubr.bf16.gmra.mrb[128].mxu0 %v8207_v48  ;;  %v8127_v57 = vmax.f32 %v10519_v54, 0.0 }
 0x67b   : > { %v10522_v2 = vadd.f32 %v7838_v44, %v15239_v61  ;;  %v8128_v31 = vmax.f32 %v10520_v53, 0.0 }
 0x67c   : > { %v8131_v10 = vmax.f32 %v10521_v24, 0.0 }
 0x67d   : > { %v8132_v63 = vmax.f32 %v10522_v2, 0.0 }
 0x67e   : > { %v8211_v27 = vpack.c.bf16 %v8131_v10, %v8127_v57 }
 0x67f   : > { %v8212_v62 = vpack.c.bf16 %v8132_v63, %v8128_v31  ;;  %v7842_v46 = vpop.f32.mrb[136].mxu1 }
 0x680   : > { %v10523_v33 = vadd.f32 %v7842_v46, %v15238_v22  ;;  %v7844_v0 = vpop.f32.mrb[137].mxu1 }
 0x681   : > { %v10524_v56 = vadd.f32 %v7844_v0, %v15239_v61  ;;  %v7846_v9 = vpop.f32.mrb[138].mxu1  ;;  %8806 = vmatprep.mubr.bf16.mxu0 %v8212_v62 }
 0x682   : > { %v10525_v19 = vadd.f32 %v7846_v9, %v15238_v22  ;;  %v7848_v1 = vpop.f32.mrb[139].mxu1  ;;  %8807 = vmatmul.mubr.bf16.gmra.mrb[132].mxu0 %v8211_v27  ;;  %v8135_v45 = vmax.f32 %v10523_v33, 0.0 }
 0x683   : > { %v10526_v50 = vadd.f32 %v7848_v1, %v15239_v61  ;;  %v8136_v47 = vmax.f32 %v10524_v56, 0.0 }
 0x684   : > { %v8139_v3 = vmax.f32 %v10525_v19, 0.0 }
 0x685   : > { %v8140_v15 = vmax.f32 %v10526_v50, 0.0 }
 0x686   : > { %v8215_v34 = vpack.c.bf16 %v8139_v3, %v8135_v45 }
 0x687   : > { %v8216_v42 = vpack.c.bf16 %v8140_v15, %v8136_v47  ;;  %v7852_v6 = vpop.f32.mrb[140].mxu1 }
 0x688   : > { %v10527_v29 = vadd.f32 %v7852_v6, %v15238_v22  ;;  %v7854_v32 = vpop.f32.mrb[141].mxu1 }
 0x689   : > { %v10528_v49 = vadd.f32 %v7854_v32, %v15239_v61  ;;  %v7856_v37 = vpop.f32.mrb[142].mxu1  ;;  %8814 = vmatprep.mubr.bf16.mxu0 %v8216_v42 }
 0x68a   : > { %v10529_v30 = vadd.f32 %v7856_v37, %v15238_v22  ;;  %v7858_v52 = vpop.f32.mrb[143].mxu1  ;;  %8815 = vmatmul.mubr.bf16.gmra.mrb[136].mxu0 %v8215_v34  ;;  %v8143_v39 = vmax.f32 %v10527_v29, 0.0 }
 0x68b   : > { %v10530_v18 = vadd.f32 %v7858_v52, %v15239_v61  ;;  %v8144_v20 = vmax.f32 %v10528_v49, 0.0 }
 0x68c   : > { %v8147_v13 = vmax.f32 %v10529_v30, 0.0 }
 0x68d   : > { %v8148_v60 = vmax.f32 %v10530_v18, 0.0 }
 0x68e   : > { %v8219_v55 = vpack.c.bf16 %v8147_v13, %v8143_v39 }
 0x68f   : > { %v8220_v43 = vpack.c.bf16 %v8148_v60, %v8144_v20 }
 0x691   : > { %8822 = vmatprep.mubr.bf16.mxu0 %v8220_v43 }
 0x692   : > { %8823 = vmatmul.mubr.bf16.gmra.mrb[140].mxu0 %v8219_v55 }
 0x6dd   : > { %v8688_v40 = vpop.f32.mrb[72].mxu0 }
 0x6de   : > { %v14420_v22 = vadd.f32 %v14417_v7, %v8688_v40  ;;  %v8690_v35 = vpop.f32.mrb[73].mxu0 }
 0x6df   : > { %v8691_v12 = vpop.f32.mrb[74].mxu0 }
 0x6e0   : > { %v8693_v61 = vpop.f32.mrb[75].mxu0  ;;  %8867 = vrot.lane.b32.xlu0 %v14420_v22, %s12104_s21  ;;  %v14425_v58 = vadd.f32 %v14417_v7, %v8691_v12 }
 0x6e4   : > { %8869 = vrot.lane.b32.xlu0 %v14425_v58, %s12104_s21 }
 0x6e5   : > { %v8696_v25 = vpop.f32.mrb[76].mxu0 }
 0x6e6   : > { %v14430_v51 = vadd.f32 %v14417_v7, %v8696_v25  ;;  %v8698_v4 = vpop.f32.mrb[77].mxu0 }
 0x6e7   : > { %v8699_v5 = vpop.f32.mrb[78].mxu0 }
 0x6e8   : > { %v8701_v14 = vpop.f32.mrb[79].mxu0  ;;  %8871 = vrot.lane.b32.xlu1 %v14430_v51, %s12104_s21  ;;  %v14435_v11 = vadd.f32 %v14417_v7, %v8699_v5 }
 0x6ec   : > { %8873 = vrot.lane.b32.xlu1 %v14435_v11, %s12104_s21 }
 0x6ed   : > { %v8704_v23 = vpop.f32.mrb[80].mxu0 }
 0x6ee   : > { %v14440_v16 = vadd.f32 %v14417_v7, %v8704_v23  ;;  %v8706_v59 = vpop.f32.mrb[81].mxu0 }
 0x6ef   : > { %v8707_v41 = vpop.f32.mrb[82].mxu0 }
 0x6f0   : > { %15240 = vst [vmem:[#allocation4_spill] sm:$0xff] %v14440_v16  ;;  %v14443_v28 = vadd.f32 %v14417_v7, %v8707_v41  ;;  %v8709_v21 = vpop.f32.mrb[83].mxu0  ;;  %8875 = vrot.lane.b32.xlu0 %v14440_v16, %s12104_s21 }
 0x6f2   : > { %15241 = vst [vmem:[#allocation5_spill] sm:$0xff] %v14443_v28  ;;  %8877 = vrot.lane.b32.xlu1 %v14443_v28, %s12104_s21 }
 0x6f5   : > { %v8712_v26 = vpop.f32.mrb[84].mxu0 }
 0x6f6   : > { %v14450_v48 = vadd.f32 %v14417_v7, %v8712_v26  ;;  %v8714_v38 = vpop.f32.mrb[85].mxu0 }
 0x6f7   : > { %v8715_v8 = vpop.f32.mrb[86].mxu0 }
 0x6f8   : > { %15242 = vst [vmem:[#allocation6_spill] sm:$0xff] %v14450_v48  ;;  %v14453_v54 = vadd.f32 %v14417_v7, %v8715_v8  ;;  %v8717_v17 = vpop.f32.mrb[87].mxu0  ;;  %8879 = vrot.lane.b32.xlu0 %v14450_v48, %s12104_s21 }
 0x6fa   : > { %15243 = vst [vmem:[#allocation7_spill] sm:$0xff] %v14453_v54  ;;  %8881 = vrot.lane.b32.xlu1 %v14453_v54, %s12104_s21 }
 0x6fd   : > { %v8720_v53 = vpop.f32.mrb[88].mxu0 }
 0x6fe   : > { %v14460_v36 = vadd.f32 %v14417_v7, %v8720_v53  ;;  %v8722_v24 = vpop.f32.mrb[89].mxu0 }
 0x6ff   : > { %v8723_v44 = vpop.f32.mrb[90].mxu0 }
 0x700   : > { %15244 = vst [vmem:[#allocation8_spill] sm:$0xff] %v14460_v36  ;;  %v14463_v2 = vadd.f32 %v14417_v7, %v8723_v44  ;;  %v8725_v57 = vpop.f32.mrb[91].mxu0  ;;  %8883 = vrot.lane.b32.xlu0 %v14460_v36, %s12104_s21 }
 0x702   : > { %15245 = vst [vmem:[#allocation9_spill] sm:$0xff] %v14463_v2  ;;  %8885 = vrot.lane.b32.xlu1 %v14463_v2, %s12104_s21 }
 0x705   : > { %v8728_v10 = vpop.f32.mrb[92].mxu0 }
 0x706   : > { %v14470_v31 = vadd.f32 %v14417_v7, %v8728_v10  ;;  %v8730_v63 = vpop.f32.mrb[93].mxu0 }
 0x707   : > { %v8731_v27 = vpop.f32.mrb[94].mxu0 }
 0x708   : > { %v14473_v62 = vadd.f32 %v14417_v7, %v8731_v27  ;;  %v8733_v46 = vpop.f32.mrb[95].mxu0  ;;  %8887 = vrot.lane.b32.xlu0 %v14470_v31, %s12104_s21 }
 0x70a   : > { %8889 = vrot.lane.b32.xlu1 %v14473_v62, %s12104_s21 }
 0x70d   : > { %v8736_v33 = vpop.f32.mrb[96].mxu0 }
 0x70e   : > { %v14480_v0 = vadd.f32 %v14417_v7, %v8736_v33  ;;  %v8738_v56 = vpop.f32.mrb[97].mxu0 }
 0x70f   : > { %v8739_v9 = vpop.f32.mrb[98].mxu0 }
 0x710   : > { %v14483_v19 = vadd.f32 %v14417_v7, %v8739_v9  ;;  %v8741_v1 = vpop.f32.mrb[99].mxu0  ;;  %8891 = vrot.lane.b32.xlu0 %v14480_v0, %s12104_s21 }
 0x712   : > { %8893 = vrot.lane.b32.xlu1 %v14483_v19, %s12104_s21 }
 0x715   : > { %v8744_v50 = vpop.f32.mrb[100].mxu0 }
 0x716   : > { %v14490_v45 = vadd.f32 %v14417_v7, %v8744_v50  ;;  %v8746_v3 = vpop.f32.mrb[101].mxu0 }
 0x717   : > { %v8747_v47 = vpop.f32.mrb[102].mxu0 }
 0x718   : > { %v14493_v15 = vadd.f32 %v14417_v7, %v8747_v47  ;;  %v8749_v34 = vpop.f32.mrb[103].mxu0  ;;  %8895 = vrot.lane.b32.xlu0 %v14490_v45, %s12104_s21 }
 0x71a   : > { %8897 = vrot.lane.b32.xlu1 %v14493_v15, %s12104_s21 }
 0x71d   : > { %v8752_v42 = vpop.f32.mrb[104].mxu0 }
 0x71e   : > { %v14500_v6 = vadd.f32 %v14417_v7, %v8752_v42  ;;  %v8754_v29 = vpop.f32.mrb[105].mxu0 }
 0x71f   : > { %v8755_v32 = vpop.f32.mrb[106].mxu0 }
 0x720   : > { %v14503_v49 = vadd.f32 %v14417_v7, %v8755_v32  ;;  %v8757_v37 = vpop.f32.mrb[107].mxu0  ;;  %8899 = vrot.lane.b32.xlu0 %v14500_v6, %s12104_s21 }
 0x722   : > { %8901 = vrot.lane.b32.xlu1 %v14503_v49, %s12104_s21 }
 0x725   : > { %v8760_v30 = vpop.f32.mrb[108].mxu0 }
 0x726   : > { %v14510_v52 = vadd.f32 %v14417_v7, %v8760_v30  ;;  %v8762_v18 = vpop.f32.mrb[109].mxu0 }
 0x727   : > { %v8763_v39 = vpop.f32.mrb[110].mxu0 }
 0x728   : > { %v14513_v13 = vadd.f32 %v14417_v7, %v8763_v39  ;;  %v8765_v20 = vpop.f32.mrb[111].mxu0  ;;  %8903 = vrot.lane.b32.xlu0 %v14510_v52, %s12104_s21 }
 0x72a   : > { %8905 = vrot.lane.b32.xlu1 %v14513_v13, %s12104_s21 }
 0x72d   : > { %v8768_v60 = vpop.f32.mrb[112].mxu0 }
 0x72e   : > { %v14520_v55 = vadd.f32 %v14417_v7, %v8768_v60  ;;  %v8770_v43 = vpop.f32.mrb[113].mxu0 }
 0x72f   : > { %v8771_v40 = vpop.f32.mrb[114].mxu0 }
 0x730   : > { %v14523_v35 = vadd.f32 %v14417_v7, %v8771_v40  ;;  %v8773_v12 = vpop.f32.mrb[115].mxu0  ;;  %8907 = vrot.lane.b32.xlu0 %v14520_v55, %s12104_s21 }
 0x732   : > { %8909 = vrot.lane.b32.xlu1 %v14523_v35, %s12104_s21 }
 0x735   : > { %v8776_v61 = vpop.f32.mrb[116].mxu0 }
 0x736   : > { %v14530_v25 = vadd.f32 %v14417_v7, %v8776_v61  ;;  %v8778_v4 = vpop.f32.mrb[117].mxu0 }
 0x737   : > { %v8779_v5 = vpop.f32.mrb[118].mxu0 }
 0x738   : > { %v14533_v14 = vadd.f32 %v14417_v7, %v8779_v5  ;;  %v8781_v23 = vpop.f32.mrb[119].mxu0  ;;  %8911 = vrot.lane.b32.xlu0 %v14530_v25, %s12104_s21 }
 0x73a   : > { %8913 = vrot.lane.b32.xlu1 %v14533_v14, %s12104_s21 }
 0x73d   : > { %v8784_v59 = vpop.f32.mrb[120].mxu0 }
 0x73e   : > { %v14540_v41 = vadd.f32 %v14417_v7, %v8784_v59  ;;  %v8786_v21 = vpop.f32.mrb[121].mxu0 }
 0x73f   : > { %v8787_v26 = vpop.f32.mrb[122].mxu0 }
 0x740   : > { %v14543_v38 = vadd.f32 %v14417_v7, %v8787_v26  ;;  %v8789_v8 = vpop.f32.mrb[123].mxu0  ;;  %8915 = vrot.lane.b32.xlu0 %v14540_v41, %s12104_s21 }
 0x742   : > { %8917 = vrot.lane.b32.xlu1 %v14543_v38, %s12104_s21 }
 0x745   : > { %v8792_v17 = vpop.f32.mrb[124].mxu0 }
 0x746   : > { %v14550_v53 = vadd.f32 %v14417_v7, %v8792_v17  ;;  %v8794_v24 = vpop.f32.mrb[125].mxu0 }
 0x747   : > { %v8795_v44 = vpop.f32.mrb[126].mxu0 }
 0x748   : > { %v14553_v57 = vadd.f32 %v14417_v7, %v8795_v44  ;;  %v8797_v10 = vpop.f32.mrb[127].mxu0  ;;  %8919 = vrot.lane.b32.xlu0 %v14550_v53, %s12104_s21 }
 0x74a   : > { %8921 = vrot.lane.b32.xlu1 %v14553_v57, %s12104_s21 }
 0x74d   : > { %v8800_v63 = vpop.f32.mrb[128].mxu0 }
 0x74e   : > { %v14560_v27 = vadd.f32 %v14417_v7, %v8800_v63  ;;  %v8802_v46 = vpop.f32.mrb[129].mxu0 }
 0x74f   : > { %v8803_v33 = vpop.f32.mrb[130].mxu0 }
 0x750   : > { %v14563_v56 = vadd.f32 %v14417_v7, %v8803_v33  ;;  %v8805_v9 = vpop.f32.mrb[131].mxu0  ;;  %8923 = vrot.lane.b32.xlu0 %v14560_v27, %s12104_s21 }
 0x752   : > { %8925 = vrot.lane.b32.xlu1 %v14563_v56, %s12104_s21  ;;  %v8868_v1 = vpop.permute.xlu0 %8867 }
 0x753   : > { %v14570_v50 = vsub.f32 %v14420_v22, %v8868_v1 }
 0x755   : > { %v9011_v3 = vand.u32 2147483647, %v14570_v50  ;;  %v8808_v47 = vpop.f32.mrb[132].mxu0  ;;  %vm9335_vm8 = vcmp.ge.f32.partialorder %v14570_v50, 0.0 }
 0x756   : > { %v14574_v34 = vadd.f32 %v14417_v7, %v8808_v47  ;;  %v8810_v42 = vpop.f32.mrb[133].mxu0  ;;  %v8870_v29 = vpop.permute.xlu0 %8869 }
 0x757   : > { %v9047_v32 = vsub.f32 0.0, %v9011_v3  ;;  %v14577_v37 = vsub.f32 %v14425_v58, %v8870_v29  ;;  %v8811_v30 = vpop.f32.mrb[134].mxu0 }
 0x758   : > { %v14580_v18 = vadd.f32 %v14417_v7, %v8811_v30  ;;  %v8813_v39 = vpop.f32.mrb[135].mxu0  ;;  %8927 = vrot.lane.b32.xlu0 %v14574_v34, %s12104_s21 }
 0x759   : > { %v9083_v20 = vmul.f32 1.442695, %v9047_v32  ;;  %v9012_v60 = vand.u32 2147483647, %v14577_v37  ;;  %vm9336_vm9 = vcmp.ge.f32.partialorder %v14577_v37, 0.0 }
 0x75a   : > { %8929 = vrot.lane.b32.xlu1 %v14580_v18, %s12104_s21  ;;  %v8872_v43 = vpop.permute.xlu1 %8871 }
 0x75b   : > { %11944 = vpow2.f32 %v9083_v20  ;;  %v9048_v40 = vsub.f32 0.0, %v9012_v60  ;;  %v14588_v12 = vsub.f32 %v14430_v51, %v8872_v43 }
 0x75d   : > { %v9085_v61 = vmul.f32 1.442695, %v9048_v40  ;;  %v9013_v4 = vand.u32 2147483647, %v14588_v12  ;;  %v8816_v5 = vpop.f32.mrb[136].mxu0  ;;  %vm9337_vm10 = vcmp.ge.f32.partialorder %v14588_v12, 0.0 }
 0x75e   : > { %v14592_v23 = vadd.f32 %v14417_v7, %v8816_v5  ;;  %v8818_v59 = vpop.f32.mrb[137].mxu0  ;;  %v8874_v21 = vpop.permute.xlu1 %8873 }
 0x75f   : > { %11946 = vpow2.f32 %v9085_v61  ;;  %v9049_v26 = vsub.f32 0.0, %v9013_v4  ;;  %v14595_v8 = vsub.f32 %v14435_v11, %v8874_v21  ;;  %v8819_v17 = vpop.f32.mrb[138].mxu0 }
 0x760   : > { %v14598_v24 = vadd.f32 %v14417_v7, %v8819_v17  ;;  %v8821_v44 = vpop.f32.mrb[139].mxu0  ;;  %8931 = vrot.lane.b32.xlu0 %v14592_v23, %s12104_s21 }
 0x761   : > { %v9087_v10 = vmul.f32 1.442695, %v9049_v26  ;;  %v9014_v63 = vand.u32 2147483647, %v14595_v8  ;;  %vm9338_vm11 = vcmp.ge.f32.partialorder %v14595_v8, 0.0 }
 0x762   : > { %8933 = vrot.lane.b32.xlu1 %v14598_v24, %s12104_s21  ;;  %v8876_v46 = vpop.permute.xlu0 %8875 }
 0x763   : > { %11948 = vpow2.f32 %v9087_v10  ;;  %v9050_v33 = vsub.f32 0.0, %v9014_v63  ;;  %v14606_v9 = vsub.f32 %v14440_v16, %v8876_v46 }
 0x764   : > { %v8878_v1 = vpop.permute.xlu1 %8877 }
 0x765   : > { %v11945_v3 = vpop.eup %11944  ;;  %v9089_v47 = vmul.f32 1.442695, %v9050_v33  ;;  %v9015_v42 = vand.u32 2147483647, %v14606_v9  ;;  %v14610_v29 = vsub.f32 %v14443_v28, %v8878_v1  ;;  %v8824_v32 = vpop.f32.mrb[140].mxu0  ;;  %vm9339_vm12 = vcmp.ge.f32.partialorder %v14606_v9, 0.0 }
 0x766   : > { %v9155_v30 = vadd.f32 1.0, %v11945_v3  ;;  %v14613_v39 = vadd.f32 %v14417_v7, %v8824_v32  ;;  %v8826_v20 = vpop.f32.mrb[141].mxu0 }
 0x767   : > { %11950 = vpow2.f32 %v9089_v47  ;;  %v9051_v60 = vsub.f32 0.0, %v9015_v42  ;;  %v9016_v43 = vand.u32 2147483647, %v14610_v29  ;;  %v8827_v40 = vpop.f32.mrb[142].mxu0  ;;  %vm9340_vm13 = vcmp.ge.f32.partialorder %v14610_v29, 0.0 }
 0x768   : > { %15246 = vst [vmem:[#allocation10_spill] sm:$0xff] %v14613_v39  ;;  %11952 = vrcp.f32 %v9155_v30  ;;  %v14617_v61 = vadd.f32 %v14417_v7, %v8827_v40  ;;  %v8829_v4 = vpop.f32.mrb[143].mxu0  ;;  %8935 = vrot.lane.b32.xlu0 %v14613_v39, %s12104_s21 }
 0x769   : > { %v11947_v5 = vpop.eup %11946  ;;  %v9091_v59 = vmul.f32 1.442695, %v9051_v60  ;;  %v9052_v21 = vsub.f32 0.0, %v9016_v43 }
 0x76a   : > { %15247 = vst [vmem:[#allocation11_spill] sm:$0xff] %v14617_v61  ;;  %v9156_v26 = vadd.f32 1.0, %v11947_v5  ;;  %8937 = vrot.lane.b32.xlu1 %v14617_v61, %s12104_s21  ;;  %v8880_v17 = vpop.permute.xlu0 %8879 }
 0x76b   : > { %11954 = vpow2.f32 %v9091_v59  ;;  %v9093_v44 = vmul.f32 1.442695, %v9052_v21  ;;  %v14624_v10 = vsub.f32 %v14450_v48, %v8880_v17 }
 0x76c   : > { %11956 = vrcp.f32 %v9156_v26  ;;  %v8882_v7 = vpop.permute.xlu1 %8881 }
 0x76d   : > { %v11949_v63 = vpop.eup %11948  ;;  %11958 = vpow2.f32 %v9093_v44  ;;  %v9017_v46 = vand.u32 2147483647, %v14624_v10  ;;  %v14628_v33 = vsub.f32 %v14453_v54, %v8882_v7  ;;  %vm9341_vm14 = vcmp.ge.f32.partialorder %v14624_v10, 0.0 }
 0x76e   : > { %v9157_v1 = vadd.f32 1.0, %v11949_v63 }
 0x76f   : > { %v9053_v3 = vsub.f32 0.0, %v9017_v46  ;;  %v9018_v47 = vand.u32 2147483647, %v14628_v33  ;;  %vm9342_vm15 = vcmp.ge.f32.partialorder %v14628_v33, 0.0 }
 0x770   : > { %11960 = vrcp.f32 %v9157_v1 }
 0x771   : > { %v11951_v42 = vpop.eup %11950  ;;  %v9095_v32 = vmul.f32 1.442695, %v9053_v3  ;;  %v9054_v20 = vsub.f32 0.0, %v9018_v47 }
 0x772   : > { %v11953_v60 = vpop.eup %11952  ;;  %v9158_v43 = vadd.f32 1.0, %v11951_v42  ;;  %v8884_v40 = vpop.permute.xlu0 %8883 }
 0x773   : > { %11962 = vpow2.f32 %v9095_v32  ;;  %v9097_v4 = vmul.f32 1.442695, %v9054_v20  ;;  %v14632_v5 = vsub.f32 %v14460_v36, %v8884_v40  ;;  %v9227_v59 = vmul.f32 %v11953_v60, %v9155_v30 }
 0x774   : > { %11964 = vrcp.f32 %v9158_v43  ;;  %v8886_v21 = vpop.permute.xlu1 %8885 }
 0x775   : > { %v11955_v17 = vpop.eup %11954  ;;  %11966 = vpow2.f32 %v9097_v4  ;;  %v9019_v44 = vand.u32 2147483647, %v14632_v5  ;;  %v14636_v7 = vsub.f32 %v14463_v2, %v8886_v21  ;;  %v9263_v3 = vsub.f32 2.0, %v9227_v59 }
 0x776   : > { %v11957_v63 = vpop.eup %11956  ;;  %v9159_v46 = vadd.f32 1.0, %v11955_v17  ;;  %vm9343_vm0 = vcmp.ge.f32.partialorder %v14632_v5, 0.0 }
 0x777   : > { %v11959_v47 = vpop.eup %11958  ;;  %v9055_v42 = vsub.f32 0.0, %v9019_v44  ;;  %v9020_v32 = vand.u32 2147483647, %v14636_v7  ;;  %v9228_v20 = vmul.f32 %v11957_v63, %v9156_v26  ;;  %v9299_v30 = vmul.f32 %v11953_v60, %v9263_v3 }
 0x778   : > { %11968 = vrcp.f32 %v9159_v46  ;;  %v9160_v40 = vadd.f32 1.0, %v11959_v47  ;;  %vm9344_vm1 = vcmp.ge.f32.partialorder %v14636_v7, 0.0 }
 0x779   : > { %v9099_v36 = vmul.f32 1.442695, %v9055_v42  ;;  %v9056_v54 = vsub.f32 0.0, %v9020_v32  ;;  %v9264_v48 = vsub.f32 2.0, %v9228_v20  ;;  %v9371_v2 = vsub.f32 1.0, %v9299_v30 }
 0x77a   : > { %v11961_v4 = vpop.eup %11960  ;;  %11970 = vrcp.f32 %v9160_v40  ;;  %v8888_v21 = vpop.permute.xlu0 %8887 }
 0x77b   : > { %11972 = vpow2.f32 %v9099_v36  ;;  %v9101_v17 = vmul.f32 1.442695, %v9056_v54  ;;  %v14641_v59 = vsub.f32 %v14470_v31, %v8888_v21  ;;  %v9300_v44 = vmul.f32 %v11957_v63, %v9264_v48 }
 0x77c   : > { %v8890_v28 = vpop.permute.xlu1 %8889  ;;  %v9407_v26 = vsel %vm9335_vm8, %v9299_v30, %v9371_v2  ;;  %v9229_v16 = vmul.f32 %v11961_v4, %v9157_v1 }
 0x77d   : > { %v11963_v47 = vpop.eup %11962  ;;  %11974 = vpow2.f32 %v9101_v17  ;;  %v9021_v60 = vand.u32 2147483647, %v14641_v59  ;;  %v14645_v3 = vsub.f32 %v14473_v62, %v8890_v28  ;;  %9479 = vrot.lane.b32.xlu0 %v9407_v26, %s12105_s22  ;;  %v9372_v54 = vsub.f32 1.0, %v9300_v44 }
 0x77e   : > { %v11965_v50 = vpop.eup %11964  ;;  %v14648_v36 = vadd.f32 1.0, %v11963_v47  ;;  %v9265_v42 = vsub.f32 2.0, %v9229_v16  ;;  %vm9345_vm2 = vcmp.ge.f32.partialorder %v14641_v59, 0.0 }
 0x77f   : > { %v11967_v32 = vpop.eup %11966  ;;  %v9057_v48 = vsub.f32 0.0, %v9021_v60  ;;  %v9022_v2 = vand.u32 2147483647, %v14645_v3  ;;  %v9230_v1 = vmul.f32 %v11965_v50, %v9158_v43  ;;  %v9408_v28 = vsel %vm9336_vm9, %v9300_v44, %v9372_v54 }
 0x780   : > { %11976 = vrcp.f32 %v14648_v36  ;;  %v9162_v63 = vadd.f32 1.0, %v11967_v32  ;;  %v9301_v20 = vmul.f32 %v11961_v4, %v9265_v42  ;;  %9481 = vrot.lane.b32.xlu1 %v9408_v28, %s12105_s22  ;;  %vm9346_vm3 = vcmp.ge.f32.partialorder %v14645_v3, 0.0 }
 0x781   : > { %v9103_v30 = vmul.f32 1.442695, %v9057_v48  ;;  %v9058_v21 = vsub.f32 0.0, %v9022_v2  ;;  %v9266_v17 = vsub.f32 2.0, %v9230_v1 }
 0x782   : > { %v11969_v26 = vpop.eup %11968  ;;  %11978 = vrcp.f32 %v9162_v63  ;;  %v8892_v16 = vpop.permute.xlu0 %8891  ;;  %v9373_v37 = vsub.f32 1.0, %v9301_v20 }
 0x783   : > { %11980 = vpow2.f32 %v9103_v30  ;;  %v9105_v47 = vmul.f32 1.442695, %v9058_v21  ;;  %v14656_v43 = vsub.f32 %v14480_v0, %v8892_v16  ;;  %v9302_v60 = vmul.f32 %v11965_v50, %v9266_v17 }
 0x784   : > { %v11971_v32 = vpop.eup %11970  ;;  %v8894_v44 = vpop.permute.xlu1 %8893  ;;  %v9409_v4 = vsel %vm9337_vm10, %v9301_v20, %v9373_v37  ;;  %v9231_v54 = vmul.f32 %v11969_v26, %v9159_v46 }
 0x785   : > { %v11973_v42 = vpop.eup %11972  ;;  %11982 = vpow2.f32 %v9105_v47  ;;  %v9023_v48 = vand.u32 2147483647, %v14656_v43  ;;  %v14660_v2 = vsub.f32 %v14483_v19, %v8894_v44  ;;  %9483 = vrot.lane.b32.xlu0 %v9409_v4, %s12105_s22  ;;  %v9374_v1 = vsub.f32 1.0, %v9302_v60 }
 0x786   : > { %v14663_v12 = vadd.f32 1.0, %v11973_v42  ;;  %v9267_v28 = vsub.f32 2.0, %v9231_v54  ;;  %v9232_v30 = vmul.f32 %v11971_v32, %v9160_v40  ;;  %vm9347_vm4 = vcmp.ge.f32.partialorder %v14656_v43, 0.0 }
 0x787   : > { %v11975_v21 = vpop.eup %11974  ;;  %v9059_v50 = vsub.f32 0.0, %v9023_v48  ;;  %v9024_v46 = vand.u32 2147483647, %v14660_v2  ;;  %v9410_v17 = vsel %vm9338_vm11, %v9302_v60, %v9374_v1  ;;  %vm9348_vm5 = vcmp.ge.f32.partialorder %v14660_v2, 0.0 }
 0x788   : > { %11984 = vrcp.f32 %v14663_v12  ;;  %v9164_v20 = vadd.f32 1.0, %v11975_v21  ;;  %v9303_v16 = vmul.f32 %v11969_v26, %v9267_v28  ;;  %9485 = vrot.lane.b32.xlu1 %v9410_v17, %s12105_s22  ;;  %v9268_v44 = vsub.f32 2.0, %v9232_v30 }
 0x789   : > { %v9107_v37 = vmul.f32 1.442695, %v9059_v50  ;;  %v9060_v47 = vsub.f32 0.0, %v9024_v46 }
 0x78a   : > { %v11977_v4 = vpop.eup %11976  ;;  %11986 = vrcp.f32 %v9164_v20  ;;  %v8896_v40 = vpop.permute.xlu0 %8895  ;;  %v9375_v54 = vsub.f32 1.0, %v9303_v16  ;;  %v9304_v48 = vmul.f32 %v11971_v32, %v9268_v44 }
 0x78b   : > { %11988 = vpow2.f32 %v9107_v37  ;;  %v9109_v8 = vmul.f32 1.442695, %v9060_v47  ;;  %v14671_v42 = vsub.f32 %v14490_v45, %v8896_v40  ;;  %v9233_v1 = vmul.f32 %v11977_v4, %v14648_v36 }
 0x78c   : > { %v11979_v21 = vpop.eup %11978  ;;  %v8898_v60 = vpop.permute.xlu1 %8897  ;;  %v9411_v26 = vsel %vm9339_vm12, %v9303_v16, %v9375_v54  ;;  %v9376_v46 = vsub.f32 1.0, %v9304_v48 }
 0x78d   : > { %v11981_v28 = vpop.eup %11980  ;;  %11990 = vpow2.f32 %v9109_v8  ;;  %v9025_v30 = vand.u32 2147483647, %v14671_v42  ;;  %v14676_v9 = vsub.f32 %v14493_v15, %v8898_v60  ;;  %9487 = vrot.lane.b32.xlu0 %v9411_v26, %s12105_s22  ;;  %v9269_v17 = vsub.f32 2.0, %v9233_v1 }
 0x78e   : > { %v14679_v50 = vadd.f32 1.0, %v11981_v28  ;;  %v9234_v37 = vmul.f32 %v11979_v21, %v9162_v63  ;;  %v9412_v44 = vsel %vm9340_vm13, %v9304_v48, %v9376_v46  ;;  %vm9349_vm6 = vcmp.ge.f32.partialorder %v14671_v42, 0.0 }
 0x78f   : > { %v11983_v32 = vpop.eup %11982  ;;  %v9061_v16 = vsub.f32 0.0, %v9025_v30  ;;  %v9026_v36 = vand.u32 2147483647, %v14676_v9  ;;  %v9305_v40 = vmul.f32 %v11977_v4, %v9269_v17  ;;  %9489 = vrot.lane.b32.xlu1 %v9412_v44, %s12105_s22  ;;  %vm9350_vm7 = vcmp.ge.f32.partialorder %v14676_v9, 0.0 }
 0x790   : > { %11992 = vrcp.f32 %v14679_v50  ;;  %v9166_v47 = vadd.f32 1.0, %v11983_v32  ;;  %v9270_v60 = vsub.f32 2.0, %v9234_v37 }
 0x791   : > { %v9111_v54 = vmul.f32 1.442695, %v9061_v16  ;;  %v9062_v8 = vsub.f32 0.0, %v9026_v36  ;;  %v9377_v1 = vsub.f32 1.0, %v9305_v40 }
 0x792   : > { %v11985_v26 = vpop.eup %11984  ;;  %11994 = vrcp.f32 %v9166_v47  ;;  %v8900_v63 = vpop.permute.xlu0 %8899  ;;  %v9306_v30 = vmul.f32 %v11979_v21, %v9270_v60 }
 0x793   : > { %11996 = vpow2.f32 %v9111_v54  ;;  %v9113_v29 = vmul.f32 1.442695, %v9062_v8  ;;  %v14687_v28 = vsub.f32 %v14500_v6, %v8900_v63  ;;  %v9413_v4 = vsel %vm9341_vm14, %v9305_v40, %v9377_v1 }
 0x794   : > { %v11987_v32 = vpop.eup %11986  ;;  %v8902_v48 = vpop.permute.xlu1 %8901  ;;  %v9235_v46 = vmul.f32 %v11985_v26, %v14663_v12  ;;  %9491 = vrot.lane.b32.xlu0 %v9413_v4, %s12105_s22  ;;  %v9378_v36 = vsub.f32 1.0, %v9306_v30 }
 0x795   : > { %v11989_v17 = vpop.eup %11988  ;;  %11998 = vpow2.f32 %v9113_v29  ;;  %v9027_v37 = vand.u32 2147483647, %v14687_v28  ;;  %v14692_v10 = vsub.f32 %v14503_v49, %v8902_v48  ;;  %v9236_v54 = vmul.f32 %v11987_v32, %v9164_v20 }
 0x796   : > { %v14695_v16 = vadd.f32 1.0, %v11989_v17  ;;  %v9271_v44 = vsub.f32 2.0, %v9235_v46  ;;  %v9414_v60 = vsel %vm9342_vm15, %v9306_v30, %v9378_v36  ;;  %vm9351_vm8 = vcmp.ge.f32.partialorder %v14687_v28, 0.0 }
 0x797   : > { %v11991_v21 = vpop.eup %11990  ;;  %v9063_v40 = vsub.f32 0.0, %v9027_v37  ;;  %v9028_v12 = vand.u32 2147483647, %v14692_v10  ;;  %9493 = vrot.lane.b32.xlu1 %v9414_v60, %s12105_s22  ;;  %v9272_v48 = vsub.f32 2.0, %v9236_v54  ;;  %vm9352_vm9 = vcmp.ge.f32.partialorder %v14692_v10, 0.0 }
 0x798   : > { %12000 = vrcp.f32 %v14695_v16  ;;  %v9168_v8 = vadd.f32 1.0, %v11991_v21  ;;  %v9307_v63 = vmul.f32 %v11985_v26, %v9271_v44 }
 0x799   : > { %v9115_v1 = vmul.f32 1.442695, %v9063_v40  ;;  %v9064_v29 = vsub.f32 0.0, %v9028_v12  ;;  %v9308_v37 = vmul.f32 %v11987_v32, %v9272_v48 }
 0x79a   : > { %v11993_v4 = vpop.eup %11992  ;;  %12002 = vrcp.f32 %v9168_v8  ;;  %v8904_v20 = vpop.permute.xlu0 %8903  ;;  %v9379_v46 = vsub.f32 1.0, %v9307_v63 }
 0x79b   : > { %12004 = vpow2.f32 %v9115_v1  ;;  %v9117_v33 = vmul.f32 1.442695, %v9064_v29  ;;  %v14703_v17 = vsub.f32 %v14510_v52, %v8904_v20  ;;  %v9237_v36 = vmul.f32 %v11993_v4, %v14679_v50 }
 0x79c   : > { %v11995_v21 = vpop.eup %11994  ;;  %v8906_v30 = vpop.permute.xlu1 %8905  ;;  %v9415_v26 = vsel %vm9343_vm0, %v9307_v63, %v9379_v46  ;;  %v9380_v12 = vsub.f32 1.0, %v9308_v37 }
 0x79d   : > { %v11997_v44 = vpop.eup %11996  ;;  %12006 = vpow2.f32 %v9117_v33  ;;  %v9029_v54 = vand.u32 2147483647, %v14703_v17  ;;  %v14708_v5 = vsub.f32 %v14513_v13, %v8906_v30  ;;  %9495 = vrot.lane.b32.xlu0 %v9415_v26, %s12105_s22  ;;  %v9273_v60 = vsub.f32 2.0, %v9237_v36 }
 0x79e   : > { %v14711_v40 = vadd.f32 1.0, %v11997_v44  ;;  %v9238_v1 = vmul.f32 %v11995_v21, %v9166_v47  ;;  %v9416_v48 = vsel %vm9344_vm1, %v9308_v37, %v9380_v12  ;;  %vm9353_vm10 = vcmp.ge.f32.partialorder %v14703_v17, 0.0 }
 0x79f   : > { %v11999_v32 = vpop.eup %11998  ;;  %v9065_v63 = vsub.f32 0.0, %v9029_v54  ;;  %v9030_v50 = vand.u32 2147483647, %v14708_v5  ;;  %v9309_v20 = vmul.f32 %v11993_v4, %v9273_v60  ;;  %9497 = vrot.lane.b32.xlu1 %v9416_v48, %s12105_s22  ;;  %vm9354_vm11 = vcmp.ge.f32.partialorder %v14708_v5, 0.0 }
 0x7a0   : > { %12008 = vrcp.f32 %v14711_v40  ;;  %v9170_v29 = vadd.f32 1.0, %v11999_v32  ;;  %v9274_v30 = vsub.f32 2.0, %v9238_v1 }
 0x7a1   : > { %v9119_v46 = vmul.f32 1.442695, %v9065_v63  ;;  %v9066_v33 = vsub.f32 0.0, %v9030_v50  ;;  %v9381_v36 = vsub.f32 1.0, %v9309_v20 }
 0x7a2   : > { %v12001_v26 = vpop.eup %12000  ;;  %12010 = vrcp.f32 %v9170_v29  ;;  %v8908_v47 = vpop.permute.xlu0 %8907  ;;  %v9310_v54 = vmul.f32 %v11995_v21, %v9274_v30 }
 0x7a3   : > { %12012 = vpow2.f32 %v9119_v46  ;;  %v9121_v7 = vmul.f32 1.442695, %v9066_v33  ;;  %v14719_v44 = vsub.f32 %v14520_v55, %v8908_v47  ;;  %v9417_v4 = vsel %vm9345_vm2, %v9309_v20, %v9381_v36 }
 0x7a4   : > { %v12003_v32 = vpop.eup %12002  ;;  %v8910_v37 = vpop.permute.xlu1 %8909  ;;  %v9239_v12 = vmul.f32 %v12001_v26, %v14695_v16  ;;  %9499 = vrot.lane.b32.xlu0 %v9417_v4, %s12105_s22  ;;  %v9382_v50 = vsub.f32 1.0, %v9310_v54 }
 0x7a5   : > { %v12005_v60 = vpop.eup %12004  ;;  %12014 = vpow2.f32 %v9121_v7  ;;  %v9031_v1 = vand.u32 2147483647, %v14719_v44  ;;  %v14724_v59 = vsub.f32 %v14523_v35, %v8910_v37  ;;  %v9240_v46 = vmul.f32 %v12003_v32, %v9168_v8 }
 0x7a6   : > { %v14727_v63 = vadd.f32 1.0, %v12005_v60  ;;  %v9275_v48 = vsub.f32 2.0, %v9239_v12  ;;  %v9418_v30 = vsel %vm9346_vm3, %v9310_v54, %v9382_v50  ;;  %vm9355_vm12 = vcmp.ge.f32.partialorder %v14719_v44, 0.0 }
 0x7a7   : > { %v12007_v21 = vpop.eup %12006  ;;  %v9067_v20 = vsub.f32 0.0, %v9031_v1  ;;  %v9032_v16 = vand.u32 2147483647, %v14724_v59  ;;  %9501 = vrot.lane.b32.xlu1 %v9418_v30, %s12105_s22  ;;  %v9276_v37 = vsub.f32 2.0, %v9240_v46  ;;  %vm9356_vm13 = vcmp.ge.f32.partialorder %v14724_v59, 0.0 }
 0x7a8   : > { %12016 = vrcp.f32 %v14727_v63  ;;  %v9172_v33 = vadd.f32 1.0, %v12007_v21  ;;  %v9311_v47 = vmul.f32 %v12001_v26, %v9275_v48 }
 0x7a9   : > { %v9123_v36 = vmul.f32 1.442695, %v9067_v20  ;;  %v9068_v7 = vsub.f32 0.0, %v9032_v16  ;;  %v9312_v1 = vmul.f32 %v12003_v32, %v9276_v37 }
 0x7aa   : > { %v12009_v4 = vpop.eup %12008  ;;  %12018 = vrcp.f32 %v9172_v33  ;;  %v8912_v8 = vpop.permute.xlu0 %8911  ;;  %v9383_v12 = vsub.f32 1.0, %v9311_v47 }
 0x7ab   : > { %12020 = vpow2.f32 %v9123_v36  ;;  %v9125_v3 = vmul.f32 1.442695, %v9068_v7  ;;  %v14735_v60 = vsub.f32 %v14530_v25, %v8912_v8  ;;  %v9241_v50 = vmul.f32 %v12009_v4, %v14711_v40 }
 0x7ac   : > { %v12011_v21 = vpop.eup %12010  ;;  %v8914_v54 = vpop.permute.xlu1 %8913  ;;  %v9419_v26 = vsel %vm9347_vm4, %v9311_v47, %v9383_v12  ;;  %v9384_v16 = vsub.f32 1.0, %v9312_v1 }
 0x7ad   : > { %v12013_v48 = vpop.eup %12012  ;;  %12022 = vpow2.f32 %v9125_v3  ;;  %v9033_v46 = vand.u32 2147483647, %v14735_v60  ;;  %v14740_v43 = vsub.f32 %v14533_v14, %v8914_v54  ;;  %9503 = vrot.lane.b32.xlu0 %v9419_v26, %s12105_s22  ;;  %v9277_v30 = vsub.f32 2.0, %v9241_v50 }
 0x7ae   : > { %v14743_v20 = vadd.f32 1.0, %v12013_v48  ;;  %v9242_v36 = vmul.f32 %v12011_v21, %v9170_v29  ;;  %v9420_v37 = vsel %vm9348_vm5, %v9312_v1, %v9384_v16  ;;  %vm9357_vm14 = vcmp.ge.f32.partialorder %v14735_v60, 0.0 }
 0x7af   : > { %v12015_v32 = vpop.eup %12014  ;;  %v9069_v47 = vsub.f32 0.0, %v9033_v46  ;;  %v9034_v40 = vand.u32 2147483647, %v14740_v43  ;;  %v9313_v8 = vmul.f32 %v12009_v4, %v9277_v30  ;;  %9505 = vrot.lane.b32.xlu1 %v9420_v37, %s12105_s22  ;;  %vm9358_vm15 = vcmp.ge.f32.partialorder %v14740_v43, 0.0 }
 0x7b0   : > { %12024 = vrcp.f32 %v14743_v20  ;;  %v9174_v7 = vadd.f32 1.0, %v12015_v32  ;;  %v9278_v54 = vsub.f32 2.0, %v9242_v36 }
 0x7b1   : > { %v9127_v12 = vmul.f32 1.442695, %v9069_v47  ;;  %v9070_v3 = vsub.f32 0.0, %v9034_v40  ;;  %v9385_v50 = vsub.f32 1.0, %v9313_v8 }
 0x7b2   : > { %v12017_v26 = vpop.eup %12016  ;;  %12026 = vrcp.f32 %v9174_v7  ;;  %v8916_v29 = vpop.permute.xlu0 %8915  ;;  %v9314_v46 = vmul.f32 %v12011_v21, %v9278_v54 }
 0x7b3   : > { %12028 = vpow2.f32 %v9127_v12  ;;  %v9129_v2 = vmul.f32 1.442695, %v9070_v3  ;;  %v14751_v48 = vsub.f32 %v14540_v41, %v8916_v29  ;;  %v9421_v4 = vsel %vm9349_vm6, %v9313_v8, %v9385_v50 }
 0x7b4   : > { %v12019_v32 = vpop.eup %12018  ;;  %v8918_v1 = vpop.permute.xlu1 %8917  ;;  %v9243_v16 = vmul.f32 %v12017_v26, %v14727_v63  ;;  %9507 = vrot.lane.b32.xlu0 %v9421_v4, %s12105_s22  ;;  %v9386_v40 = vsub.f32 1.0, %v9314_v46  ;;  %vm9587_vm6 = vcmask 48128  }
 0x7b5   : > { %v12021_v30 = vpop.eup %12020  ;;  %12030 = vpow2.f32 %v9129_v2  ;;  %v9035_v36 = vand.u32 2147483647, %v14751_v48  ;;  %v14756_v42 = vsub.f32 %v14543_v38, %v8918_v1  ;;  %v9244_v12 = vmul.f32 %v12019_v32, %v9172_v33 }
 0x7b6   : > { %v14759_v47 = vadd.f32 1.0, %v12021_v30  ;;  %v9279_v37 = vsub.f32 2.0, %v9243_v16  ;;  %v9422_v54 = vsel %vm9350_vm7, %v9314_v46, %v9386_v40  ;;  %vm9359_vm0 = vcmp.ge.f32.partialorder %v14751_v48, 0.0 }
 0x7b7   : > { %v12023_v21 = vpop.eup %12022  ;;  %v9071_v8 = vsub.f32 0.0, %v9035_v36  ;;  %v9036_v63 = vand.u32 2147483647, %v14756_v42  ;;  %9509 = vrot.lane.b32.xlu1 %v9422_v54, %s12105_s22  ;;  %v9280_v1 = vsub.f32 2.0, %v9244_v12  ;;  %vm9360_vm1 = vcmp.ge.f32.partialorder %v14756_v42, 0.0 }
 0x7b8   : > { %12032 = vrcp.f32 %v14759_v47  ;;  %v9176_v3 = vadd.f32 1.0, %v12023_v21  ;;  %v9315_v29 = vmul.f32 %v12017_v26, %v9279_v37  ;;  %vm9624_vm7 = vcmask 97280  }
 0x7b9   : > { %v9131_v50 = vmul.f32 1.442695, %v9071_v8  ;;  %v9072_v2 = vsub.f32 0.0, %v9036_v63  ;;  %v9316_v36 = vmul.f32 %v12019_v32, %v9280_v1 }
 0x7ba   : > { %v12025_v4 = vpop.eup %12024  ;;  %12034 = vrcp.f32 %v9176_v3  ;;  %v8920_v33 = vpop.permute.xlu0 %8919  ;;  %v9387_v16 = vsub.f32 1.0, %v9315_v29 }
 0x7bb   : > { %12036 = vpow2.f32 %v9131_v50  ;;  %v9133_v9 = vmul.f32 1.442695, %v9072_v2  ;;  %v14767_v30 = vsub.f32 %v14550_v53, %v8920_v33  ;;  %v9245_v40 = vmul.f32 %v12025_v4, %v14743_v20 }
 0x7bc   : > { %v12027_v21 = vpop.eup %12026  ;;  %v8922_v46 = vpop.permute.xlu1 %8921  ;;  %v9423_v26 = vsel %vm9351_vm8, %v9315_v29, %v9387_v16  ;;  %v9388_v63 = vsub.f32 1.0, %v9316_v36  ;;  %vm9661_vm8 = vcmask 195584  }
 0x7bd   : > { %v12029_v37 = vpop.eup %12028  ;;  %12038 = vpow2.f32 %v9133_v9  ;;  %v9037_v12 = vand.u32 2147483647, %v14767_v30  ;;  %v14772_v28 = vsub.f32 %v14553_v57, %v8922_v46  ;;  %9511 = vrot.lane.b32.xlu0 %v9423_v26, %s12105_s22  ;;  %v9281_v54 = vsub.f32 2.0, %v9245_v40 }
 0x7be   : > { %v14775_v8 = vadd.f32 1.0, %v12029_v37  ;;  %v9246_v50 = vmul.f32 %v12027_v21, %v9174_v7  ;;  %v9424_v1 = vsel %vm9352_vm9, %v9316_v36, %v9388_v63  ;;  %vm9361_vm2 = vcmp.ge.f32.partialorder %v14767_v30, 0.0 }
 0x7bf   : > { %v12031_v32 = vpop.eup %12030  ;;  %v9073_v29 = vsub.f32 0.0, %v9037_v12  ;;  %v9038_v20 = vand.u32 2147483647, %v14772_v28  ;;  %v9317_v33 = vmul.f32 %v12025_v4, %v9281_v54  ;;  %9513 = vrot.lane.b32.xlu1 %v9424_v1, %s12105_s22  ;;  %vm9362_vm3 = vcmp.ge.f32.partialorder %v14772_v28, 0.0 }
 0x7c0   : > { %12040 = vrcp.f32 %v14775_v8  ;;  %v9178_v2 = vadd.f32 1.0, %v12031_v32  ;;  %v9282_v46 = vsub.f32 2.0, %v9246_v50 }
 0x7c1   : > { %v9135_v16 = vmul.f32 1.442695, %v9073_v29  ;;  %v9074_v9 = vsub.f32 0.0, %v9038_v20  ;;  %v9389_v40 = vsub.f32 1.0, %v9317_v33 }
 0x7c2   : > { %v12033_v26 = vpop.eup %12032  ;;  %12042 = vrcp.f32 %v9178_v2  ;;  %v8924_v7 = vpop.permute.xlu0 %8923  ;;  %v9318_v12 = vmul.f32 %v12027_v21, %v9282_v46 }
 0x7c3   : > { %12044 = vpow2.f32 %v9135_v16  ;;  %v9137_v10 = vmul.f32 1.442695, %v9074_v9  ;;  %v14783_v37 = vsub.f32 %v14560_v27, %v8924_v7  ;;  %v9425_v4 = vsel %vm9353_vm10, %v9317_v33, %v9389_v40 }
 0x7c4   : > { %v12035_v32 = vpop.eup %12034  ;;  %v8926_v36 = vpop.permute.xlu1 %8925  ;;  %v9247_v63 = vmul.f32 %v12033_v26, %v14759_v47  ;;  %9515 = vrot.lane.b32.xlu0 %v9425_v4, %s12105_s22  ;;  %v9390_v20 = vsub.f32 1.0, %v9318_v12 }
 0x7c5   : > { %v12037_v54 = vpop.eup %12036  ;;  %12046 = vpow2.f32 %v9137_v10  ;;  %v9039_v50 = vand.u32 2147483647, %v14783_v37  ;;  %v14788_v17 = vsub.f32 %v14563_v56, %v8926_v36  ;;  %v9248_v16 = vmul.f32 %v12035_v32, %v9176_v3 }
 0x7c6   : > { %v14791_v29 = vadd.f32 1.0, %v12037_v54  ;;  %v9283_v1 = vsub.f32 2.0, %v9247_v63  ;;  %v9426_v46 = vsel %vm9354_vm11, %v9318_v12, %v9390_v20  ;;  %vm9363_vm4 = vcmp.ge.f32.partialorder %v14783_v37, 0.0 }
 0x7c7   : > { %v12039_v21 = vpop.eup %12038  ;;  %v9075_v33 = vsub.f32 0.0, %v9039_v50  ;;  %v9040_v47 = vand.u32 2147483647, %v14788_v17  ;;  %9517 = vrot.lane.b32.xlu1 %v9426_v46, %s12105_s22  ;;  %v9284_v36 = vsub.f32 2.0, %v9248_v16  ;;  %vm9364_vm5 = vcmp.ge.f32.partialorder %v14788_v17, 0.0 }
 0x7c8   : > { %12048 = vrcp.f32 %v14791_v29  ;;  %v9180_v9 = vadd.f32 1.0, %v12039_v21  ;;  %v9319_v7 = vmul.f32 %v12033_v26, %v9283_v1 }
 0x7c9   : > { %v9139_v40 = vmul.f32 1.442695, %v9075_v33  ;;  %v9076_v10 = vsub.f32 0.0, %v9040_v47  ;;  %v9320_v50 = vmul.f32 %v12035_v32, %v9284_v36 }
 0x7ca   : > { %v12041_v4 = vpop.eup %12040  ;;  %12050 = vrcp.f32 %v9180_v9  ;;  %v8928_v3 = vpop.permute.xlu0 %8927  ;;  %v9391_v63 = vsub.f32 1.0, %v9319_v7 }
 0x7cb   : > { %12052 = vpow2.f32 %v9139_v40  ;;  %v9141_v5 = vmul.f32 1.442695, %v9076_v10  ;;  %v14799_v54 = vsub.f32 %v14574_v34, %v8928_v3  ;;  %v9249_v20 = vmul.f32 %v12041_v4, %v14775_v8 }
 0x7cc   : > { %v12043_v21 = vpop.eup %12042  ;;  %v8930_v12 = vpop.permute.xlu1 %8929  ;;  %v9427_v26 = vsel %vm9355_vm12, %v9319_v7, %v9391_v63  ;;  %v9392_v47 = vsub.f32 1.0, %v9320_v50 }
 0x7cd   : > { %v12045_v1 = vpop.eup %12044  ;;  %12054 = vpow2.f32 %v9141_v5  ;;  %v9041_v16 = vand.u32 2147483647, %v14799_v54  ;;  %v14804_v44 = vsub.f32 %v14580_v18, %v8930_v12  ;;  %9519 = vrot.lane.b32.xlu0 %v9427_v26, %s12105_s22  ;;  %v9285_v46 = vsub.f32 2.0, %v9249_v20 }
 0x7ce   : > { %v14807_v33 = vadd.f32 1.0, %v12045_v1  ;;  %v9250_v40 = vmul.f32 %v12043_v21, %v9178_v2  ;;  %v9428_v36 = vsel %vm9356_vm13, %v9320_v50, %v9392_v47  ;;  %vm9365_vm9 = vcmp.ge.f32.partialorder %v14799_v54, 0.0 }
 0x7cf   : > { %v12047_v32 = vpop.eup %12046  ;;  %v9077_v7 = vsub.f32 0.0, %v9041_v16  ;;  %v9042_v8 = vand.u32 2147483647, %v14804_v44  ;;  %v9321_v3 = vmul.f32 %v12041_v4, %v9285_v46  ;;  %9521 = vrot.lane.b32.xlu1 %v9428_v36, %s12105_s22  ;;  %vm9366_vm10 = vcmp.ge.f32.partialorder %v14804_v44, 0.0 }
 0x7d0   : > { %12056 = vrcp.f32 %v14807_v33  ;;  %v9182_v10 = vadd.f32 1.0, %v12047_v32  ;;  %v9286_v12 = vsub.f32 2.0, %v9250_v40 }
 0x7d1   : > { %v9143_v63 = vmul.f32 1.442695, %v9077_v7  ;;  %v9078_v5 = vsub.f32 0.0, %v9042_v8  ;;  %v9393_v20 = vsub.f32 1.0, %v9321_v3 }
 0x7d2   : > { %v12049_v26 = vpop.eup %12048  ;;  %12058 = vrcp.f32 %v9182_v10  ;;  %v8932_v2 = vpop.permute.xlu0 %8931  ;;  %v9322_v16 = vmul.f32 %v12043_v21, %v9286_v12 }
 0x7d3   : > { %12060 = vpow2.f32 %v9143_v63  ;;  %v9145_v59 = vmul.f32 1.442695, %v9078_v5  ;;  %v14815_v1 = vsub.f32 %v14592_v23, %v8932_v2  ;;  %v9429_v4 = vsel %vm9357_vm14, %v9321_v3, %v9393_v20 }
 0x7d4   : > { %v12051_v32 = vpop.eup %12050  ;;  %v8934_v50 = vpop.permute.xlu1 %8933  ;;  %v9251_v47 = vmul.f32 %v12049_v26, %v14791_v29  ;;  %9523 = vrot.lane.b32.xlu0 %v9429_v4, %s12105_s22  ;;  %v9394_v8 = vsub.f32 1.0, %v9322_v16 }
 0x7d5   : > { %v12053_v46 = vpop.eup %12052  ;;  %12062 = vpow2.f32 %v9145_v59  ;;  %v9043_v40 = vand.u32 2147483647, %v14815_v1  ;;  %v14820_v60 = vsub.f32 %v14598_v24, %v8934_v50  ;;  %v9252_v63 = vmul.f32 %v12051_v32, %v9180_v9 }
 0x7d6   : > { %v9183_v7 = vadd.f32 1.0, %v12053_v46  ;;  %v9287_v36 = vsub.f32 2.0, %v9251_v47  ;;  %v9430_v12 = vsel %vm9358_vm15, %v9322_v16, %v9394_v8  ;;  %vm9367_vm11 = vcmp.ge.f32.partialorder %v14815_v1, 0.0 }
 0x7d7   : > { %v12055_v5 = vpop.eup %12054  ;;  %v9079_v21 = vsub.f32 0.0, %v9043_v40  ;;  %v9044_v3 = vand.u32 2147483647, %v14820_v60  ;;  %9525 = vrot.lane.b32.xlu1 %v9430_v12, %s12105_s22  ;;  %v9288_v50 = vsub.f32 2.0, %v9252_v63  ;;  %vm9368_vm12 = vcmp.ge.f32.partialorder %v14820_v60, 0.0 }
 0x7d8   : > { %12064 = vrcp.f32 %v9183_v7  ;;  %v9184_v29 = vadd.f32 1.0, %v12055_v5  ;;  %v9323_v2 = vmul.f32 %v12049_v26, %v9287_v36 }
 0x7d9   : > { %v9147_v20 = vmul.f32 1.442695, %v9079_v21  ;;  %v9080_v59 = vsub.f32 0.0, %v9044_v3  ;;  %v9324_v40 = vmul.f32 %v12051_v32, %v9288_v50 }
 0x7da   : > { %v12057_v4 = vpop.eup %12056  ;;  %12066 = vrcp.f32 %v9184_v29  ;;  %v8936_v9 = vpop.permute.xlu0 %8935  ;;  %v9395_v47 = vsub.f32 1.0, %v9323_v2 }
 0x7db   : > { %12068 = vpow2.f32 %v9147_v20  ;;  %v9149_v43 = vmul.f32 1.442695, %v9080_v59  ;;  %v14828_v46 = vsub.f32 %v14613_v39, %v8936_v9  ;;  %v9253_v8 = vmul.f32 %v12057_v4, %v14807_v33 }
 0x7dc   : > { %v12059_v5 = vpop.eup %12058  ;;  %v8938_v16 = vpop.permute.xlu1 %8937  ;;  %v9431_v26 = vsel %vm9359_vm0, %v9323_v2, %v9395_v47  ;;  %v9396_v3 = vsub.f32 1.0, %v9324_v40 }
 0x7dd   : > { %v12061_v36 = vpop.eup %12060  ;;  %12070 = vpow2.f32 %v9149_v43  ;;  %v9045_v63 = vand.u32 2147483647, %v14828_v46  ;;  %v14833_v48 = vsub.f32 %v14617_v61, %v8938_v16  ;;  %9527 = vrot.lane.b32.xlu0 %v9431_v26, %s12105_s22  ;;  %v9289_v12 = vsub.f32 2.0, %v9253_v8 }
 0x7de   : > { %v9185_v21 = vadd.f32 1.0, %v12061_v36  ;;  %v9254_v20 = vmul.f32 %v12059_v5, %v9182_v10  ;;  %v9432_v50 = vsel %vm9360_vm1, %v9324_v40, %v9396_v3  ;;  %vm9369_vm13 = vcmp.ge.f32.partialorder %v14828_v46, 0.0 }
 0x7df   : > { %v12063_v59 = vpop.eup %12062  ;;  %v9081_v32 = vsub.f32 0.0, %v9045_v63  ;;  %v9046_v2 = vand.u32 2147483647, %v14833_v48  ;;  %v9325_v9 = vmul.f32 %v12057_v4, %v9289_v12  ;;  %9529 = vrot.lane.b32.xlu1 %v9432_v50, %s12105_s22  ;;  %vm9370_vm14 = vcmp.ge.f32.partialorder %v14833_v48, 0.0 }
 0x7e0   : > { %12072 = vrcp.f32 %v9185_v21  ;;  %v9186_v33 = vadd.f32 1.0, %v12063_v59  ;;  %v9290_v16 = vsub.f32 2.0, %v9254_v20 }
 0x7e1   : > { %v9151_v47 = vmul.f32 1.442695, %v9081_v32  ;;  %v9082_v43 = vsub.f32 0.0, %v9046_v2  ;;  %v9397_v10 = vsub.f32 1.0, %v9325_v9 }
 0x7e2   : > { %v12065_v26 = vpop.eup %12064  ;;  %12074 = vrcp.f32 %v9186_v33  ;;  %v9326_v42 = vmul.f32 %v12059_v5, %v9290_v16 }
 0x7e3   : > { %12076 = vpow2.f32 %v9151_v47  ;;  %v9153_v8 = vmul.f32 1.442695, %v9082_v43  ;;  %v9255_v36 = vmul.f32 %v12065_v26, %v9183_v7  ;;  %v9433_v61 = vsel %vm9361_vm2, %v9325_v9, %v9397_v10 }
 0x7e4   : > { %v12067_v63 = vpop.eup %12066  ;;  %9531 = vrot.lane.b32.xlu0 %v9433_v61, %s12105_s22  ;;  %v9398_v4 = vsub.f32 1.0, %v9326_v42 }
 0x7e5   : > { %v12069_v39 = vpop.eup %12068  ;;  %12078 = vpow2.f32 %v9153_v8  ;;  %v9291_v40 = vsub.f32 2.0, %v9255_v36  ;;  %v9256_v3 = vmul.f32 %v12067_v63, %v9184_v29 }
 0x7e6   : > { %v9187_v12 = vadd.f32 1.0, %v12069_v39  ;;  %v9434_v20 = vsel %vm9362_vm3, %v9326_v42, %v9398_v4 }
 0x7e7   : > { %v12071_v30 = vpop.eup %12070  ;;  %v9327_v59 = vmul.f32 %v12065_v26, %v9291_v40  ;;  %v9292_v32 = vsub.f32 2.0, %v9256_v3  ;;  %9533 = vrot.lane.b32.xlu1 %v9434_v20, %s12105_s22 }
 0x7e8   : > { %12080 = vrcp.f32 %v9187_v12  ;;  %v9188_v5 = vadd.f32 1.0, %v12071_v30 }
 0x7e9   : > { %v9399_v7 = vsub.f32 1.0, %v9327_v59  ;;  %v9328_v2 = vmul.f32 %v12067_v63, %v9292_v32 }
 0x7ea   : > { %v12073_v50 = vpop.eup %12072  ;;  %12082 = vrcp.f32 %v9188_v5 }
 0x7eb   : > { %v9435_v61 = vsel %vm9363_vm4, %v9327_v59, %v9399_v7  ;;  %v9400_v29 = vsub.f32 1.0, %v9328_v2  ;;  %v9257_v28 = vmul.f32 %v12073_v50, %v9185_v21 }
 0x7ec   : > { %v12075_v9 = vpop.eup %12074  ;;  %9535 = vrot.lane.b32.xlu0 %v9435_v61, %s12105_s22 }
 0x7ed   : > { %v12077_v39 = vpop.eup %12076  ;;  %v9436_v47 = vsel %vm9364_vm5, %v9328_v2, %v9400_v29  ;;  %v9293_v43 = vsub.f32 2.0, %v9257_v28  ;;  %v9258_v16 = vmul.f32 %v12075_v9, %v9186_v33 }
 0x7ee   : > { %v9189_v26 = vadd.f32 1.0, %v12077_v39  ;;  %9537 = vrot.lane.b32.xlu1 %v9436_v47, %s12105_s22 }
 0x7ef   : > { %v12079_v37 = vpop.eup %12078  ;;  %v9480_v17 = vpop.permute.xlu0 %9479  ;;  %v9329_v21 = vmul.f32 %v12073_v50, %v9293_v43  ;;  %v9294_v10 = vsub.f32 2.0, %v9258_v16 }
 0x7f0   : > { %12084 = vrcp.f32 %v9189_v26  ;;  %v9190_v8 = vadd.f32 1.0, %v12079_v37  ;;  %v9588_v33 = vsel %vm9587_vm6, %v14420_v22, %v9480_v17 }
 0x7f1   : > { %v9625_v42 = vsel %vm9624_vm7, %v9588_v33, %v14420_v22  ;;  %v9401_v36 = vsub.f32 1.0, %v9329_v21  ;;  %v9330_v63 = vmul.f32 %v12075_v9, %v9294_v10  ;;  %v15248_v33 = vld [vmem:[#allocation4_spill] sm:$0xff] }
 0x7f2   : > { %v12081_v4 = vpop.eup %12080  ;;  %12086 = vrcp.f32 %v9190_v8  ;;  %9662 = vst.msk [vmem:[%s14851_s19] sm:$0xff] %vm9661_vm8, %v9625_v42  ;;  %v9482_v40 = vpop.permute.xlu1 %9481 }
 0x7f3   : > { %v9437_v3 = vsel %vm9365_vm9, %v9329_v21, %v9401_v36  ;;  %v9402_v30 = vsub.f32 1.0, %v9330_v63  ;;  %v9259_v20 = vmul.f32 %v12081_v4, %v9187_v12  ;;  %v9589_v32 = vsel %vm9587_vm6, %v14425_v58, %v9482_v40 }
 0x7f4   : > { %v12083_v59 = vpop.eup %12082  ;;  %9539 = vrot.lane.b32.xlu0 %v9437_v3, %s12105_s22  ;;  %v9626_v22 = vsel %vm9624_vm7, %v9589_v32, %v14425_v58  ;;  %v15249_v3 = vld [vmem:[#allocation5_spill] sm:$0xff]  ;;  %v15250_v32 = vld [vmem:[#allocation6_spill] sm:$0xff] }
 0x7f5   : > { %v9438_v54 = vsel %vm9366_vm10, %v9330_v63, %v9402_v30  ;;  %v9295_v7 = vsub.f32 2.0, %v9259_v20  ;;  %v9260_v2 = vmul.f32 %v12083_v59, %v9188_v5  ;;  %9663 = vst.msk [vmem:[%s14851_s19 + $0x8] sm:$0xff] %vm9661_vm8, %v9626_v22 }
 0x7f6   : > { %9541 = vrot.lane.b32.xlu1 %v9438_v54, %s12105_s22 }
 0x7f7   : > { %v9484_v12 = vpop.permute.xlu0 %9483  ;;  %v9331_v50 = vmul.f32 %v12081_v4, %v9295_v7  ;;  %v9296_v61 = vsub.f32 2.0, %v9260_v2  ;;  %v15251_v7 = vld [vmem:[#allocation7_spill] sm:$0xff] }
 0x7f8   : > { %v9590_v44 = vsel %vm9587_vm6, %v14430_v51, %v9484_v12 }
 0x7f9   : > { %v9627_v29 = vsel %vm9624_vm7, %v9590_v44, %v14430_v51  ;;  %v9403_v28 = vsub.f32 1.0, %v9331_v50  ;;  %v9332_v9 = vmul.f32 %v12083_v59, %v9296_v61  ;;  %v15252_v61 = vld [vmem:[#allocation8_spill] sm:$0xff] }
 0x7fa   : > { %v12085_v58 = vpop.eup %12084  ;;  %9664 = vst.msk [vmem:[%s14851_s19 + $0x10] sm:$0xff] %vm9661_vm8, %v9627_v29  ;;  %v9486_v5 = vpop.permute.xlu1 %9485 }
 0x7fb   : > { %v9439_v39 = vsel %vm9367_vm11, %v9331_v50, %v9403_v28  ;;  %v9404_v47 = vsub.f32 1.0, %v9332_v9  ;;  %v9261_v43 = vmul.f32 %v12085_v58, %v9189_v26  ;;  %v9591_v37 = vsel %vm9587_vm6, %v14435_v11, %v9486_v5 }
 0x7fc   : > { %v12087_v16 = vpop.eup %12086  ;;  %9543 = vrot.lane.b32.xlu0 %v9439_v39, %s12105_s22  ;;  %v9628_v51 = vsel %vm9624_vm7, %v9591_v37, %v14435_v11 }
 0x7fd   : > { %v9440_v17 = vsel %vm9368_vm12, %v9332_v9, %v9404_v47  ;;  %v9297_v1 = vsub.f32 2.0, %v9261_v43  ;;  %v9262_v21 = vmul.f32 %v12087_v16, %v9190_v8  ;;  %9665 = vst.msk [vmem:[%s14851_s19 + $0x18] sm:$0xff] %vm9661_vm8, %v9628_v51  ;;  %v15253_v9 = vld [vmem:[#allocation9_spill] sm:$0xff] }
 0x7fe   : > { %9545 = vrot.lane.b32.xlu1 %v9440_v17, %s12105_s22 }
 0x7ff   : > { %v9488_v26 = vpop.permute.xlu0 %9487  ;;  %v9333_v10 = vmul.f32 %v12085_v58, %v9297_v1  ;;  %v9298_v60 = vsub.f32 2.0, %v9262_v21 }
 0x800   : > { %v9592_v42 = vsel %vm9587_vm6, %v15248_v33, %v9488_v26 }
 0x801   : > { %v9629_v36 = vsel %vm9624_vm7, %v9592_v42, %v15248_v33  ;;  %v9405_v63 = vsub.f32 1.0, %v9333_v10  ;;  %v9334_v4 = vmul.f32 %v12087_v16, %v9298_v60  ;;  %v9490_v11 = vpop.permute.xlu1 %9489 }
 0x802   : > { %9666 = vst.msk [vmem:[%s14851_s19 + $0x20] sm:$0xff] %vm9661_vm8, %v9629_v36  ;;  %v9593_v30 = vsel %vm9587_vm6, %v15249_v3, %v9490_v11 }
 0x803   : > { %v9441_v8 = vsel %vm9369_vm13, %v9333_v10, %v9405_v63  ;;  %v9406_v40 = vsub.f32 1.0, %v9334_v4  ;;  %v9630_v20 = vsel %vm9624_vm7, %v9593_v30, %v15249_v3 }
 0x804   : > { %9547 = vrot.lane.b32.xlu0 %v9441_v8, %s12105_s22  ;;  %9667 = vst.msk [vmem:[%s14851_s19 + $0x28] sm:$0xff] %vm9661_vm8, %v9630_v20 }
 0x805   : > { %v9442_v59 = vsel %vm9370_vm14, %v9334_v4, %v9406_v40 }
 0x806   : > { %9549 = vrot.lane.b32.xlu1 %v9442_v59, %s12105_s22  ;;  %v9492_v46 = vpop.permute.xlu0 %9491 }
 0x807   : > { %v9594_v22 = vsel %vm9587_vm6, %v15250_v32, %v9492_v46 }
 0x808   : > { %v9631_v48 = vsel %vm9624_vm7, %v9594_v22, %v15250_v32 }
 0x809   : > { %9668 = vst.msk [vmem:[%s14851_s19 + $0x30] sm:$0xff] %vm9661_vm8, %v9631_v48  ;;  %v9494_v54 = vpop.permute.xlu1 %9493 }
 0x80a   : > { %v9595_v2 = vsel %vm9587_vm6, %v15251_v7, %v9494_v54 }
 0x80b   : > { %v9632_v12 = vsel %vm9624_vm7, %v9595_v2, %v15251_v7 }
 0x80c   : > { %9669 = vst.msk [vmem:[%s14851_s19 + $0x38] sm:$0xff] %vm9661_vm8, %v9632_v12 }
 0x80f   : > { %v9496_v50 = vpop.permute.xlu0 %9495 }
 0x810   : > { %v9596_v44 = vsel %vm9587_vm6, %v15252_v61, %v9496_v50 }
 0x811   : > { %v9633_v29 = vsel %vm9624_vm7, %v9596_v44, %v15252_v61  ;;  %v9498_v28 = vpop.permute.xlu1 %9497 }
 0x812   : > { %9670 = vst.msk [vmem:[%s14851_s19 + $0x40] sm:$0xff] %vm9661_vm8, %v9633_v29  ;;  %v9597_v58 = vsel %vm9587_vm6, %v15253_v9, %v9498_v28 }
 0x813   : > { %v9634_v5 = vsel %vm9624_vm7, %v9597_v58, %v15253_v9 }
 0x814   : > { %9671 = vst.msk [vmem:[%s14851_s19 + $0x48] sm:$0xff] %vm9661_vm8, %v9634_v5 }
 0x816   : > { %v9500_v39 = vpop.permute.xlu0 %9499 }
 0x817   : > { %v9598_v47 = vsel %vm9587_vm6, %v14470_v31, %v9500_v39 }
 0x818   : > { %v9635_v43 = vsel %vm9624_vm7, %v9598_v47, %v14470_v31 }
 0x819   : > { %9672 = vst.msk [vmem:[%s14851_s19 + $0x50] sm:$0xff] %vm9661_vm8, %v9635_v43  ;;  %v9502_v16 = vpop.permute.xlu1 %9501 }
 0x81a   : > { %v9599_v37 = vsel %vm9587_vm6, %v14473_v62, %v9502_v16 }
 0x81b   : > { %v9636_v51 = vsel %vm9624_vm7, %v9599_v37, %v14473_v62 }
 0x81c   : > { %9673 = vst.msk [vmem:[%s14851_s19 + $0x58] sm:$0xff] %vm9661_vm8, %v9636_v51 }
 0x81f   : > { %v9504_v17 = vpop.permute.xlu0 %9503 }
 0x820   : > { %v9600_v1 = vsel %vm9587_vm6, %v14480_v0, %v9504_v17 }
 0x821   : > { %v9637_v31 = vsel %vm9624_vm7, %v9600_v1, %v14480_v0  ;;  %v9506_v21 = vpop.permute.xlu1 %9505 }
 0x822   : > { %9674 = vst.msk [vmem:[%s14851_s19 + $0x60] sm:$0xff] %vm9661_vm8, %v9637_v31  ;;  %v9601_v26 = vsel %vm9587_vm6, %v14483_v19, %v9506_v21 }
 0x823   : > { %v9638_v62 = vsel %vm9624_vm7, %v9601_v26, %v14483_v19 }
 0x824   : > { %9675 = vst.msk [vmem:[%s14851_s19 + $0x68] sm:$0xff] %vm9661_vm8, %v9638_v62  ;;  %v15254_v62 = vld [vmem:[#allocation10_spill] sm:$0xff] }
 0x826   : > { %v9508_v10 = vpop.permute.xlu0 %9507 }
 0x827   : > { %v9602_v60 = vsel %vm9587_vm6, %v14490_v45, %v9508_v10 }
 0x828   : > { %v9639_v0 = vsel %vm9624_vm7, %v9602_v60, %v14490_v45 }
 0x829   : > { %9676 = vst.msk [vmem:[%s14851_s19 + $0x70] sm:$0xff] %vm9661_vm8, %v9639_v0  ;;  %v9510_v33 = vpop.permute.xlu1 %9509 }
 0x82a   : > { %v9603_v42 = vsel %vm9587_vm6, %v14493_v15, %v9510_v33 }
 0x82b   : > { %v9640_v19 = vsel %vm9624_vm7, %v9603_v42, %v14493_v15 }
 0x82c   : > { %9677 = vst.msk [vmem:[%s14851_s19 + $0x78] sm:$0xff] %vm9661_vm8, %v9640_v19 }
 0x82f   : > { %v9512_v36 = vpop.permute.xlu0 %9511 }
 0x830   : > { %v9604_v63 = vsel %vm9587_vm6, %v14500_v6, %v9512_v36 }
 0x831   : > { %v9641_v45 = vsel %vm9624_vm7, %v9604_v63, %v14500_v6  ;;  %v9514_v4 = vpop.permute.xlu1 %9513 }
 0x832   : > { %9678 = vst.msk [vmem:[%s14851_s19 + $0x80] sm:$0xff] %vm9661_vm8, %v9641_v45  ;;  %v9605_v11 = vsel %vm9587_vm6, %v14503_v49, %v9514_v4 }
 0x833   : > { %v9642_v15 = vsel %vm9624_vm7, %v9605_v11, %v14503_v49 }
 0x834   : > { %9679 = vst.msk [vmem:[%s14851_s19 + $0x88] sm:$0xff] %vm9661_vm8, %v9642_v15 }
 0x836   : > { %v9516_v8 = vpop.permute.xlu0 %9515 }
 0x837   : > { %v9606_v40 = vsel %vm9587_vm6, %v14510_v52, %v9516_v8 }
 0x838   : > { %v9643_v6 = vsel %vm9624_vm7, %v9606_v40, %v14510_v52 }
 0x839   : > { %9680 = vst.msk [vmem:[%s14851_s19 + $0x90] sm:$0xff] %vm9661_vm8, %v9643_v6  ;;  %v9518_v3 = vpop.permute.xlu1 %9517 }
 0x83a   : > { %v9607_v30 = vsel %vm9587_vm6, %v14513_v13, %v9518_v3 }
 0x83b   : > { %v9644_v49 = vsel %vm9624_vm7, %v9607_v30, %v14513_v13 }
 0x83c   : > { %9681 = vst.msk [vmem:[%s14851_s19 + $0x98] sm:$0xff] %vm9661_vm8, %v9644_v49 }
 0x83f   : > { %v9520_v20 = vpop.permute.xlu0 %9519 }
 0x840   : > { %v9608_v59 = vsel %vm9587_vm6, %v14520_v55, %v9520_v20 }
 0x841   : > { %v9645_v52 = vsel %vm9624_vm7, %v9608_v59, %v14520_v55  ;;  %v9522_v46 = vpop.permute.xlu1 %9521 }
 0x842   : > { %9682 = vst.msk [vmem:[%s14851_s19 + $0xa0] sm:$0xff] %vm9661_vm8, %v9645_v52  ;;  %v9609_v32 = vsel %vm9587_vm6, %v14523_v35, %v9522_v46 }
 0x843   : > { %v9646_v13 = vsel %vm9624_vm7, %v9609_v32, %v14523_v35 }
 0x844   : > { %9683 = vst.msk [vmem:[%s14851_s19 + $0xa8] sm:$0xff] %vm9661_vm8, %v9646_v13 }
 0x846   : > { %v9524_v22 = vpop.permute.xlu0 %9523 }
 0x847   : > { %v9610_v48 = vsel %vm9587_vm6, %v14530_v25, %v9524_v22 }
 0x848   : > { %v9647_v55 = vsel %vm9624_vm7, %v9610_v48, %v14530_v25 }
 0x849   : > { %9684 = vst.msk [vmem:[%s14851_s19 + $0xb0] sm:$0xff] %vm9661_vm8, %v9647_v55  ;;  %v9526_v54 = vpop.permute.xlu1 %9525 }
 0x84a   : > { %v9611_v7 = vsel %vm9587_vm6, %v14533_v14, %v9526_v54 }
 0x84b   : > { %v9648_v35 = vsel %vm9624_vm7, %v9611_v7, %v14533_v14 }
 0x84c   : > { %9685 = vst.msk [vmem:[%s14851_s19 + $0xb8] sm:$0xff] %vm9661_vm8, %v9648_v35 }
 0x84f   : > { %v9528_v2 = vpop.permute.xlu0 %9527 }
 0x850   : > { %v9612_v12 = vsel %vm9587_vm6, %v14540_v41, %v9528_v2 }
 0x851   : > { %v9649_v25 = vsel %vm9624_vm7, %v9612_v12, %v14540_v41  ;;  %v9530_v50 = vpop.permute.xlu1 %9529 }
 0x852   : > { %9686 = vst.msk [vmem:[%s14851_s19 + $0xc0] sm:$0xff] %vm9661_vm8, %v9649_v25  ;;  %v9613_v61 = vsel %vm9587_vm6, %v14543_v38, %v9530_v50 }
 0x853   : > { %v9650_v14 = vsel %vm9624_vm7, %v9613_v61, %v14543_v38 }
 0x854   : > { %9687 = vst.msk [vmem:[%s14851_s19 + $0xc8] sm:$0xff] %vm9661_vm8, %v9650_v14 }
 0x856   : > { %v9532_v44 = vpop.permute.xlu0 %9531 }
 0x857   : > { %v9614_v29 = vsel %vm9587_vm6, %v14550_v53, %v9532_v44 }
 0x858   : > { %v9651_v41 = vsel %vm9624_vm7, %v9614_v29, %v14550_v53 }
 0x859   : > { %9688 = vst.msk [vmem:[%s14851_s19 + $0xd0] sm:$0xff] %vm9661_vm8, %v9651_v41  ;;  %v9534_v28 = vpop.permute.xlu1 %9533 }
 0x85a   : > { %v9615_v9 = vsel %vm9587_vm6, %v14553_v57, %v9534_v28 }
 0x85b   : > { %v9652_v38 = vsel %vm9624_vm7, %v9615_v9, %v14553_v57 }
 0x85c   : > { %9689 = vst.msk [vmem:[%s14851_s19 + $0xd8] sm:$0xff] %vm9661_vm8, %v9652_v38 }
 0x85e   : > { %v9536_v58 = vpop.permute.xlu0 %9535 }
 0x85f   : > { %v9616_v5 = vsel %vm9587_vm6, %v14560_v27, %v9536_v58 }
 0x860   : > { %v9653_v53 = vsel %vm9624_vm7, %v9616_v5, %v14560_v27  ;;  %v9538_v39 = vpop.permute.xlu1 %9537 }
 0x861   : > { %9690 = vst.msk [vmem:[%s14851_s19 + $0xe0] sm:$0xff] %vm9661_vm8, %v9653_v53  ;;  %v9617_v47 = vsel %vm9587_vm6, %v14563_v56, %v9538_v39 }
 0x862   : > { %v9654_v57 = vsel %vm9624_vm7, %v9617_v47, %v14563_v56 }
 0x863   : > { %9691 = vst.msk [vmem:[%s14851_s19 + $0xe8] sm:$0xff] %vm9661_vm8, %v9654_v57 }
 0x866   : > { %v9540_v43 = vpop.permute.xlu0 %9539 }
 0x867   : > { %v9618_v16 = vsel %vm9587_vm6, %v14574_v34, %v9540_v43 }
 0x868   : > { %v9655_v27 = vsel %vm9624_vm7, %v9618_v16, %v14574_v34  ;;  %v9542_v37 = vpop.permute.xlu1 %9541 }
 0x869   : > { %9692 = vst.msk [vmem:[%s14851_s19 + $0xf0] sm:$0xff] %vm9661_vm8, %v9655_v27  ;;  %v9619_v51 = vsel %vm9587_vm6, %v14580_v18, %v9542_v37 }
 0x86a   : > { %v9656_v56 = vsel %vm9624_vm7, %v9619_v51, %v14580_v18 }
 0x86b   : > { %9693 = vst.msk [vmem:[%s14851_s19 + $0xf8] sm:$0xff] %vm9661_vm8, %v9656_v56 }
 0x86e   : > { %v9544_v17 = vpop.permute.xlu0 %9543 }
 0x86f   : > { %v9620_v1 = vsel %vm9587_vm6, %v14592_v23, %v9544_v17 }
 0x870   : > { %v9657_v34 = vsel %vm9624_vm7, %v9620_v1, %v14592_v23  ;;  %v9546_v31 = vpop.permute.xlu1 %9545  ;;  %v15255_v23 = vld [vmem:[#allocation11_spill] sm:$0xff] }
 0x871   : > { %9694 = vst.msk [vmem:[%s14851_s19 + $0x100] sm:$0xff] %vm9661_vm8, %v9657_v34  ;;  %v9621_v21 = vsel %vm9587_vm6, %v14598_v24, %v9546_v31 }
 0x872   : > { %v9658_v26 = vsel %vm9624_vm7, %v9621_v21, %v14598_v24 }
 0x873   : > { %9695 = vst.msk [vmem:[%s14851_s19 + $0x108] sm:$0xff] %vm9661_vm8, %v9658_v26 }
 0x876   : > { %v9548_v18 = vpop.permute.xlu0 %9547 }
 0x877   : > { %v9622_v10 = vsel %vm9587_vm6, %v15254_v62, %v9548_v18 }
 0x878   : > { %v9659_v60 = vsel %vm9624_vm7, %v9622_v10, %v15254_v62  ;;  %v9550_v0 = vpop.permute.xlu1 %9549 }
 0x879   : > { %9696 = vst.msk [vmem:[%s14851_s19 + $0x110] sm:$0xff] %vm9661_vm8, %v9659_v60  ;;  %v9623_v33 = vsel %vm9587_vm6, %v15255_v23, %v9550_v0 }
 0x87a   : > { %v9660_v42 = vsel %vm9624_vm7, %v9623_v33, %v15255_v23 }
 0x87b   : > { %9697 = vst.msk [vmem:[%s14851_s19 + $0x118] sm:$0xff] %vm9661_vm8, %v9660_v42 }
 0x87c PF: > { %s15_s18 = sadd.s32 1, %s12100_s18  }
 0x87d   : > { %p12_p4 = scmp.ge.s32.totalorder %s15_s18, 4  }
 0x87f   :  { %14 = sbr.rel (!%p12_p4) target bundleno = 1 (0x1), region = 78 }

</bundles_post_ra>
